<compile_context>
chip_gen: v7x
topology: tpu7x:2x2x1
jax: 0.10.0
libtpu: 0.0.40
codegen_flags: <defaults>
</compile_context>

<pallas_src>
import math

import jax
import jax.numpy as jnp
from jax import lax
from jax.experimental import pallas as pl
from jax.experimental.pallas import tpu as pltpu  # noqa: F401  (kept for parity/debug)

# ------------------------- small synthetic AST config -------------------------
B = 2            # batch
T = 24           # time frames (max_length)
F = 16           # mel bins
PS = 8           # patch size
FS = 8           # frequency stride (== PS -> non-overlapping)
TS = 8           # time stride      (== PS -> non-overlapping)
FP = (F - PS) // FS + 1          # freq patches   = 2
TP = (T - PS) // TS + 1          # time patches   = 3
NUM_PATCHES = FP * TP            # 6
SEQ = NUM_PATCHES + 2            # + cls + distillation token = 8
H = 32           # hidden size
NH = 4           # attention heads
HD = H // NH     # head dim = 8
INTER = 128      # intermediate (MLP) size
L = 2            # encoder layers
C = 5            # num classes
EPS = 1e-12      # AST layer_norm_eps
PP = PS * PS     # flattened patch length = 64


# ------------------------------- kernel helpers --------------------------------
def _gelu(x):
    # TODO(synk): HF AST "gelu" is the exact erf GELU; tanh approximation used for
    # robust TPU lowering (matches jax.nn.gelu(approximate=True)).
    c = math.sqrt(2.0 / math.pi)
    return 0.5 * x * (1.0 + jnp.tanh(c * (x + 0.044715 * x * x * x)))


def _ln_normalize(v):
    # Normalize-only LayerNorm; the affine (g, b) is folded into downstream weights.
    mu = jnp.mean(v, axis=-1, keepdims=True)
    var = jnp.mean(jnp.square(v - mu), axis=-1, keepdims=True)
    return (v - mu) * lax.rsqrt(var + EPS)


# ------------------------------ fused forward kernel ---------------------------
def ast_fused_kernel(
    patches_ref,                 # (B*SEQ, PP)  rows 0,1 of each batch are zeros (cls/dist slots)
    patch_w_ref,                 # (PP, H)
    base_ref,                    # (B*SEQ, H)   cls/dist token + pos, or patch bias + pos
    wq_ref, bq_ref,              # (L*NH, H, HD), (L*NH, 1, HD)  [ln1 affine + 1/sqrt(HD) folded]
    wk_ref, bk_ref,              # (L*NH, H, HD), (L*NH, 1, HD)  [ln1 affine folded]
    wv_ref, bv_ref,              # (L*NH, H, HD), (L*NH, 1, HD)  [ln1 affine folded]
    wo_ref, bo_ref,              # (L, H, H),  (L, 1, H)
    w1_ref, b1_ref,              # (L, H, INTER), (L, 1, INTER)  [ln2 affine folded]
    w2_ref, b2_ref,              # (L, INTER, H), (L, 1, H)
    pool_ref,                    # (B, B*SEQ)  per-batch mean-pool matrix
    wc_ref, bc_ref,              # (H, C), (1, C)                [final-LN affine folded]
    o_ref,                       # (B, C)
):
    # Patch embedding for all tokens in one MXU push; cls/dist rows are zero so only
    # the additive base (token + position) survives for them.
    x = (
        jnp.dot(patches_ref[...], patch_w_ref[...], preferred_element_type=jnp.float32)
        + base_ref[...]
    )                                                                   # (B*SEQ, H)

    for l in range(L):                                                  # static unroll, L=2
        # ---------------- self attention (pre-norm) ----------------
        xn = _ln_normalize(x)                                           # (B*SEQ, H)

        # Per-head Q/K/V via small MXU matmuls on pre-split weights — no lane slicing.
        q_h, k_h, v_h = [], [], []
        for h in range(NH):                                             # static, NH=4
            lh = l * NH + h
            q_h.append(jnp.dot(xn, wq_ref[lh], preferred_element_type=jnp.float32) + bq_ref[lh])
            k_h.append(jnp.dot(xn, wk_ref[lh], preferred_element_type=jnp.float32) + bk_ref[lh])
            v_h.append(jnp.dot(xn, wv_ref[lh], preferred_element_type=jnp.float32) + bv_ref[lh])

        # Scores for all (batch, head) pairs, stacked along sublanes -> (B*NH*SEQ, SEQ).
        tiles = []
        for b in range(B):                                              # static, B=2
            r0 = b * SEQ
            for h in range(NH):
                tiles.append(lax.dot_general(
                    q_h[h][r0:r0 + SEQ, :], k_h[h][r0:r0 + SEQ, :],
                    (((1,), (1,)), ((), ())),
                    preferred_element_type=jnp.float32))                # (SEQ, SEQ)
        s_all = jnp.concatenate(tiles, axis=0)                          # (B*NH*SEQ, SEQ)

        # ONE softmax pass for all heads / batches.
        s_all = s_all - jnp.max(s_all, axis=-1, keepdims=True)
        p_all = jnp.exp(s_all)
        p_all = p_all / jnp.sum(p_all, axis=-1, keepdims=True)

        # Per-head P@V contracted straight against the matching sublane block of Wo,
        # accumulated in registers (no VMEM scratch, no masked stores, no lane concat).
        wo_l = wo_ref[l]                                                # (H, H)
        attn = []
        for b in range(B):
            r0 = b * SEQ
            acc = None
            for h in range(NH):
                t0 = (b * NH + h) * SEQ
                ctx = jnp.dot(p_all[t0:t0 + SEQ, :], v_h[h][r0:r0 + SEQ, :],
                              preferred_element_type=jnp.float32)       # (SEQ, HD)
                contrib = jnp.dot(ctx, wo_l[h * HD:(h + 1) * HD, :],
                                  preferred_element_type=jnp.float32)   # (SEQ, H)
                acc = contrib if acc is None else acc + contrib
            attn.append(acc)
        x = x + jnp.concatenate(attn, axis=0) + bo_ref[l]               # (B*SEQ, H)

        # ---------------------- MLP (pre-norm) ----------------------
        xn2 = _ln_normalize(x)
        h1 = _gelu(jnp.dot(xn2, w1_ref[l], preferred_element_type=jnp.float32) + b1_ref[l])
        x = x + jnp.dot(h1, w2_ref[l], preferred_element_type=jnp.float32) + b2_ref[l]

    # -------- final layernorm (normalize) -> mean over sequence -> classifier --------
    xn = _ln_normalize(x)                                               # (B*SEQ, H)
    pooled = jnp.dot(pool_ref[...], xn, preferred_element_type=jnp.float32)   # (B, H)
    # dropout(0.3) is identity at inference
    o_ref[...] = (
        jnp.dot(pooled, wc_ref[...], preferred_element_type=jnp.float32) + bc_ref[...]
    )


# -------------------------------- parameters ----------------------------------
def init_params(key):
    keys = jax.random.split(key, 64)
    ki = iter(keys)
    std = 0.02

    def nrm(shape):
        return std * jax.random.normal(next(ki), shape, jnp.float32)

    layers = []
    for _ in range(L):
        layers.append(dict(
            ln1_g=jnp.ones((H,), jnp.float32), ln1_b=jnp.zeros((H,), jnp.float32),
            wq=nrm((H, H)), bq=jnp.zeros((H,), jnp.float32),
            wk=nrm((H, H)), bk=jnp.zeros((H,), jnp.float32),
            wv=nrm((H, H)), bv=jnp.zeros((H,), jnp.float32),
            wo=nrm((H, H)), bo=jnp.zeros((H,), jnp.float32),
            ln2_g=jnp.ones((H,), jnp.float32), ln2_b=jnp.zeros((H,), jnp.float32),
            w1=nrm((H, INTER)), b1=jnp.zeros((INTER,), jnp.float32),
            w2=nrm((INTER, H)), b2=jnp.zeros((H,), jnp.float32),
        ))
    return dict(
        # Conv2d(1, H, (PS,PS)) weight, flattened (freq,time) & transposed -> (PP, H)
        patch_w=nrm((PP, H)), patch_b=jnp.zeros((H,), jnp.float32),
        cls=nrm((1, H)), dist=nrm((1, H)), pos=nrm((SEQ, H)),
        final_ln_g=jnp.ones((H,), jnp.float32), final_ln_b=jnp.zeros((H,), jnp.float32),
        cls_w=nrm((H, C)), cls_b=jnp.zeros((C,), jnp.float32),
        layers=layers,
    )


def prepare_params(p):
    """Host-side, one-time: fold LN affines and 1/sqrt(HD) into projection weights,
    split Q/K/V per head, and precompute the additive token base + pooling matrix."""
    scale = 1.0 / math.sqrt(HD)

    def fold(g, b, w, bias):
        # LN(x) @ w + bias == normalize(x) @ (diag(g) @ w) + (b @ w + bias)
        return g[:, None] * w, b @ w + bias

    wq_s, bq_s, wk_s, bk_s, wv_s, bv_s = [], [], [], [], [], []
    wo_s, bo_s, w1_s, b1_s, w2_s, b2_s = [], [], [], [], [], []
    for lp in p["layers"]:
        wq, bq = fold(lp["ln1_g"], lp["ln1_b"], lp["wq"], lp["bq"])
        wk, bk = fold(lp["ln1_g"], lp["ln1_b"], lp["wk"], lp["bk"])
        wv, bv = fold(lp["ln1_g"], lp["ln1_b"], lp["wv"], lp["bv"])
        wq, bq = wq * scale, bq * scale                     # fold attention scale into Q
        for h in range(NH):
            sl = slice(h * HD, (h + 1) * HD)
            wq_s.append(wq[:, sl]); bq_s.append(bq[sl][None, :])
            wk_s.append(wk[:, sl]); bk_s.append(bk[sl][None, :])
            wv_s.append(wv[:, sl]); bv_s.append(bv[sl][None, :])
        wo_s.append(lp["wo"]); bo_s.append(lp["bo"][None, :])
        w1, b1 = fold(lp["ln2_g"], lp["ln2_b"], lp["w1"], lp["b1"])
        w1_s.append(w1); b1_s.append(b1[None, :])
        w2_s.append(lp["w2"]); b2_s.append(lp["b2"][None, :])

    wc, bc = fold(p["final_ln_g"], p["final_ln_b"], p["cls_w"], p["cls_b"])

    # Per-token additive base: rows 0,1 = cls/dist + pos; rows 2.. = patch bias + pos.
    base = jnp.concatenate(
        [p["cls"], p["dist"],
         jnp.broadcast_to(p["patch_b"][None, :], (NUM_PATCHES, H))], axis=0) + p["pos"]
    base_full = jnp.tile(base, (B, 1))                                  # (B*SEQ, H)
    # Mean-pool over the sequence expressed as a tiny matmul (keeps it on the MXU).
    pool_mat = jnp.repeat(jnp.eye(B, dtype=jnp.float32), SEQ, axis=1) / SEQ   # (B, B*SEQ)

    return dict(
        patch_w=p["patch_w"], base=base_full,
        wq=jnp.stack(wq_s), bq=jnp.stack(bq_s),
        wk=jnp.stack(wk_s), bk=jnp.stack(bk_s),
        wv=jnp.stack(wv_s), bv=jnp.stack(bv_s),
        wo=jnp.stack(wo_s), bo=jnp.stack(bo_s),
        w1=jnp.stack(w1_s), b1=jnp.stack(b1_s),
        w2=jnp.stack(w2_s), b2=jnp.stack(b2_s),
        pool=pool_mat, wc=wc, bc=bc[None, :],
    )


# --------------------------------- forward ------------------------------------
@jax.jit
def ast_classifier_forward(input_values, prep):
    """input_values: (B, T, F) float32 spectrogram -> logits (B, C)."""
    # im2col patch unfold via a single reshape/transpose (valid because FS==TS==PS,
    # i.e. non-overlapping patches). Freq-major patch order + (freq, time) patch
    # flatten matches the NCHW Conv2d weight flatten. XLA fuses these cheap ops.
    spec = jnp.transpose(input_values, (0, 2, 1))                        # (B, F, T)
    patches = (
        spec.reshape(B, FP, PS, TP, PS)
        .transpose(0, 1, 3, 2, 4)
        .reshape(B, NUM_PATCHES, PP)
    )
    # Two leading zero rows per batch stand in for the cls / distillation token slots
    # so a single matmul embeds all SEQ rows.
    patches_ext = jnp.pad(patches, ((0, 0), (2, 0), (0, 0))).reshape(B * SEQ, PP)

    return pl.pallas_call(
        ast_fused_kernel,
        out_shape=jax.ShapeDtypeStruct((B, C), jnp.float32),
    )(
        patches_ext, prep["patch_w"], prep["base"],
        prep["wq"], prep["bq"], prep["wk"], prep["bk"], prep["wv"], prep["bv"],
        prep["wo"], prep["bo"], prep["w1"], prep["b1"], prep["w2"], prep["b2"],
        prep["pool"], prep["wc"], prep["bc"],
    )


# ----------------------------------- main --------------------------------------
if __name__ == "__main__":
    key = jax.random.PRNGKey(0)
    kx, kp = jax.random.split(key)
    input_values = jax.random.normal(kx, (B, T, F), jnp.float32)
    params = init_params(kp)
    prep = prepare_params(params)        # host-side, once (weight folding + precompute)

    logits = ast_classifier_forward(input_values, prep)
    logits = jax.block_until_ready(logits)
    assert logits.shape == (B, C)
    assert bool(jnp.all(jnp.isfinite(logits)))
    print("KERNEL_OK")
</pallas_src>

<mosaic_0001>
module attributes {stable_mosaic.version = 11 : i64} {
  func.func @ast_fused_kernel(%arg0: memref<16x64xf32, #tpu.memory_space<vmem>>, %arg1: memref<64x32xf32, #tpu.memory_space<vmem>>, %arg2: memref<16x32xf32, #tpu.memory_space<vmem>>, %arg3: memref<8x32x8xf32, #tpu.memory_space<vmem>>, %arg4: memref<8x1x8xf32, #tpu.memory_space<vmem>>, %arg5: memref<8x32x8xf32, #tpu.memory_space<vmem>>, %arg6: memref<8x1x8xf32, #tpu.memory_space<vmem>>, %arg7: memref<8x32x8xf32, #tpu.memory_space<vmem>>, %arg8: memref<8x1x8xf32, #tpu.memory_space<vmem>>, %arg9: memref<2x32x32xf32, #tpu.memory_space<vmem>>, %arg10: memref<2x1x32xf32, #tpu.memory_space<vmem>>, %arg11: memref<2x32x128xf32, #tpu.memory_space<vmem>>, %arg12: memref<2x1x128xf32, #tpu.memory_space<vmem>>, %arg13: memref<2x128x32xf32, #tpu.memory_space<vmem>>, %arg14: memref<2x1x32xf32, #tpu.memory_space<vmem>>, %arg15: memref<2x16xf32, #tpu.memory_space<vmem>>, %arg16: memref<32x5xf32, #tpu.memory_space<vmem>>, %arg17: memref<1x5xf32, #tpu.memory_space<vmem>>, %arg18: memref<2x5xf32, #tpu.memory_space<vmem>>) attributes {dimension_semantics = [], scalar_prefetch = 0 : i64, scratch_operands = 0 : i64, tpu.core_type = #tpu.core_type<tc>} {
    %c0 = arith.constant 0 : index
    %c0_0 = arith.constant 0 : index
    %0 = vector.load %arg0[%c0, %c0_0] : memref<16x64xf32, #tpu.memory_space<vmem>>, vector<16x64xf32>
    %c0_1 = arith.constant 0 : index
    %c0_2 = arith.constant 0 : index
    %1 = vector.load %arg1[%c0_1, %c0_2] : memref<64x32xf32, #tpu.memory_space<vmem>>, vector<64x32xf32>
    %cst = arith.constant dense<0.000000e+00> : vector<16x32xf32>
    %2 = tpu.matmul %0, %1, %cst {dimension_numbers = #tpu.dot_dimension_numbers<[1], [0], [0], [1], [0, 0, 1, 1], [], []>} : vector<16x64xf32>, vector<64x32xf32>, vector<16x32xf32> -> vector<16x32xf32>
    %c0_3 = arith.constant 0 : index
    %c0_4 = arith.constant 0 : index
    %3 = vector.load %arg2[%c0_3, %c0_4] : memref<16x32xf32, #tpu.memory_space<vmem>>, vector<16x32xf32>
    %4 = arith.addf %2, %3 : vector<16x32xf32>
    %cst_5 = arith.constant dense<0.000000e+00> : vector<16xf32>
    %5 = vector.multi_reduction <add>, %4, %cst_5 [1] : vector<16x32xf32> to vector<16xf32>
    %6 = vector.shape_cast %5 : vector<16xf32> to vector<16x1xf32>
    %cst_6 = arith.constant 3.200000e+01 : f32
    %7 = vector.broadcast %cst_6 : f32 to vector<16x1xf32>
    %8 = arith.divf %6, %7 : vector<16x1xf32>
    %9 = vector.broadcast %8 : vector<16x1xf32> to vector<16x32xf32>
    %10 = arith.subf %4, %9 : vector<16x32xf32>
    %11 = arith.mulf %10, %10 : vector<16x32xf32>
    %cst_7 = arith.constant dense<0.000000e+00> : vector<16xf32>
    %12 = vector.multi_reduction <add>, %11, %cst_7 [1] : vector<16x32xf32> to vector<16xf32>
    %13 = vector.shape_cast %12 : vector<16xf32> to vector<16x1xf32>
    %cst_8 = arith.constant 3.200000e+01 : f32
    %14 = vector.broadcast %cst_8 : f32 to vector<16x1xf32>
    %15 = arith.divf %13, %14 : vector<16x1xf32>
    %16 = vector.broadcast %8 : vector<16x1xf32> to vector<16x32xf32>
    %17 = arith.subf %4, %16 : vector<16x32xf32>
    %cst_9 = arith.constant 9.99999996E-13 : f32
    %18 = vector.broadcast %cst_9 : f32 to vector<16x1xf32>
    %19 = arith.addf %15, %18 : vector<16x1xf32>
    %20 = math.rsqrt %19 : vector<16x1xf32>
    %21 = vector.broadcast %20 : vector<16x1xf32> to vector<16x32xf32>
    %22 = arith.mulf %17, %21 : vector<16x32xf32>
    %c0_10 = arith.constant 0 : index
    %c0_11 = arith.constant 0 : index
    %c0_12 = arith.constant 0 : index
    %23 = vector.load %arg3[%c0_10, %c0_11, %c0_12] : memref<8x32x8xf32, #tpu.memory_space<vmem>>, vector<1x32x8xf32>
    %24 = vector.shape_cast %23 : vector<1x32x8xf32> to vector<32x8xf32>
    %cst_13 = arith.constant dense<0.000000e+00> : vector<16x8xf32>
    %25 = tpu.matmul %22, %24, %cst_13 {dimension_numbers = #tpu.dot_dimension_numbers<[1], [0], [0], [1], [0, 0, 1, 1], [], []>} : vector<16x32xf32>, vector<32x8xf32>, vector<16x8xf32> -> vector<16x8xf32>
    %c0_14 = arith.constant 0 : index
    %c0_15 = arith.constant 0 : index
    %c0_16 = arith.constant 0 : index
    %26 = vector.load %arg4[%c0_14, %c0_15, %c0_16] : memref<8x1x8xf32, #tpu.memory_space<vmem>>, vector<1x1x8xf32>
    %27 = vector.shape_cast %26 : vector<1x1x8xf32> to vector<1x8xf32>
    %28 = vector.broadcast %27 : vector<1x8xf32> to vector<16x8xf32>
    %29 = arith.addf %25, %28 : vector<16x8xf32>
    %c0_17 = arith.constant 0 : index
    %c0_18 = arith.constant 0 : index
    %c0_19 = arith.constant 0 : index
    %30 = vector.load %arg5[%c0_17, %c0_18, %c0_19] : memref<8x32x8xf32, #tpu.memory_space<vmem>>, vector<1x32x8xf32>
    %31 = vector.shape_cast %30 : vector<1x32x8xf32> to vector<32x8xf32>
    %cst_20 = arith.constant dense<0.000000e+00> : vector<16x8xf32>
    %32 = tpu.matmul %22, %31, %cst_20 {dimension_numbers = #tpu.dot_dimension_numbers<[1], [0], [0], [1], [0, 0, 1, 1], [], []>} : vector<16x32xf32>, vector<32x8xf32>, vector<16x8xf32> -> vector<16x8xf32>
    %c0_21 = arith.constant 0 : index
    %c0_22 = arith.constant 0 : index
    %c0_23 = arith.constant 0 : index
    %33 = vector.load %arg6[%c0_21, %c0_22, %c0_23] : memref<8x1x8xf32, #tpu.memory_space<vmem>>, vector<1x1x8xf32>
    %34 = vector.shape_cast %33 : vector<1x1x8xf32> to vector<1x8xf32>
    %35 = vector.broadcast %34 : vector<1x8xf32> to vector<16x8xf32>
    %36 = arith.addf %32, %35 : vector<16x8xf32>
    %c0_24 = arith.constant 0 : index
    %c0_25 = arith.constant 0 : index
    %c0_26 = arith.constant 0 : index
    %37 = vector.load %arg7[%c0_24, %c0_25, %c0_26] : memref<8x32x8xf32, #tpu.memory_space<vmem>>, vector<1x32x8xf32>
    %38 = vector.shape_cast %37 : vector<1x32x8xf32> to vector<32x8xf32>
    %cst_27 = arith.constant dense<0.000000e+00> : vector<16x8xf32>
    %39 = tpu.matmul %22, %38, %cst_27 {dimension_numbers = #tpu.dot_dimension_numbers<[1], [0], [0], [1], [0, 0, 1, 1], [], []>} : vector<16x32xf32>, vector<32x8xf32>, vector<16x8xf32> -> vector<16x8xf32>
    %c0_28 = arith.constant 0 : index
    %c0_29 = arith.constant 0 : index
    %c0_30 = arith.constant 0 : index
    %40 = vector.load %arg8[%c0_28, %c0_29, %c0_30] : memref<8x1x8xf32, #tpu.memory_space<vmem>>, vector<1x1x8xf32>
    %41 = vector.shape_cast %40 : vector<1x1x8xf32> to vector<1x8xf32>
    %42 = vector.broadcast %41 : vector<1x8xf32> to vector<16x8xf32>
    %43 = arith.addf %39, %42 : vector<16x8xf32>
    %c1 = arith.constant 1 : index
    %c0_31 = arith.constant 0 : index
    %c0_32 = arith.constant 0 : index
    %44 = vector.load %arg3[%c1, %c0_31, %c0_32] : memref<8x32x8xf32, #tpu.memory_space<vmem>>, vector<1x32x8xf32>
    %45 = vector.shape_cast %44 : vector<1x32x8xf32> to vector<32x8xf32>
    %cst_33 = arith.constant dense<0.000000e+00> : vector<16x8xf32>
    %46 = tpu.matmul %22, %45, %cst_33 {dimension_numbers = #tpu.dot_dimension_numbers<[1], [0], [0], [1], [0, 0, 1, 1], [], []>} : vector<16x32xf32>, vector<32x8xf32>, vector<16x8xf32> -> vector<16x8xf32>
    %c1_34 = arith.constant 1 : index
    %c0_35 = arith.constant 0 : index
    %c0_36 = arith.constant 0 : index
    %47 = vector.load %arg4[%c1_34, %c0_35, %c0_36] : memref<8x1x8xf32, #tpu.memory_space<vmem>>, vector<1x1x8xf32>
    %48 = vector.shape_cast %47 : vector<1x1x8xf32> to vector<1x8xf32>
    %49 = vector.broadcast %48 : vector<1x8xf32> to vector<16x8xf32>
    %50 = arith.addf %46, %49 : vector<16x8xf32>
    %c1_37 = arith.constant 1 : index
    %c0_38 = arith.constant 0 : index
    %c0_39 = arith.constant 0 : index
    %51 = vector.load %arg5[%c1_37, %c0_38, %c0_39] : memref<8x32x8xf32, #tpu.memory_space<vmem>>, vector<1x32x8xf32>
    %52 = vector.shape_cast %51 : vector<1x32x8xf32> to vector<32x8xf32>
    %cst_40 = arith.constant dense<0.000000e+00> : vector<16x8xf32>
    %53 = tpu.matmul %22, %52, %cst_40 {dimension_numbers = #tpu.dot_dimension_numbers<[1], [0], [0], [1], [0, 0, 1, 1], [], []>} : vector<16x32xf32>, vector<32x8xf32>, vector<16x8xf32> -> vector<16x8xf32>
    %c1_41 = arith.constant 1 : index
    %c0_42 = arith.constant 0 : index
    %c0_43 = arith.constant 0 : index
    %54 = vector.load %arg6[%c1_41, %c0_42, %c0_43] : memref<8x1x8xf32, #tpu.memory_space<vmem>>, vector<1x1x8xf32>
    %55 = vector.shape_cast %54 : vector<1x1x8xf32> to vector<1x8xf32>
    %56 = vector.broadcast %55 : vector<1x8xf32> to vector<16x8xf32>
    %57 = arith.addf %53, %56 : vector<16x8xf32>
    %c1_44 = arith.constant 1 : index
    %c0_45 = arith.constant 0 : index
    %c0_46 = arith.constant 0 : index
    %58 = vector.load %arg7[%c1_44, %c0_45, %c0_46] : memref<8x32x8xf32, #tpu.memory_space<vmem>>, vector<1x32x8xf32>
    %59 = vector.shape_cast %58 : vector<1x32x8xf32> to vector<32x8xf32>
    %cst_47 = arith.constant dense<0.000000e+00> : vector<16x8xf32>
    %60 = tpu.matmul %22, %59, %cst_47 {dimension_numbers = #tpu.dot_dimension_numbers<[1], [0], [0], [1], [0, 0, 1, 1], [], []>} : vector<16x32xf32>, vector<32x8xf32>, vector<16x8xf32> -> vector<16x8xf32>
    %c1_48 = arith.constant 1 : index
    %c0_49 = arith.constant 0 : index
    %c0_50 = arith.constant 0 : index
    %61 = vector.load %arg8[%c1_48, %c0_49, %c0_50] : memref<8x1x8xf32, #tpu.memory_space<vmem>>, vector<1x1x8xf32>
    %62 = vector.shape_cast %61 : vector<1x1x8xf32> to vector<1x8xf32>
    %63 = vector.broadcast %62 : vector<1x8xf32> to vector<16x8xf32>
    %64 = arith.addf %60, %63 : vector<16x8xf32>
    %c2 = arith.constant 2 : index
    %c0_51 = arith.constant 0 : index
    %c0_52 = arith.constant 0 : index
    %65 = vector.load %arg3[%c2, %c0_51, %c0_52] : memref<8x32x8xf32, #tpu.memory_space<vmem>>, vector<1x32x8xf32>
    %66 = vector.shape_cast %65 : vector<1x32x8xf32> to vector<32x8xf32>
    %cst_53 = arith.constant dense<0.000000e+00> : vector<16x8xf32>
    %67 = tpu.matmul %22, %66, %cst_53 {dimension_numbers = #tpu.dot_dimension_numbers<[1], [0], [0], [1], [0, 0, 1, 1], [], []>} : vector<16x32xf32>, vector<32x8xf32>, vector<16x8xf32> -> vector<16x8xf32>
    %c2_54 = arith.constant 2 : index
    %c0_55 = arith.constant 0 : index
    %c0_56 = arith.constant 0 : index
    %68 = vector.load %arg4[%c2_54, %c0_55, %c0_56] : memref<8x1x8xf32, #tpu.memory_space<vmem>>, vector<1x1x8xf32>
    %69 = vector.shape_cast %68 : vector<1x1x8xf32> to vector<1x8xf32>
    %70 = vector.broadcast %69 : vector<1x8xf32> to vector<16x8xf32>
    %71 = arith.addf %67, %70 : vector<16x8xf32>
    %c2_57 = arith.constant 2 : index
    %c0_58 = arith.constant 0 : index
    %c0_59 = arith.constant 0 : index
    %72 = vector.load %arg5[%c2_57, %c0_58, %c0_59] : memref<8x32x8xf32, #tpu.memory_space<vmem>>, vector<1x32x8xf32>
    %73 = vector.shape_cast %72 : vector<1x32x8xf32> to vector<32x8xf32>
    %cst_60 = arith.constant dense<0.000000e+00> : vector<16x8xf32>
    %74 = tpu.matmul %22, %73, %cst_60 {dimension_numbers = #tpu.dot_dimension_numbers<[1], [0], [0], [1], [0, 0, 1, 1], [], []>} : vector<16x32xf32>, vector<32x8xf32>, vector<16x8xf32> -> vector<16x8xf32>
    %c2_61 = arith.constant 2 : index
    %c0_62 = arith.constant 0 : index
    %c0_63 = arith.constant 0 : index
    %75 = vector.load %arg6[%c2_61, %c0_62, %c0_63] : memref<8x1x8xf32, #tpu.memory_space<vmem>>, vector<1x1x8xf32>
    %76 = vector.shape_cast %75 : vector<1x1x8xf32> to vector<1x8xf32>
    %77 = vector.broadcast %76 : vector<1x8xf32> to vector<16x8xf32>
    %78 = arith.addf %74, %77 : vector<16x8xf32>
    %c2_64 = arith.constant 2 : index
    %c0_65 = arith.constant 0 : index
    %c0_66 = arith.constant 0 : index
    %79 = vector.load %arg7[%c2_64, %c0_65, %c0_66] : memref<8x32x8xf32, #tpu.memory_space<vmem>>, vector<1x32x8xf32>
    %80 = vector.shape_cast %79 : vector<1x32x8xf32> to vector<32x8xf32>
    %cst_67 = arith.constant dense<0.000000e+00> : vector<16x8xf32>
    %81 = tpu.matmul %22, %80, %cst_67 {dimension_numbers = #tpu.dot_dimension_numbers<[1], [0], [0], [1], [0, 0, 1, 1], [], []>} : vector<16x32xf32>, vector<32x8xf32>, vector<16x8xf32> -> vector<16x8xf32>
    %c2_68 = arith.constant 2 : index
    %c0_69 = arith.constant 0 : index
    %c0_70 = arith.constant 0 : index
    %82 = vector.load %arg8[%c2_68, %c0_69, %c0_70] : memref<8x1x8xf32, #tpu.memory_space<vmem>>, vector<1x1x8xf32>
    %83 = vector.shape_cast %82 : vector<1x1x8xf32> to vector<1x8xf32>
    %84 = vector.broadcast %83 : vector<1x8xf32> to vector<16x8xf32>
    %85 = arith.addf %81, %84 : vector<16x8xf32>
    %c3 = arith.constant 3 : index
    %c0_71 = arith.constant 0 : index
    %c0_72 = arith.constant 0 : index
    %86 = vector.load %arg3[%c3, %c0_71, %c0_72] : memref<8x32x8xf32, #tpu.memory_space<vmem>>, vector<1x32x8xf32>
    %87 = vector.shape_cast %86 : vector<1x32x8xf32> to vector<32x8xf32>
    %cst_73 = arith.constant dense<0.000000e+00> : vector<16x8xf32>
    %88 = tpu.matmul %22, %87, %cst_73 {dimension_numbers = #tpu.dot_dimension_numbers<[1], [0], [0], [1], [0, 0, 1, 1], [], []>} : vector<16x32xf32>, vector<32x8xf32>, vector<16x8xf32> -> vector<16x8xf32>
    %c3_74 = arith.constant 3 : index
    %c0_75 = arith.constant 0 : index
    %c0_76 = arith.constant 0 : index
    %89 = vector.load %arg4[%c3_74, %c0_75, %c0_76] : memref<8x1x8xf32, #tpu.memory_space<vmem>>, vector<1x1x8xf32>
    %90 = vector.shape_cast %89 : vector<1x1x8xf32> to vector<1x8xf32>
    %91 = vector.broadcast %90 : vector<1x8xf32> to vector<16x8xf32>
    %92 = arith.addf %88, %91 : vector<16x8xf32>
    %c3_77 = arith.constant 3 : index
    %c0_78 = arith.constant 0 : index
    %c0_79 = arith.constant 0 : index
    %93 = vector.load %arg5[%c3_77, %c0_78, %c0_79] : memref<8x32x8xf32, #tpu.memory_space<vmem>>, vector<1x32x8xf32>
    %94 = vector.shape_cast %93 : vector<1x32x8xf32> to vector<32x8xf32>
    %cst_80 = arith.constant dense<0.000000e+00> : vector<16x8xf32>
    %95 = tpu.matmul %22, %94, %cst_80 {dimension_numbers = #tpu.dot_dimension_numbers<[1], [0], [0], [1], [0, 0, 1, 1], [], []>} : vector<16x32xf32>, vector<32x8xf32>, vector<16x8xf32> -> vector<16x8xf32>
    %c3_81 = arith.constant 3 : index
    %c0_82 = arith.constant 0 : index
    %c0_83 = arith.constant 0 : index
    %96 = vector.load %arg6[%c3_81, %c0_82, %c0_83] : memref<8x1x8xf32, #tpu.memory_space<vmem>>, vector<1x1x8xf32>
    %97 = vector.shape_cast %96 : vector<1x1x8xf32> to vector<1x8xf32>
    %98 = vector.broadcast %97 : vector<1x8xf32> to vector<16x8xf32>
    %99 = arith.addf %95, %98 : vector<16x8xf32>
    %c3_84 = arith.constant 3 : index
    %c0_85 = arith.constant 0 : index
    %c0_86 = arith.constant 0 : index
    %100 = vector.load %arg7[%c3_84, %c0_85, %c0_86] : memref<8x32x8xf32, #tpu.memory_space<vmem>>, vector<1x32x8xf32>
    %101 = vector.shape_cast %100 : vector<1x32x8xf32> to vector<32x8xf32>
    %cst_87 = arith.constant dense<0.000000e+00> : vector<16x8xf32>
    %102 = tpu.matmul %22, %101, %cst_87 {dimension_numbers = #tpu.dot_dimension_numbers<[1], [0], [0], [1], [0, 0, 1, 1], [], []>} : vector<16x32xf32>, vector<32x8xf32>, vector<16x8xf32> -> vector<16x8xf32>
    %c3_88 = arith.constant 3 : index
    %c0_89 = arith.constant 0 : index
    %c0_90 = arith.constant 0 : index
    %103 = vector.load %arg8[%c3_88, %c0_89, %c0_90] : memref<8x1x8xf32, #tpu.memory_space<vmem>>, vector<1x1x8xf32>
    %104 = vector.shape_cast %103 : vector<1x1x8xf32> to vector<1x8xf32>
    %105 = vector.broadcast %104 : vector<1x8xf32> to vector<16x8xf32>
    %106 = arith.addf %102, %105 : vector<16x8xf32>
    %107 = vector.extract_strided_slice %29 {offsets = [0, 0], sizes = [8, 8], strides = [1, 1]} : vector<16x8xf32> to vector<8x8xf32>
    %108 = vector.extract_strided_slice %36 {offsets = [0, 0], sizes = [8, 8], strides = [1, 1]} : vector<16x8xf32> to vector<8x8xf32>
    %cst_91 = arith.constant dense<0.000000e+00> : vector<8x8xf32>
    %109 = tpu.matmul %107, %108, %cst_91 {dimension_numbers = #tpu.dot_dimension_numbers<[1], [1], [0], [0], [0, 0, 1, 0], [], []>} : vector<8x8xf32>, vector<8x8xf32>, vector<8x8xf32> -> vector<8x8xf32>
    %110 = vector.extract_strided_slice %50 {offsets = [0, 0], sizes = [8, 8], strides = [1, 1]} : vector<16x8xf32> to vector<8x8xf32>
    %111 = vector.extract_strided_slice %57 {offsets = [0, 0], sizes = [8, 8], strides = [1, 1]} : vector<16x8xf32> to vector<8x8xf32>
    %cst_92 = arith.constant dense<0.000000e+00> : vector<8x8xf32>
    %112 = tpu.matmul %110, %111, %cst_92 {dimension_numbers = #tpu.dot_dimension_numbers<[1], [1], [0], [0], [0, 0, 1, 0], [], []>} : vector<8x8xf32>, vector<8x8xf32>, vector<8x8xf32> -> vector<8x8xf32>
    %113 = vector.extract_strided_slice %71 {offsets = [0, 0], sizes = [8, 8], strides = [1, 1]} : vector<16x8xf32> to vector<8x8xf32>
    %114 = vector.extract_strided_slice %78 {offsets = [0, 0], sizes = [8, 8], strides = [1, 1]} : vector<16x8xf32> to vector<8x8xf32>
    %cst_93 = arith.constant dense<0.000000e+00> : vector<8x8xf32>
    %115 = tpu.matmul %113, %114, %cst_93 {dimension_numbers = #tpu.dot_dimension_numbers<[1], [1], [0], [0], [0, 0, 1, 0], [], []>} : vector<8x8xf32>, vector<8x8xf32>, vector<8x8xf32> -> vector<8x8xf32>
    %116 = vector.extract_strided_slice %92 {offsets = [0, 0], sizes = [8, 8], strides = [1, 1]} : vector<16x8xf32> to vector<8x8xf32>
    %117 = vector.extract_strided_slice %99 {offsets = [0, 0], sizes = [8, 8], strides = [1, 1]} : vector<16x8xf32> to vector<8x8xf32>
    %cst_94 = arith.constant dense<0.000000e+00> : vector<8x8xf32>
    %118 = tpu.matmul %116, %117, %cst_94 {dimension_numbers = #tpu.dot_dimension_numbers<[1], [1], [0], [0], [0, 0, 1, 0], [], []>} : vector<8x8xf32>, vector<8x8xf32>, vector<8x8xf32> -> vector<8x8xf32>
    %119 = vector.extract_strided_slice %29 {offsets = [8, 0], sizes = [8, 8], strides = [1, 1]} : vector<16x8xf32> to vector<8x8xf32>
    %120 = vector.extract_strided_slice %36 {offsets = [8, 0], sizes = [8, 8], strides = [1, 1]} : vector<16x8xf32> to vector<8x8xf32>
    %cst_95 = arith.constant dense<0.000000e+00> : vector<8x8xf32>
    %121 = tpu.matmul %119, %120, %cst_95 {dimension_numbers = #tpu.dot_dimension_numbers<[1], [1], [0], [0], [0, 0, 1, 0], [], []>} : vector<8x8xf32>, vector<8x8xf32>, vector<8x8xf32> -> vector<8x8xf32>
    %122 = vector.extract_strided_slice %50 {offsets = [8, 0], sizes = [8, 8], strides = [1, 1]} : vector<16x8xf32> to vector<8x8xf32>
    %123 = vector.extract_strided_slice %57 {offsets = [8, 0], sizes = [8, 8], strides = [1, 1]} : vector<16x8xf32> to vector<8x8xf32>
    %cst_96 = arith.constant dense<0.000000e+00> : vector<8x8xf32>
    %124 = tpu.matmul %122, %123, %cst_96 {dimension_numbers = #tpu.dot_dimension_numbers<[1], [1], [0], [0], [0, 0, 1, 0], [], []>} : vector<8x8xf32>, vector<8x8xf32>, vector<8x8xf32> -> vector<8x8xf32>
    %125 = vector.extract_strided_slice %71 {offsets = [8, 0], sizes = [8, 8], strides = [1, 1]} : vector<16x8xf32> to vector<8x8xf32>
    %126 = vector.extract_strided_slice %78 {offsets = [8, 0], sizes = [8, 8], strides = [1, 1]} : vector<16x8xf32> to vector<8x8xf32>
    %cst_97 = arith.constant dense<0.000000e+00> : vector<8x8xf32>
    %127 = tpu.matmul %125, %126, %cst_97 {dimension_numbers = #tpu.dot_dimension_numbers<[1], [1], [0], [0], [0, 0, 1, 0], [], []>} : vector<8x8xf32>, vector<8x8xf32>, vector<8x8xf32> -> vector<8x8xf32>
    %128 = vector.extract_strided_slice %92 {offsets = [8, 0], sizes = [8, 8], strides = [1, 1]} : vector<16x8xf32> to vector<8x8xf32>
    %129 = vector.extract_strided_slice %99 {offsets = [8, 0], sizes = [8, 8], strides = [1, 1]} : vector<16x8xf32> to vector<8x8xf32>
    %cst_98 = arith.constant dense<0.000000e+00> : vector<8x8xf32>
    %130 = tpu.matmul %128, %129, %cst_98 {dimension_numbers = #tpu.dot_dimension_numbers<[1], [1], [0], [0], [0, 0, 1, 0], [], []>} : vector<8x8xf32>, vector<8x8xf32>, vector<8x8xf32> -> vector<8x8xf32>
    %131 = tpu.concatenate %109, %112, %115, %118, %121, %124, %127, %130 in 0 : vector<8x8xf32>, vector<8x8xf32>, vector<8x8xf32>, vector<8x8xf32>, vector<8x8xf32>, vector<8x8xf32>, vector<8x8xf32>, vector<8x8xf32> -> vector<64x8xf32>
    %cst_99 = arith.constant dense<0xFF800000> : vector<64xf32>
    %132 = vector.multi_reduction <maximumf>, %131, %cst_99 [1] : vector<64x8xf32> to vector<64xf32>
    %133 = vector.shape_cast %132 : vector<64xf32> to vector<64x1xf32>
    %134 = vector.broadcast %133 : vector<64x1xf32> to vector<64x8xf32>
    %135 = arith.subf %131, %134 : vector<64x8xf32>
    %136 = math.exp %135 : vector<64x8xf32>
    %cst_100 = arith.constant dense<0.000000e+00> : vector<64xf32>
    %137 = vector.multi_reduction <add>, %136, %cst_100 [1] : vector<64x8xf32> to vector<64xf32>
    %138 = vector.shape_cast %137 : vector<64xf32> to vector<64x1xf32>
    %139 = vector.broadcast %138 : vector<64x1xf32> to vector<64x8xf32>
    %140 = arith.divf %136, %139 : vector<64x8xf32>
    %c0_101 = arith.constant 0 : index
    %c0_102 = arith.constant 0 : index
    %c0_103 = arith.constant 0 : index
    %141 = vector.load %arg9[%c0_101, %c0_102, %c0_103] : memref<2x32x32xf32, #tpu.memory_space<vmem>>, vector<1x32x32xf32>
    %142 = vector.shape_cast %141 : vector<1x32x32xf32> to vector<32x32xf32>
    %143 = vector.extract_strided_slice %140 {offsets = [0, 0], sizes = [8, 8], strides = [1, 1]} : vector<64x8xf32> to vector<8x8xf32>
    %144 = vector.extract_strided_slice %43 {offsets = [0, 0], sizes = [8, 8], strides = [1, 1]} : vector<16x8xf32> to vector<8x8xf32>
    %cst_104 = arith.constant dense<0.000000e+00> : vector<8x8xf32>
    %145 = tpu.matmul %143, %144, %cst_104 {dimension_numbers = #tpu.dot_dimension_numbers<[1], [0], [0], [1], [0, 0, 1, 1], [], []>} : vector<8x8xf32>, vector<8x8xf32>, vector<8x8xf32> -> vector<8x8xf32>
    %146 = vector.extract_strided_slice %142 {offsets = [0, 0], sizes = [8, 32], strides = [1, 1]} : vector<32x32xf32> to vector<8x32xf32>
    %cst_105 = arith.constant dense<0.000000e+00> : vector<8x32xf32>
    %147 = tpu.matmul %145, %146, %cst_105 {dimension_numbers = #tpu.dot_dimension_numbers<[1], [0], [0], [1], [0, 0, 1, 1], [], []>} : vector<8x8xf32>, vector<8x32xf32>, vector<8x32xf32> -> vector<8x32xf32>
    %148 = vector.extract_strided_slice %140 {offsets = [8, 0], sizes = [8, 8], strides = [1, 1]} : vector<64x8xf32> to vector<8x8xf32>
    %149 = vector.extract_strided_slice %64 {offsets = [0, 0], sizes = [8, 8], strides = [1, 1]} : vector<16x8xf32> to vector<8x8xf32>
    %cst_106 = arith.constant dense<0.000000e+00> : vector<8x8xf32>
    %150 = tpu.matmul %148, %149, %cst_106 {dimension_numbers = #tpu.dot_dimension_numbers<[1], [0], [0], [1], [0, 0, 1, 1], [], []>} : vector<8x8xf32>, vector<8x8xf32>, vector<8x8xf32> -> vector<8x8xf32>
    %151 = vector.extract_strided_slice %142 {offsets = [8, 0], sizes = [8, 32], strides = [1, 1]} : vector<32x32xf32> to vector<8x32xf32>
    %cst_107 = arith.constant dense<0.000000e+00> : vector<8x32xf32>
    %152 = tpu.matmul %150, %151, %cst_107 {dimension_numbers = #tpu.dot_dimension_numbers<[1], [0], [0], [1], [0, 0, 1, 1], [], []>} : vector<8x8xf32>, vector<8x32xf32>, vector<8x32xf32> -> vector<8x32xf32>
    %153 = arith.addf %147, %152 : vector<8x32xf32>
    %154 = vector.extract_strided_slice %140 {offsets = [16, 0], sizes = [8, 8], strides = [1, 1]} : vector<64x8xf32> to vector<8x8xf32>
    %155 = vector.extract_strided_slice %85 {offsets = [0, 0], sizes = [8, 8], strides = [1, 1]} : vector<16x8xf32> to vector<8x8xf32>
    %cst_108 = arith.constant dense<0.000000e+00> : vector<8x8xf32>
    %156 = tpu.matmul %154, %155, %cst_108 {dimension_numbers = #tpu.dot_dimension_numbers<[1], [0], [0], [1], [0, 0, 1, 1], [], []>} : vector<8x8xf32>, vector<8x8xf32>, vector<8x8xf32> -> vector<8x8xf32>
    %157 = vector.extract_strided_slice %142 {offsets = [16, 0], sizes = [8, 32], strides = [1, 1]} : vector<32x32xf32> to vector<8x32xf32>
    %cst_109 = arith.constant dense<0.000000e+00> : vector<8x32xf32>
    %158 = tpu.matmul %156, %157, %cst_109 {dimension_numbers = #tpu.dot_dimension_numbers<[1], [0], [0], [1], [0, 0, 1, 1], [], []>} : vector<8x8xf32>, vector<8x32xf32>, vector<8x32xf32> -> vector<8x32xf32>
    %159 = arith.addf %153, %158 : vector<8x32xf32>
    %160 = vector.extract_strided_slice %140 {offsets = [24, 0], sizes = [8, 8], strides = [1, 1]} : vector<64x8xf32> to vector<8x8xf32>
    %161 = vector.extract_strided_slice %106 {offsets = [0, 0], sizes = [8, 8], strides = [1, 1]} : vector<16x8xf32> to vector<8x8xf32>
    %cst_110 = arith.constant dense<0.000000e+00> : vector<8x8xf32>
    %162 = tpu.matmul %160, %161, %cst_110 {dimension_numbers = #tpu.dot_dimension_numbers<[1], [0], [0], [1], [0, 0, 1, 1], [], []>} : vector<8x8xf32>, vector<8x8xf32>, vector<8x8xf32> -> vector<8x8xf32>
    %163 = vector.extract_strided_slice %142 {offsets = [24, 0], sizes = [8, 32], strides = [1, 1]} : vector<32x32xf32> to vector<8x32xf32>
    %cst_111 = arith.constant dense<0.000000e+00> : vector<8x32xf32>
    %164 = tpu.matmul %162, %163, %cst_111 {dimension_numbers = #tpu.dot_dimension_numbers<[1], [0], [0], [1], [0, 0, 1, 1], [], []>} : vector<8x8xf32>, vector<8x32xf32>, vector<8x32xf32> -> vector<8x32xf32>
    %165 = arith.addf %159, %164 : vector<8x32xf32>
    %166 = vector.extract_strided_slice %140 {offsets = [32, 0], sizes = [8, 8], strides = [1, 1]} : vector<64x8xf32> to vector<8x8xf32>
    %167 = vector.extract_strided_slice %43 {offsets = [8, 0], sizes = [8, 8], strides = [1, 1]} : vector<16x8xf32> to vector<8x8xf32>
    %cst_112 = arith.constant dense<0.000000e+00> : vector<8x8xf32>
    %168 = tpu.matmul %166, %167, %cst_112 {dimension_numbers = #tpu.dot_dimension_numbers<[1], [0], [0], [1], [0, 0, 1, 1], [], []>} : vector<8x8xf32>, vector<8x8xf32>, vector<8x8xf32> -> vector<8x8xf32>
    %169 = vector.extract_strided_slice %142 {offsets = [0, 0], sizes = [8, 32], strides = [1, 1]} : vector<32x32xf32> to vector<8x32xf32>
    %cst_113 = arith.constant dense<0.000000e+00> : vector<8x32xf32>
    %170 = tpu.matmul %168, %169, %cst_113 {dimension_numbers = #tpu.dot_dimension_numbers<[1], [0], [0], [1], [0, 0, 1, 1], [], []>} : vector<8x8xf32>, vector<8x32xf32>, vector<8x32xf32> -> vector<8x32xf32>
    %171 = vector.extract_strided_slice %140 {offsets = [40, 0], sizes = [8, 8], strides = [1, 1]} : vector<64x8xf32> to vector<8x8xf32>
    %172 = vector.extract_strided_slice %64 {offsets = [8, 0], sizes = [8, 8], strides = [1, 1]} : vector<16x8xf32> to vector<8x8xf32>
    %cst_114 = arith.constant dense<0.000000e+00> : vector<8x8xf32>
    %173 = tpu.matmul %171, %172, %cst_114 {dimension_numbers = #tpu.dot_dimension_numbers<[1], [0], [0], [1], [0, 0, 1, 1], [], []>} : vector<8x8xf32>, vector<8x8xf32>, vector<8x8xf32> -> vector<8x8xf32>
    %174 = vector.extract_strided_slice %142 {offsets = [8, 0], sizes = [8, 32], strides = [1, 1]} : vector<32x32xf32> to vector<8x32xf32>
    %cst_115 = arith.constant dense<0.000000e+00> : vector<8x32xf32>
    %175 = tpu.matmul %173, %174, %cst_115 {dimension_numbers = #tpu.dot_dimension_numbers<[1], [0], [0], [1], [0, 0, 1, 1], [], []>} : vector<8x8xf32>, vector<8x32xf32>, vector<8x32xf32> -> vector<8x32xf32>
    %176 = arith.addf %170, %175 : vector<8x32xf32>
    %177 = vector.extract_strided_slice %140 {offsets = [48, 0], sizes = [8, 8], strides = [1, 1]} : vector<64x8xf32> to vector<8x8xf32>
    %178 = vector.extract_strided_slice %85 {offsets = [8, 0], sizes = [8, 8], strides = [1, 1]} : vector<16x8xf32> to vector<8x8xf32>
    %cst_116 = arith.constant dense<0.000000e+00> : vector<8x8xf32>
    %179 = tpu.matmul %177, %178, %cst_116 {dimension_numbers = #tpu.dot_dimension_numbers<[1], [0], [0], [1], [0, 0, 1, 1], [], []>} : vector<8x8xf32>, vector<8x8xf32>, vector<8x8xf32> -> vector<8x8xf32>
    %180 = vector.extract_strided_slice %142 {offsets = [16, 0], sizes = [8, 32], strides = [1, 1]} : vector<32x32xf32> to vector<8x32xf32>
    %cst_117 = arith.constant dense<0.000000e+00> : vector<8x32xf32>
    %181 = tpu.matmul %179, %180, %cst_117 {dimension_numbers = #tpu.dot_dimension_numbers<[1], [0], [0], [1], [0, 0, 1, 1], [], []>} : vector<8x8xf32>, vector<8x32xf32>, vector<8x32xf32> -> vector<8x32xf32>
    %182 = arith.addf %176, %181 : vector<8x32xf32>
    %183 = vector.extract_strided_slice %140 {offsets = [56, 0], sizes = [8, 8], strides = [1, 1]} : vector<64x8xf32> to vector<8x8xf32>
    %184 = vector.extract_strided_slice %106 {offsets = [8, 0], sizes = [8, 8], strides = [1, 1]} : vector<16x8xf32> to vector<8x8xf32>
    %cst_118 = arith.constant dense<0.000000e+00> : vector<8x8xf32>
    %185 = tpu.matmul %183, %184, %cst_118 {dimension_numbers = #tpu.dot_dimension_numbers<[1], [0], [0], [1], [0, 0, 1, 1], [], []>} : vector<8x8xf32>, vector<8x8xf32>, vector<8x8xf32> -> vector<8x8xf32>
    %186 = vector.extract_strided_slice %142 {offsets = [24, 0], sizes = [8, 32], strides = [1, 1]} : vector<32x32xf32> to vector<8x32xf32>
    %cst_119 = arith.constant dense<0.000000e+00> : vector<8x32xf32>
    %187 = tpu.matmul %185, %186, %cst_119 {dimension_numbers = #tpu.dot_dimension_numbers<[1], [0], [0], [1], [0, 0, 1, 1], [], []>} : vector<8x8xf32>, vector<8x32xf32>, vector<8x32xf32> -> vector<8x32xf32>
    %188 = arith.addf %182, %187 : vector<8x32xf32>
    %189 = tpu.concatenate %165, %188 in 0 : vector<8x32xf32>, vector<8x32xf32> -> vector<16x32xf32>
    %190 = arith.addf %4, %189 : vector<16x32xf32>
    %c0_120 = arith.constant 0 : index
    %c0_121 = arith.constant 0 : index
    %c0_122 = arith.constant 0 : index
    %191 = vector.load %arg10[%c0_120, %c0_121, %c0_122] : memref<2x1x32xf32, #tpu.memory_space<vmem>>, vector<1x1x32xf32>
    %192 = vector.shape_cast %191 : vector<1x1x32xf32> to vector<1x32xf32>
    %193 = vector.broadcast %192 : vector<1x32xf32> to vector<16x32xf32>
    %194 = arith.addf %190, %193 : vector<16x32xf32>
    %cst_123 = arith.constant dense<0.000000e+00> : vector<16xf32>
    %195 = vector.multi_reduction <add>, %194, %cst_123 [1] : vector<16x32xf32> to vector<16xf32>
    %196 = vector.shape_cast %195 : vector<16xf32> to vector<16x1xf32>
    %cst_124 = arith.constant 3.200000e+01 : f32
    %197 = vector.broadcast %cst_124 : f32 to vector<16x1xf32>
    %198 = arith.divf %196, %197 : vector<16x1xf32>
    %199 = vector.broadcast %198 : vector<16x1xf32> to vector<16x32xf32>
    %200 = arith.subf %194, %199 : vector<16x32xf32>
    %201 = arith.mulf %200, %200 : vector<16x32xf32>
    %cst_125 = arith.constant dense<0.000000e+00> : vector<16xf32>
    %202 = vector.multi_reduction <add>, %201, %cst_125 [1] : vector<16x32xf32> to vector<16xf32>
    %203 = vector.shape_cast %202 : vector<16xf32> to vector<16x1xf32>
    %cst_126 = arith.constant 3.200000e+01 : f32
    %204 = vector.broadcast %cst_126 : f32 to vector<16x1xf32>
    %205 = arith.divf %203, %204 : vector<16x1xf32>
    %206 = vector.broadcast %198 : vector<16x1xf32> to vector<16x32xf32>
    %207 = arith.subf %194, %206 : vector<16x32xf32>
    %cst_127 = arith.constant 9.99999996E-13 : f32
    %208 = vector.broadcast %cst_127 : f32 to vector<16x1xf32>
    %209 = arith.addf %205, %208 : vector<16x1xf32>
    %210 = math.rsqrt %209 : vector<16x1xf32>
    %211 = vector.broadcast %210 : vector<16x1xf32> to vector<16x32xf32>
    %212 = arith.mulf %207, %211 : vector<16x32xf32>
    %c0_128 = arith.constant 0 : index
    %c0_129 = arith.constant 0 : index
    %c0_130 = arith.constant 0 : index
    %213 = vector.load %arg11[%c0_128, %c0_129, %c0_130] : memref<2x32x128xf32, #tpu.memory_space<vmem>>, vector<1x32x128xf32>
    %214 = vector.shape_cast %213 : vector<1x32x128xf32> to vector<32x128xf32>
    %cst_131 = arith.constant dense<0.000000e+00> : vector<16x128xf32>
    %215 = tpu.matmul %212, %214, %cst_131 {dimension_numbers = #tpu.dot_dimension_numbers<[1], [0], [0], [1], [0, 0, 1, 1], [], []>} : vector<16x32xf32>, vector<32x128xf32>, vector<16x128xf32> -> vector<16x128xf32>
    %c0_132 = arith.constant 0 : index
    %c0_133 = arith.constant 0 : index
    %c0_134 = arith.constant 0 : index
    %216 = vector.load %arg12[%c0_132, %c0_133, %c0_134] : memref<2x1x128xf32, #tpu.memory_space<vmem>>, vector<1x1x128xf32>
    %217 = vector.shape_cast %216 : vector<1x1x128xf32> to vector<1x128xf32>
    %218 = vector.broadcast %217 : vector<1x128xf32> to vector<16x128xf32>
    %219 = arith.addf %215, %218 : vector<16x128xf32>
    %cst_135 = arith.constant 5.000000e-01 : f32
    %220 = vector.broadcast %cst_135 : f32 to vector<16x128xf32>
    %221 = arith.mulf %220, %219 : vector<16x128xf32>
    %cst_136 = arith.constant 4.471500e-02 : f32
    %222 = vector.broadcast %cst_136 : f32 to vector<16x128xf32>
    %223 = arith.mulf %222, %219 : vector<16x128xf32>
    %224 = arith.mulf %223, %219 : vector<16x128xf32>
    %225 = arith.mulf %224, %219 : vector<16x128xf32>
    %226 = arith.addf %219, %225 : vector<16x128xf32>
    %cst_137 = arith.constant 0.797884583 : f32
    %227 = vector.broadcast %cst_137 : f32 to vector<16x128xf32>
    %228 = arith.mulf %227, %226 : vector<16x128xf32>
    %229 = math.tanh %228 : vector<16x128xf32>
    %cst_138 = arith.constant 1.000000e+00 : f32
    %230 = vector.broadcast %cst_138 : f32 to vector<16x128xf32>
    %231 = arith.addf %230, %229 : vector<16x128xf32>
    %232 = arith.mulf %221, %231 : vector<16x128xf32>
    %c0_139 = arith.constant 0 : index
    %c0_140 = arith.constant 0 : index
    %c0_141 = arith.constant 0 : index
    %233 = vector.load %arg13[%c0_139, %c0_140, %c0_141] : memref<2x128x32xf32, #tpu.memory_space<vmem>>, vector<1x128x32xf32>
    %234 = vector.shape_cast %233 : vector<1x128x32xf32> to vector<128x32xf32>
    %cst_142 = arith.constant dense<0.000000e+00> : vector<16x32xf32>
    %235 = tpu.matmul %232, %234, %cst_142 {dimension_numbers = #tpu.dot_dimension_numbers<[1], [0], [0], [1], [0, 0, 1, 1], [], []>} : vector<16x128xf32>, vector<128x32xf32>, vector<16x32xf32> -> vector<16x32xf32>
    %236 = arith.addf %194, %235 : vector<16x32xf32>
    %c0_143 = arith.constant 0 : index
    %c0_144 = arith.constant 0 : index
    %c0_145 = arith.constant 0 : index
    %237 = vector.load %arg14[%c0_143, %c0_144, %c0_145] : memref<2x1x32xf32, #tpu.memory_space<vmem>>, vector<1x1x32xf32>
    %238 = vector.shape_cast %237 : vector<1x1x32xf32> to vector<1x32xf32>
    %239 = vector.broadcast %238 : vector<1x32xf32> to vector<16x32xf32>
    %240 = arith.addf %236, %239 : vector<16x32xf32>
    %cst_146 = arith.constant dense<0.000000e+00> : vector<16xf32>
    %241 = vector.multi_reduction <add>, %240, %cst_146 [1] : vector<16x32xf32> to vector<16xf32>
    %242 = vector.shape_cast %241 : vector<16xf32> to vector<16x1xf32>
    %cst_147 = arith.constant 3.200000e+01 : f32
    %243 = vector.broadcast %cst_147 : f32 to vector<16x1xf32>
    %244 = arith.divf %242, %243 : vector<16x1xf32>
    %245 = vector.broadcast %244 : vector<16x1xf32> to vector<16x32xf32>
    %246 = arith.subf %240, %245 : vector<16x32xf32>
    %247 = arith.mulf %246, %246 : vector<16x32xf32>
    %cst_148 = arith.constant dense<0.000000e+00> : vector<16xf32>
    %248 = vector.multi_reduction <add>, %247, %cst_148 [1] : vector<16x32xf32> to vector<16xf32>
    %249 = vector.shape_cast %248 : vector<16xf32> to vector<16x1xf32>
    %cst_149 = arith.constant 3.200000e+01 : f32
    %250 = vector.broadcast %cst_149 : f32 to vector<16x1xf32>
    %251 = arith.divf %249, %250 : vector<16x1xf32>
    %252 = vector.broadcast %244 : vector<16x1xf32> to vector<16x32xf32>
    %253 = arith.subf %240, %252 : vector<16x32xf32>
    %cst_150 = arith.constant 9.99999996E-13 : f32
    %254 = vector.broadcast %cst_150 : f32 to vector<16x1xf32>
    %255 = arith.addf %251, %254 : vector<16x1xf32>
    %256 = math.rsqrt %255 : vector<16x1xf32>
    %257 = vector.broadcast %256 : vector<16x1xf32> to vector<16x32xf32>
    %258 = arith.mulf %253, %257 : vector<16x32xf32>
    %c4 = arith.constant 4 : index
    %c0_151 = arith.constant 0 : index
    %c0_152 = arith.constant 0 : index
    %259 = vector.load %arg3[%c4, %c0_151, %c0_152] : memref<8x32x8xf32, #tpu.memory_space<vmem>>, vector<1x32x8xf32>
    %260 = vector.shape_cast %259 : vector<1x32x8xf32> to vector<32x8xf32>
    %cst_153 = arith.constant dense<0.000000e+00> : vector<16x8xf32>
    %261 = tpu.matmul %258, %260, %cst_153 {dimension_numbers = #tpu.dot_dimension_numbers<[1], [0], [0], [1], [0, 0, 1, 1], [], []>} : vector<16x32xf32>, vector<32x8xf32>, vector<16x8xf32> -> vector<16x8xf32>
    %c4_154 = arith.constant 4 : index
    %c0_155 = arith.constant 0 : index
    %c0_156 = arith.constant 0 : index
    %262 = vector.load %arg4[%c4_154, %c0_155, %c0_156] : memref<8x1x8xf32, #tpu.memory_space<vmem>>, vector<1x1x8xf32>
    %263 = vector.shape_cast %262 : vector<1x1x8xf32> to vector<1x8xf32>
    %264 = vector.broadcast %263 : vector<1x8xf32> to vector<16x8xf32>
    %265 = arith.addf %261, %264 : vector<16x8xf32>
    %c4_157 = arith.constant 4 : index
    %c0_158 = arith.constant 0 : index
    %c0_159 = arith.constant 0 : index
    %266 = vector.load %arg5[%c4_157, %c0_158, %c0_159] : memref<8x32x8xf32, #tpu.memory_space<vmem>>, vector<1x32x8xf32>
    %267 = vector.shape_cast %266 : vector<1x32x8xf32> to vector<32x8xf32>
    %cst_160 = arith.constant dense<0.000000e+00> : vector<16x8xf32>
    %268 = tpu.matmul %258, %267, %cst_160 {dimension_numbers = #tpu.dot_dimension_numbers<[1], [0], [0], [1], [0, 0, 1, 1], [], []>} : vector<16x32xf32>, vector<32x8xf32>, vector<16x8xf32> -> vector<16x8xf32>
    %c4_161 = arith.constant 4 : index
    %c0_162 = arith.constant 0 : index
    %c0_163 = arith.constant 0 : index
    %269 = vector.load %arg6[%c4_161, %c0_162, %c0_163] : memref<8x1x8xf32, #tpu.memory_space<vmem>>, vector<1x1x8xf32>
    %270 = vector.shape_cast %269 : vector<1x1x8xf32> to vector<1x8xf32>
    %271 = vector.broadcast %270 : vector<1x8xf32> to vector<16x8xf32>
    %272 = arith.addf %268, %271 : vector<16x8xf32>
    %c4_164 = arith.constant 4 : index
    %c0_165 = arith.constant 0 : index
    %c0_166 = arith.constant 0 : index
    %273 = vector.load %arg7[%c4_164, %c0_165, %c0_166] : memref<8x32x8xf32, #tpu.memory_space<vmem>>, vector<1x32x8xf32>
    %274 = vector.shape_cast %273 : vector<1x32x8xf32> to vector<32x8xf32>
    %cst_167 = arith.constant dense<0.000000e+00> : vector<16x8xf32>
    %275 = tpu.matmul %258, %274, %cst_167 {dimension_numbers = #tpu.dot_dimension_numbers<[1], [0], [0], [1], [0, 0, 1, 1], [], []>} : vector<16x32xf32>, vector<32x8xf32>, vector<16x8xf32> -> vector<16x8xf32>
    %c4_168 = arith.constant 4 : index
    %c0_169 = arith.constant 0 : index
    %c0_170 = arith.constant 0 : index
    %276 = vector.load %arg8[%c4_168, %c0_169, %c0_170] : memref<8x1x8xf32, #tpu.memory_space<vmem>>, vector<1x1x8xf32>
    %277 = vector.shape_cast %276 : vector<1x1x8xf32> to vector<1x8xf32>
    %278 = vector.broadcast %277 : vector<1x8xf32> to vector<16x8xf32>
    %279 = arith.addf %275, %278 : vector<16x8xf32>
    %c5 = arith.constant 5 : index
    %c0_171 = arith.constant 0 : index
    %c0_172 = arith.constant 0 : index
    %280 = vector.load %arg3[%c5, %c0_171, %c0_172] : memref<8x32x8xf32, #tpu.memory_space<vmem>>, vector<1x32x8xf32>
    %281 = vector.shape_cast %280 : vector<1x32x8xf32> to vector<32x8xf32>
    %cst_173 = arith.constant dense<0.000000e+00> : vector<16x8xf32>
    %282 = tpu.matmul %258, %281, %cst_173 {dimension_numbers = #tpu.dot_dimension_numbers<[1], [0], [0], [1], [0, 0, 1, 1], [], []>} : vector<16x32xf32>, vector<32x8xf32>, vector<16x8xf32> -> vector<16x8xf32>
    %c5_174 = arith.constant 5 : index
    %c0_175 = arith.constant 0 : index
    %c0_176 = arith.constant 0 : index
    %283 = vector.load %arg4[%c5_174, %c0_175, %c0_176] : memref<8x1x8xf32, #tpu.memory_space<vmem>>, vector<1x1x8xf32>
    %284 = vector.shape_cast %283 : vector<1x1x8xf32> to vector<1x8xf32>
    %285 = vector.broadcast %284 : vector<1x8xf32> to vector<16x8xf32>
    %286 = arith.addf %282, %285 : vector<16x8xf32>
    %c5_177 = arith.constant 5 : index
    %c0_178 = arith.constant 0 : index
    %c0_179 = arith.constant 0 : index
    %287 = vector.load %arg5[%c5_177, %c0_178, %c0_179] : memref<8x32x8xf32, #tpu.memory_space<vmem>>, vector<1x32x8xf32>
    %288 = vector.shape_cast %287 : vector<1x32x8xf32> to vector<32x8xf32>
    %cst_180 = arith.constant dense<0.000000e+00> : vector<16x8xf32>
    %289 = tpu.matmul %258, %288, %cst_180 {dimension_numbers = #tpu.dot_dimension_numbers<[1], [0], [0], [1], [0, 0, 1, 1], [], []>} : vector<16x32xf32>, vector<32x8xf32>, vector<16x8xf32> -> vector<16x8xf32>
    %c5_181 = arith.constant 5 : index
    %c0_182 = arith.constant 0 : index
    %c0_183 = arith.constant 0 : index
    %290 = vector.load %arg6[%c5_181, %c0_182, %c0_183] : memref<8x1x8xf32, #tpu.memory_space<vmem>>, vector<1x1x8xf32>
    %291 = vector.shape_cast %290 : vector<1x1x8xf32> to vector<1x8xf32>
    %292 = vector.broadcast %291 : vector<1x8xf32> to vector<16x8xf32>
    %293 = arith.addf %289, %292 : vector<16x8xf32>
    %c5_184 = arith.constant 5 : index
    %c0_185 = arith.constant 0 : index
    %c0_186 = arith.constant 0 : index
    %294 = vector.load %arg7[%c5_184, %c0_185, %c0_186] : memref<8x32x8xf32, #tpu.memory_space<vmem>>, vector<1x32x8xf32>
    %295 = vector.shape_cast %294 : vector<1x32x8xf32> to vector<32x8xf32>
    %cst_187 = arith.constant dense<0.000000e+00> : vector<16x8xf32>
    %296 = tpu.matmul %258, %295, %cst_187 {dimension_numbers = #tpu.dot_dimension_numbers<[1], [0], [0], [1], [0, 0, 1, 1], [], []>} : vector<16x32xf32>, vector<32x8xf32>, vector<16x8xf32> -> vector<16x8xf32>
    %c5_188 = arith.constant 5 : index
    %c0_189 = arith.constant 0 : index
    %c0_190 = arith.constant 0 : index
    %297 = vector.load %arg8[%c5_188, %c0_189, %c0_190] : memref<8x1x8xf32, #tpu.memory_space<vmem>>, vector<1x1x8xf32>
    %298 = vector.shape_cast %297 : vector<1x1x8xf32> to vector<1x8xf32>
    %299 = vector.broadcast %298 : vector<1x8xf32> to vector<16x8xf32>
    %300 = arith.addf %296, %299 : vector<16x8xf32>
    %c6 = arith.constant 6 : index
    %c0_191 = arith.constant 0 : index
    %c0_192 = arith.constant 0 : index
    %301 = vector.load %arg3[%c6, %c0_191, %c0_192] : memref<8x32x8xf32, #tpu.memory_space<vmem>>, vector<1x32x8xf32>
    %302 = vector.shape_cast %301 : vector<1x32x8xf32> to vector<32x8xf32>
    %cst_193 = arith.constant dense<0.000000e+00> : vector<16x8xf32>
    %303 = tpu.matmul %258, %302, %cst_193 {dimension_numbers = #tpu.dot_dimension_numbers<[1], [0], [0], [1], [0, 0, 1, 1], [], []>} : vector<16x32xf32>, vector<32x8xf32>, vector<16x8xf32> -> vector<16x8xf32>
    %c6_194 = arith.constant 6 : index
    %c0_195 = arith.constant 0 : index
    %c0_196 = arith.constant 0 : index
    %304 = vector.load %arg4[%c6_194, %c0_195, %c0_196] : memref<8x1x8xf32, #tpu.memory_space<vmem>>, vector<1x1x8xf32>
    %305 = vector.shape_cast %304 : vector<1x1x8xf32> to vector<1x8xf32>
    %306 = vector.broadcast %305 : vector<1x8xf32> to vector<16x8xf32>
    %307 = arith.addf %303, %306 : vector<16x8xf32>
    %c6_197 = arith.constant 6 : index
    %c0_198 = arith.constant 0 : index
    %c0_199 = arith.constant 0 : index
    %308 = vector.load %arg5[%c6_197, %c0_198, %c0_199] : memref<8x32x8xf32, #tpu.memory_space<vmem>>, vector<1x32x8xf32>
    %309 = vector.shape_cast %308 : vector<1x32x8xf32> to vector<32x8xf32>
    %cst_200 = arith.constant dense<0.000000e+00> : vector<16x8xf32>
    %310 = tpu.matmul %258, %309, %cst_200 {dimension_numbers = #tpu.dot_dimension_numbers<[1], [0], [0], [1], [0, 0, 1, 1], [], []>} : vector<16x32xf32>, vector<32x8xf32>, vector<16x8xf32> -> vector<16x8xf32>
    %c6_201 = arith.constant 6 : index
    %c0_202 = arith.constant 0 : index
    %c0_203 = arith.constant 0 : index
    %311 = vector.load %arg6[%c6_201, %c0_202, %c0_203] : memref<8x1x8xf32, #tpu.memory_space<vmem>>, vector<1x1x8xf32>
    %312 = vector.shape_cast %311 : vector<1x1x8xf32> to vector<1x8xf32>
    %313 = vector.broadcast %312 : vector<1x8xf32> to vector<16x8xf32>
    %314 = arith.addf %310, %313 : vector<16x8xf32>
    %c6_204 = arith.constant 6 : index
    %c0_205 = arith.constant 0 : index
    %c0_206 = arith.constant 0 : index
    %315 = vector.load %arg7[%c6_204, %c0_205, %c0_206] : memref<8x32x8xf32, #tpu.memory_space<vmem>>, vector<1x32x8xf32>
    %316 = vector.shape_cast %315 : vector<1x32x8xf32> to vector<32x8xf32>
    %cst_207 = arith.constant dense<0.000000e+00> : vector<16x8xf32>
    %317 = tpu.matmul %258, %316, %cst_207 {dimension_numbers = #tpu.dot_dimension_numbers<[1], [0], [0], [1], [0, 0, 1, 1], [], []>} : vector<16x32xf32>, vector<32x8xf32>, vector<16x8xf32> -> vector<16x8xf32>
    %c6_208 = arith.constant 6 : index
    %c0_209 = arith.constant 0 : index
    %c0_210 = arith.constant 0 : index
    %318 = vector.load %arg8[%c6_208, %c0_209, %c0_210] : memref<8x1x8xf32, #tpu.memory_space<vmem>>, vector<1x1x8xf32>
    %319 = vector.shape_cast %318 : vector<1x1x8xf32> to vector<1x8xf32>
    %320 = vector.broadcast %319 : vector<1x8xf32> to vector<16x8xf32>
    %321 = arith.addf %317, %320 : vector<16x8xf32>
    %c7 = arith.constant 7 : index
    %c0_211 = arith.constant 0 : index
    %c0_212 = arith.constant 0 : index
    %322 = vector.load %arg3[%c7, %c0_211, %c0_212] : memref<8x32x8xf32, #tpu.memory_space<vmem>>, vector<1x32x8xf32>
    %323 = vector.shape_cast %322 : vector<1x32x8xf32> to vector<32x8xf32>
    %cst_213 = arith.constant dense<0.000000e+00> : vector<16x8xf32>
    %324 = tpu.matmul %258, %323, %cst_213 {dimension_numbers = #tpu.dot_dimension_numbers<[1], [0], [0], [1], [0, 0, 1, 1], [], []>} : vector<16x32xf32>, vector<32x8xf32>, vector<16x8xf32> -> vector<16x8xf32>
    %c7_214 = arith.constant 7 : index
    %c0_215 = arith.constant 0 : index
    %c0_216 = arith.constant 0 : index
    %325 = vector.load %arg4[%c7_214, %c0_215, %c0_216] : memref<8x1x8xf32, #tpu.memory_space<vmem>>, vector<1x1x8xf32>
    %326 = vector.shape_cast %325 : vector<1x1x8xf32> to vector<1x8xf32>
    %327 = vector.broadcast %326 : vector<1x8xf32> to vector<16x8xf32>
    %328 = arith.addf %324, %327 : vector<16x8xf32>
    %c7_217 = arith.constant 7 : index
    %c0_218 = arith.constant 0 : index
    %c0_219 = arith.constant 0 : index
    %329 = vector.load %arg5[%c7_217, %c0_218, %c0_219] : memref<8x32x8xf32, #tpu.memory_space<vmem>>, vector<1x32x8xf32>
    %330 = vector.shape_cast %329 : vector<1x32x8xf32> to vector<32x8xf32>
    %cst_220 = arith.constant dense<0.000000e+00> : vector<16x8xf32>
    %331 = tpu.matmul %258, %330, %cst_220 {dimension_numbers = #tpu.dot_dimension_numbers<[1], [0], [0], [1], [0, 0, 1, 1], [], []>} : vector<16x32xf32>, vector<32x8xf32>, vector<16x8xf32> -> vector<16x8xf32>
    %c7_221 = arith.constant 7 : index
    %c0_222 = arith.constant 0 : index
    %c0_223 = arith.constant 0 : index
    %332 = vector.load %arg6[%c7_221, %c0_222, %c0_223] : memref<8x1x8xf32, #tpu.memory_space<vmem>>, vector<1x1x8xf32>
    %333 = vector.shape_cast %332 : vector<1x1x8xf32> to vector<1x8xf32>
    %334 = vector.broadcast %333 : vector<1x8xf32> to vector<16x8xf32>
    %335 = arith.addf %331, %334 : vector<16x8xf32>
    %c7_224 = arith.constant 7 : index
    %c0_225 = arith.constant 0 : index
    %c0_226 = arith.constant 0 : index
    %336 = vector.load %arg7[%c7_224, %c0_225, %c0_226] : memref<8x32x8xf32, #tpu.memory_space<vmem>>, vector<1x32x8xf32>
    %337 = vector.shape_cast %336 : vector<1x32x8xf32> to vector<32x8xf32>
    %cst_227 = arith.constant dense<0.000000e+00> : vector<16x8xf32>
    %338 = tpu.matmul %258, %337, %cst_227 {dimension_numbers = #tpu.dot_dimension_numbers<[1], [0], [0], [1], [0, 0, 1, 1], [], []>} : vector<16x32xf32>, vector<32x8xf32>, vector<16x8xf32> -> vector<16x8xf32>
    %c7_228 = arith.constant 7 : index
    %c0_229 = arith.constant 0 : index
    %c0_230 = arith.constant 0 : index
    %339 = vector.load %arg8[%c7_228, %c0_229, %c0_230] : memref<8x1x8xf32, #tpu.memory_space<vmem>>, vector<1x1x8xf32>
    %340 = vector.shape_cast %339 : vector<1x1x8xf32> to vector<1x8xf32>
    %341 = vector.broadcast %340 : vector<1x8xf32> to vector<16x8xf32>
    %342 = arith.addf %338, %341 : vector<16x8xf32>
    %343 = vector.extract_strided_slice %265 {offsets = [0, 0], sizes = [8, 8], strides = [1, 1]} : vector<16x8xf32> to vector<8x8xf32>
    %344 = vector.extract_strided_slice %272 {offsets = [0, 0], sizes = [8, 8], strides = [1, 1]} : vector<16x8xf32> to vector<8x8xf32>
    %cst_231 = arith.constant dense<0.000000e+00> : vector<8x8xf32>
    %345 = tpu.matmul %343, %344, %cst_231 {dimension_numbers = #tpu.dot_dimension_numbers<[1], [1], [0], [0], [0, 0, 1, 0], [], []>} : vector<8x8xf32>, vector<8x8xf32>, vector<8x8xf32> -> vector<8x8xf32>
    %346 = vector.extract_strided_slice %286 {offsets = [0, 0], sizes = [8, 8], strides = [1, 1]} : vector<16x8xf32> to vector<8x8xf32>
    %347 = vector.extract_strided_slice %293 {offsets = [0, 0], sizes = [8, 8], strides = [1, 1]} : vector<16x8xf32> to vector<8x8xf32>
    %cst_232 = arith.constant dense<0.000000e+00> : vector<8x8xf32>
    %348 = tpu.matmul %346, %347, %cst_232 {dimension_numbers = #tpu.dot_dimension_numbers<[1], [1], [0], [0], [0, 0, 1, 0], [], []>} : vector<8x8xf32>, vector<8x8xf32>, vector<8x8xf32> -> vector<8x8xf32>
    %349 = vector.extract_strided_slice %307 {offsets = [0, 0], sizes = [8, 8], strides = [1, 1]} : vector<16x8xf32> to vector<8x8xf32>
    %350 = vector.extract_strided_slice %314 {offsets = [0, 0], sizes = [8, 8], strides = [1, 1]} : vector<16x8xf32> to vector<8x8xf32>
    %cst_233 = arith.constant dense<0.000000e+00> : vector<8x8xf32>
    %351 = tpu.matmul %349, %350, %cst_233 {dimension_numbers = #tpu.dot_dimension_numbers<[1], [1], [0], [0], [0, 0, 1, 0], [], []>} : vector<8x8xf32>, vector<8x8xf32>, vector<8x8xf32> -> vector<8x8xf32>
    %352 = vector.extract_strided_slice %328 {offsets = [0, 0], sizes = [8, 8], strides = [1, 1]} : vector<16x8xf32> to vector<8x8xf32>
    %353 = vector.extract_strided_slice %335 {offsets = [0, 0], sizes = [8, 8], strides = [1, 1]} : vector<16x8xf32> to vector<8x8xf32>
    %cst_234 = arith.constant dense<0.000000e+00> : vector<8x8xf32>
    %354 = tpu.matmul %352, %353, %cst_234 {dimension_numbers = #tpu.dot_dimension_numbers<[1], [1], [0], [0], [0, 0, 1, 0], [], []>} : vector<8x8xf32>, vector<8x8xf32>, vector<8x8xf32> -> vector<8x8xf32>
    %355 = vector.extract_strided_slice %265 {offsets = [8, 0], sizes = [8, 8], strides = [1, 1]} : vector<16x8xf32> to vector<8x8xf32>
    %356 = vector.extract_strided_slice %272 {offsets = [8, 0], sizes = [8, 8], strides = [1, 1]} : vector<16x8xf32> to vector<8x8xf32>
    %cst_235 = arith.constant dense<0.000000e+00> : vector<8x8xf32>
    %357 = tpu.matmul %355, %356, %cst_235 {dimension_numbers = #tpu.dot_dimension_numbers<[1], [1], [0], [0], [0, 0, 1, 0], [], []>} : vector<8x8xf32>, vector<8x8xf32>, vector<8x8xf32> -> vector<8x8xf32>
    %358 = vector.extract_strided_slice %286 {offsets = [8, 0], sizes = [8, 8], strides = [1, 1]} : vector<16x8xf32> to vector<8x8xf32>
    %359 = vector.extract_strided_slice %293 {offsets = [8, 0], sizes = [8, 8], strides = [1, 1]} : vector<16x8xf32> to vector<8x8xf32>
    %cst_236 = arith.constant dense<0.000000e+00> : vector<8x8xf32>
    %360 = tpu.matmul %358, %359, %cst_236 {dimension_numbers = #tpu.dot_dimension_numbers<[1], [1], [0], [0], [0, 0, 1, 0], [], []>} : vector<8x8xf32>, vector<8x8xf32>, vector<8x8xf32> -> vector<8x8xf32>
    %361 = vector.extract_strided_slice %307 {offsets = [8, 0], sizes = [8, 8], strides = [1, 1]} : vector<16x8xf32> to vector<8x8xf32>
    %362 = vector.extract_strided_slice %314 {offsets = [8, 0], sizes = [8, 8], strides = [1, 1]} : vector<16x8xf32> to vector<8x8xf32>
    %cst_237 = arith.constant dense<0.000000e+00> : vector<8x8xf32>
    %363 = tpu.matmul %361, %362, %cst_237 {dimension_numbers = #tpu.dot_dimension_numbers<[1], [1], [0], [0], [0, 0, 1, 0], [], []>} : vector<8x8xf32>, vector<8x8xf32>, vector<8x8xf32> -> vector<8x8xf32>
    %364 = vector.extract_strided_slice %328 {offsets = [8, 0], sizes = [8, 8], strides = [1, 1]} : vector<16x8xf32> to vector<8x8xf32>
    %365 = vector.extract_strided_slice %335 {offsets = [8, 0], sizes = [8, 8], strides = [1, 1]} : vector<16x8xf32> to vector<8x8xf32>
    %cst_238 = arith.constant dense<0.000000e+00> : vector<8x8xf32>
    %366 = tpu.matmul %364, %365, %cst_238 {dimension_numbers = #tpu.dot_dimension_numbers<[1], [1], [0], [0], [0, 0, 1, 0], [], []>} : vector<8x8xf32>, vector<8x8xf32>, vector<8x8xf32> -> vector<8x8xf32>
    %367 = tpu.concatenate %345, %348, %351, %354, %357, %360, %363, %366 in 0 : vector<8x8xf32>, vector<8x8xf32>, vector<8x8xf32>, vector<8x8xf32>, vector<8x8xf32>, vector<8x8xf32>, vector<8x8xf32>, vector<8x8xf32> -> vector<64x8xf32>
    %cst_239 = arith.constant dense<0xFF800000> : vector<64xf32>
    %368 = vector.multi_reduction <maximumf>, %367, %cst_239 [1] : vector<64x8xf32> to vector<64xf32>
    %369 = vector.shape_cast %368 : vector<64xf32> to vector<64x1xf32>
    %370 = vector.broadcast %369 : vector<64x1xf32> to vector<64x8xf32>
    %371 = arith.subf %367, %370 : vector<64x8xf32>
    %372 = math.exp %371 : vector<64x8xf32>
    %cst_240 = arith.constant dense<0.000000e+00> : vector<64xf32>
    %373 = vector.multi_reduction <add>, %372, %cst_240 [1] : vector<64x8xf32> to vector<64xf32>
    %374 = vector.shape_cast %373 : vector<64xf32> to vector<64x1xf32>
    %375 = vector.broadcast %374 : vector<64x1xf32> to vector<64x8xf32>
    %376 = arith.divf %372, %375 : vector<64x8xf32>
    %c1_241 = arith.constant 1 : index
    %c0_242 = arith.constant 0 : index
    %c0_243 = arith.constant 0 : index
    %377 = vector.load %arg9[%c1_241, %c0_242, %c0_243] : memref<2x32x32xf32, #tpu.memory_space<vmem>>, vector<1x32x32xf32>
    %378 = vector.shape_cast %377 : vector<1x32x32xf32> to vector<32x32xf32>
    %379 = vector.extract_strided_slice %376 {offsets = [0, 0], sizes = [8, 8], strides = [1, 1]} : vector<64x8xf32> to vector<8x8xf32>
    %380 = vector.extract_strided_slice %279 {offsets = [0, 0], sizes = [8, 8], strides = [1, 1]} : vector<16x8xf32> to vector<8x8xf32>
    %cst_244 = arith.constant dense<0.000000e+00> : vector<8x8xf32>
    %381 = tpu.matmul %379, %380, %cst_244 {dimension_numbers = #tpu.dot_dimension_numbers<[1], [0], [0], [1], [0, 0, 1, 1], [], []>} : vector<8x8xf32>, vector<8x8xf32>, vector<8x8xf32> -> vector<8x8xf32>
    %382 = vector.extract_strided_slice %378 {offsets = [0, 0], sizes = [8, 32], strides = [1, 1]} : vector<32x32xf32> to vector<8x32xf32>
    %cst_245 = arith.constant dense<0.000000e+00> : vector<8x32xf32>
    %383 = tpu.matmul %381, %382, %cst_245 {dimension_numbers = #tpu.dot_dimension_numbers<[1], [0], [0], [1], [0, 0, 1, 1], [], []>} : vector<8x8xf32>, vector<8x32xf32>, vector<8x32xf32> -> vector<8x32xf32>
    %384 = vector.extract_strided_slice %376 {offsets = [8, 0], sizes = [8, 8], strides = [1, 1]} : vector<64x8xf32> to vector<8x8xf32>
    %385 = vector.extract_strided_slice %300 {offsets = [0, 0], sizes = [8, 8], strides = [1, 1]} : vector<16x8xf32> to vector<8x8xf32>
    %cst_246 = arith.constant dense<0.000000e+00> : vector<8x8xf32>
    %386 = tpu.matmul %384, %385, %cst_246 {dimension_numbers = #tpu.dot_dimension_numbers<[1], [0], [0], [1], [0, 0, 1, 1], [], []>} : vector<8x8xf32>, vector<8x8xf32>, vector<8x8xf32> -> vector<8x8xf32>
    %387 = vector.extract_strided_slice %378 {offsets = [8, 0], sizes = [8, 32], strides = [1, 1]} : vector<32x32xf32> to vector<8x32xf32>
    %cst_247 = arith.constant dense<0.000000e+00> : vector<8x32xf32>
    %388 = tpu.matmul %386, %387, %cst_247 {dimension_numbers = #tpu.dot_dimension_numbers<[1], [0], [0], [1], [0, 0, 1, 1], [], []>} : vector<8x8xf32>, vector<8x32xf32>, vector<8x32xf32> -> vector<8x32xf32>
    %389 = arith.addf %383, %388 : vector<8x32xf32>
    %390 = vector.extract_strided_slice %376 {offsets = [16, 0], sizes = [8, 8], strides = [1, 1]} : vector<64x8xf32> to vector<8x8xf32>
    %391 = vector.extract_strided_slice %321 {offsets = [0, 0], sizes = [8, 8], strides = [1, 1]} : vector<16x8xf32> to vector<8x8xf32>
    %cst_248 = arith.constant dense<0.000000e+00> : vector<8x8xf32>
    %392 = tpu.matmul %390, %391, %cst_248 {dimension_numbers = #tpu.dot_dimension_numbers<[1], [0], [0], [1], [0, 0, 1, 1], [], []>} : vector<8x8xf32>, vector<8x8xf32>, vector<8x8xf32> -> vector<8x8xf32>
    %393 = vector.extract_strided_slice %378 {offsets = [16, 0], sizes = [8, 32], strides = [1, 1]} : vector<32x32xf32> to vector<8x32xf32>
    %cst_249 = arith.constant dense<0.000000e+00> : vector<8x32xf32>
    %394 = tpu.matmul %392, %393, %cst_249 {dimension_numbers = #tpu.dot_dimension_numbers<[1], [0], [0], [1], [0, 0, 1, 1], [], []>} : vector<8x8xf32>, vector<8x32xf32>, vector<8x32xf32> -> vector<8x32xf32>
    %395 = arith.addf %389, %394 : vector<8x32xf32>
    %396 = vector.extract_strided_slice %376 {offsets = [24, 0], sizes = [8, 8], strides = [1, 1]} : vector<64x8xf32> to vector<8x8xf32>
    %397 = vector.extract_strided_slice %342 {offsets = [0, 0], sizes = [8, 8], strides = [1, 1]} : vector<16x8xf32> to vector<8x8xf32>
    %cst_250 = arith.constant dense<0.000000e+00> : vector<8x8xf32>
    %398 = tpu.matmul %396, %397, %cst_250 {dimension_numbers = #tpu.dot_dimension_numbers<[1], [0], [0], [1], [0, 0, 1, 1], [], []>} : vector<8x8xf32>, vector<8x8xf32>, vector<8x8xf32> -> vector<8x8xf32>
    %399 = vector.extract_strided_slice %378 {offsets = [24, 0], sizes = [8, 32], strides = [1, 1]} : vector<32x32xf32> to vector<8x32xf32>
    %cst_251 = arith.constant dense<0.000000e+00> : vector<8x32xf32>
    %400 = tpu.matmul %398, %399, %cst_251 {dimension_numbers = #tpu.dot_dimension_numbers<[1], [0], [0], [1], [0, 0, 1, 1], [], []>} : vector<8x8xf32>, vector<8x32xf32>, vector<8x32xf32> -> vector<8x32xf32>
    %401 = arith.addf %395, %400 : vector<8x32xf32>
    %402 = vector.extract_strided_slice %376 {offsets = [32, 0], sizes = [8, 8], strides = [1, 1]} : vector<64x8xf32> to vector<8x8xf32>
    %403 = vector.extract_strided_slice %279 {offsets = [8, 0], sizes = [8, 8], strides = [1, 1]} : vector<16x8xf32> to vector<8x8xf32>
    %cst_252 = arith.constant dense<0.000000e+00> : vector<8x8xf32>
    %404 = tpu.matmul %402, %403, %cst_252 {dimension_numbers = #tpu.dot_dimension_numbers<[1], [0], [0], [1], [0, 0, 1, 1], [], []>} : vector<8x8xf32>, vector<8x8xf32>, vector<8x8xf32> -> vector<8x8xf32>
    %405 = vector.extract_strided_slice %378 {offsets = [0, 0], sizes = [8, 32], strides = [1, 1]} : vector<32x32xf32> to vector<8x32xf32>
    %cst_253 = arith.constant dense<0.000000e+00> : vector<8x32xf32>
    %406 = tpu.matmul %404, %405, %cst_253 {dimension_numbers = #tpu.dot_dimension_numbers<[1], [0], [0], [1], [0, 0, 1, 1], [], []>} : vector<8x8xf32>, vector<8x32xf32>, vector<8x32xf32> -> vector<8x32xf32>
    %407 = vector.extract_strided_slice %376 {offsets = [40, 0], sizes = [8, 8], strides = [1, 1]} : vector<64x8xf32> to vector<8x8xf32>
    %408 = vector.extract_strided_slice %300 {offsets = [8, 0], sizes = [8, 8], strides = [1, 1]} : vector<16x8xf32> to vector<8x8xf32>
    %cst_254 = arith.constant dense<0.000000e+00> : vector<8x8xf32>
    %409 = tpu.matmul %407, %408, %cst_254 {dimension_numbers = #tpu.dot_dimension_numbers<[1], [0], [0], [1], [0, 0, 1, 1], [], []>} : vector<8x8xf32>, vector<8x8xf32>, vector<8x8xf32> -> vector<8x8xf32>
    %410 = vector.extract_strided_slice %378 {offsets = [8, 0], sizes = [8, 32], strides = [1, 1]} : vector<32x32xf32> to vector<8x32xf32>
    %cst_255 = arith.constant dense<0.000000e+00> : vector<8x32xf32>
    %411 = tpu.matmul %409, %410, %cst_255 {dimension_numbers = #tpu.dot_dimension_numbers<[1], [0], [0], [1], [0, 0, 1, 1], [], []>} : vector<8x8xf32>, vector<8x32xf32>, vector<8x32xf32> -> vector<8x32xf32>
    %412 = arith.addf %406, %411 : vector<8x32xf32>
    %413 = vector.extract_strided_slice %376 {offsets = [48, 0], sizes = [8, 8], strides = [1, 1]} : vector<64x8xf32> to vector<8x8xf32>
    %414 = vector.extract_strided_slice %321 {offsets = [8, 0], sizes = [8, 8], strides = [1, 1]} : vector<16x8xf32> to vector<8x8xf32>
    %cst_256 = arith.constant dense<0.000000e+00> : vector<8x8xf32>
    %415 = tpu.matmul %413, %414, %cst_256 {dimension_numbers = #tpu.dot_dimension_numbers<[1], [0], [0], [1], [0, 0, 1, 1], [], []>} : vector<8x8xf32>, vector<8x8xf32>, vector<8x8xf32> -> vector<8x8xf32>
    %416 = vector.extract_strided_slice %378 {offsets = [16, 0], sizes = [8, 32], strides = [1, 1]} : vector<32x32xf32> to vector<8x32xf32>
    %cst_257 = arith.constant dense<0.000000e+00> : vector<8x32xf32>
    %417 = tpu.matmul %415, %416, %cst_257 {dimension_numbers = #tpu.dot_dimension_numbers<[1], [0], [0], [1], [0, 0, 1, 1], [], []>} : vector<8x8xf32>, vector<8x32xf32>, vector<8x32xf32> -> vector<8x32xf32>
    %418 = arith.addf %412, %417 : vector<8x32xf32>
    %419 = vector.extract_strided_slice %376 {offsets = [56, 0], sizes = [8, 8], strides = [1, 1]} : vector<64x8xf32> to vector<8x8xf32>
    %420 = vector.extract_strided_slice %342 {offsets = [8, 0], sizes = [8, 8], strides = [1, 1]} : vector<16x8xf32> to vector<8x8xf32>
    %cst_258 = arith.constant dense<0.000000e+00> : vector<8x8xf32>
    %421 = tpu.matmul %419, %420, %cst_258 {dimension_numbers = #tpu.dot_dimension_numbers<[1], [0], [0], [1], [0, 0, 1, 1], [], []>} : vector<8x8xf32>, vector<8x8xf32>, vector<8x8xf32> -> vector<8x8xf32>
    %422 = vector.extract_strided_slice %378 {offsets = [24, 0], sizes = [8, 32], strides = [1, 1]} : vector<32x32xf32> to vector<8x32xf32>
    %cst_259 = arith.constant dense<0.000000e+00> : vector<8x32xf32>
    %423 = tpu.matmul %421, %422, %cst_259 {dimension_numbers = #tpu.dot_dimension_numbers<[1], [0], [0], [1], [0, 0, 1, 1], [], []>} : vector<8x8xf32>, vector<8x32xf32>, vector<8x32xf32> -> vector<8x32xf32>
    %424 = arith.addf %418, %423 : vector<8x32xf32>
    %425 = tpu.concatenate %401, %424 in 0 : vector<8x32xf32>, vector<8x32xf32> -> vector<16x32xf32>
    %426 = arith.addf %240, %425 : vector<16x32xf32>
    %c1_260 = arith.constant 1 : index
    %c0_261 = arith.constant 0 : index
    %c0_262 = arith.constant 0 : index
    %427 = vector.load %arg10[%c1_260, %c0_261, %c0_262] : memref<2x1x32xf32, #tpu.memory_space<vmem>>, vector<1x1x32xf32>
    %428 = vector.shape_cast %427 : vector<1x1x32xf32> to vector<1x32xf32>
    %429 = vector.broadcast %428 : vector<1x32xf32> to vector<16x32xf32>
    %430 = arith.addf %426, %429 : vector<16x32xf32>
    %cst_263 = arith.constant dense<0.000000e+00> : vector<16xf32>
    %431 = vector.multi_reduction <add>, %430, %cst_263 [1] : vector<16x32xf32> to vector<16xf32>
    %432 = vector.shape_cast %431 : vector<16xf32> to vector<16x1xf32>
    %cst_264 = arith.constant 3.200000e+01 : f32
    %433 = vector.broadcast %cst_264 : f32 to vector<16x1xf32>
    %434 = arith.divf %432, %433 : vector<16x1xf32>
    %435 = vector.broadcast %434 : vector<16x1xf32> to vector<16x32xf32>
    %436 = arith.subf %430, %435 : vector<16x32xf32>
    %437 = arith.mulf %436, %436 : vector<16x32xf32>
    %cst_265 = arith.constant dense<0.000000e+00> : vector<16xf32>
    %438 = vector.multi_reduction <add>, %437, %cst_265 [1] : vector<16x32xf32> to vector<16xf32>
    %439 = vector.shape_cast %438 : vector<16xf32> to vector<16x1xf32>
    %cst_266 = arith.constant 3.200000e+01 : f32
    %440 = vector.broadcast %cst_266 : f32 to vector<16x1xf32>
    %441 = arith.divf %439, %440 : vector<16x1xf32>
    %442 = vector.broadcast %434 : vector<16x1xf32> to vector<16x32xf32>
    %443 = arith.subf %430, %442 : vector<16x32xf32>
    %cst_267 = arith.constant 9.99999996E-13 : f32
    %444 = vector.broadcast %cst_267 : f32 to vector<16x1xf32>
    %445 = arith.addf %441, %444 : vector<16x1xf32>
    %446 = math.rsqrt %445 : vector<16x1xf32>
    %447 = vector.broadcast %446 : vector<16x1xf32> to vector<16x32xf32>
    %448 = arith.mulf %443, %447 : vector<16x32xf32>
    %c1_268 = arith.constant 1 : index
    %c0_269 = arith.constant 0 : index
    %c0_270 = arith.constant 0 : index
    %449 = vector.load %arg11[%c1_268, %c0_269, %c0_270] : memref<2x32x128xf32, #tpu.memory_space<vmem>>, vector<1x32x128xf32>
    %450 = vector.shape_cast %449 : vector<1x32x128xf32> to vector<32x128xf32>
    %cst_271 = arith.constant dense<0.000000e+00> : vector<16x128xf32>
    %451 = tpu.matmul %448, %450, %cst_271 {dimension_numbers = #tpu.dot_dimension_numbers<[1], [0], [0], [1], [0, 0, 1, 1], [], []>} : vector<16x32xf32>, vector<32x128xf32>, vector<16x128xf32> -> vector<16x128xf32>
    %c1_272 = arith.constant 1 : index
    %c0_273 = arith.constant 0 : index
    %c0_274 = arith.constant 0 : index
    %452 = vector.load %arg12[%c1_272, %c0_273, %c0_274] : memref<2x1x128xf32, #tpu.memory_space<vmem>>, vector<1x1x128xf32>
    %453 = vector.shape_cast %452 : vector<1x1x128xf32> to vector<1x128xf32>
    %454 = vector.broadcast %453 : vector<1x128xf32> to vector<16x128xf32>
    %455 = arith.addf %451, %454 : vector<16x128xf32>
    %cst_275 = arith.constant 5.000000e-01 : f32
    %456 = vector.broadcast %cst_275 : f32 to vector<16x128xf32>
    %457 = arith.mulf %456, %455 : vector<16x128xf32>
    %cst_276 = arith.constant 4.471500e-02 : f32
    %458 = vector.broadcast %cst_276 : f32 to vector<16x128xf32>
    %459 = arith.mulf %458, %455 : vector<16x128xf32>
    %460 = arith.mulf %459, %455 : vector<16x128xf32>
    %461 = arith.mulf %460, %455 : vector<16x128xf32>
    %462 = arith.addf %455, %461 : vector<16x128xf32>
    %cst_277 = arith.constant 0.797884583 : f32
    %463 = vector.broadcast %cst_277 : f32 to vector<16x128xf32>
    %464 = arith.mulf %463, %462 : vector<16x128xf32>
    %465 = math.tanh %464 : vector<16x128xf32>
    %cst_278 = arith.constant 1.000000e+00 : f32
    %466 = vector.broadcast %cst_278 : f32 to vector<16x128xf32>
    %467 = arith.addf %466, %465 : vector<16x128xf32>
    %468 = arith.mulf %457, %467 : vector<16x128xf32>
    %c1_279 = arith.constant 1 : index
    %c0_280 = arith.constant 0 : index
    %c0_281 = arith.constant 0 : index
    %469 = vector.load %arg13[%c1_279, %c0_280, %c0_281] : memref<2x128x32xf32, #tpu.memory_space<vmem>>, vector<1x128x32xf32>
    %470 = vector.shape_cast %469 : vector<1x128x32xf32> to vector<128x32xf32>
    %cst_282 = arith.constant dense<0.000000e+00> : vector<16x32xf32>
    %471 = tpu.matmul %468, %470, %cst_282 {dimension_numbers = #tpu.dot_dimension_numbers<[1], [0], [0], [1], [0, 0, 1, 1], [], []>} : vector<16x128xf32>, vector<128x32xf32>, vector<16x32xf32> -> vector<16x32xf32>
    %472 = arith.addf %430, %471 : vector<16x32xf32>
    %c1_283 = arith.constant 1 : index
    %c0_284 = arith.constant 0 : index
    %c0_285 = arith.constant 0 : index
    %473 = vector.load %arg14[%c1_283, %c0_284, %c0_285] : memref<2x1x32xf32, #tpu.memory_space<vmem>>, vector<1x1x32xf32>
    %474 = vector.shape_cast %473 : vector<1x1x32xf32> to vector<1x32xf32>
    %475 = vector.broadcast %474 : vector<1x32xf32> to vector<16x32xf32>
    %476 = arith.addf %472, %475 : vector<16x32xf32>
    %cst_286 = arith.constant dense<0.000000e+00> : vector<16xf32>
    %477 = vector.multi_reduction <add>, %476, %cst_286 [1] : vector<16x32xf32> to vector<16xf32>
    %478 = vector.shape_cast %477 : vector<16xf32> to vector<16x1xf32>
    %cst_287 = arith.constant 3.200000e+01 : f32
    %479 = vector.broadcast %cst_287 : f32 to vector<16x1xf32>
    %480 = arith.divf %478, %479 : vector<16x1xf32>
    %481 = vector.broadcast %480 : vector<16x1xf32> to vector<16x32xf32>
    %482 = arith.subf %476, %481 : vector<16x32xf32>
    %483 = arith.mulf %482, %482 : vector<16x32xf32>
    %cst_288 = arith.constant dense<0.000000e+00> : vector<16xf32>
    %484 = vector.multi_reduction <add>, %483, %cst_288 [1] : vector<16x32xf32> to vector<16xf32>
    %485 = vector.shape_cast %484 : vector<16xf32> to vector<16x1xf32>
    %cst_289 = arith.constant 3.200000e+01 : f32
    %486 = vector.broadcast %cst_289 : f32 to vector<16x1xf32>
    %487 = arith.divf %485, %486 : vector<16x1xf32>
    %488 = vector.broadcast %480 : vector<16x1xf32> to vector<16x32xf32>
    %489 = arith.subf %476, %488 : vector<16x32xf32>
    %cst_290 = arith.constant 9.99999996E-13 : f32
    %490 = vector.broadcast %cst_290 : f32 to vector<16x1xf32>
    %491 = arith.addf %487, %490 : vector<16x1xf32>
    %492 = math.rsqrt %491 : vector<16x1xf32>
    %493 = vector.broadcast %492 : vector<16x1xf32> to vector<16x32xf32>
    %494 = arith.mulf %489, %493 : vector<16x32xf32>
    %c0_291 = arith.constant 0 : index
    %c0_292 = arith.constant 0 : index
    %495 = vector.load %arg15[%c0_291, %c0_292] : memref<2x16xf32, #tpu.memory_space<vmem>>, vector<2x16xf32>
    %cst_293 = arith.constant dense<0.000000e+00> : vector<2x32xf32>
    %496 = tpu.matmul %495, %494, %cst_293 {dimension_numbers = #tpu.dot_dimension_numbers<[1], [0], [0], [1], [0, 0, 1, 1], [], []>} : vector<2x16xf32>, vector<16x32xf32>, vector<2x32xf32> -> vector<2x32xf32>
    %c0_294 = arith.constant 0 : index
    %c0_295 = arith.constant 0 : index
    %497 = vector.load %arg16[%c0_294, %c0_295] : memref<32x5xf32, #tpu.memory_space<vmem>>, vector<32x5xf32>
    %cst_296 = arith.constant dense<0.000000e+00> : vector<2x5xf32>
    %498 = tpu.matmul %496, %497, %cst_296 {dimension_numbers = #tpu.dot_dimension_numbers<[1], [0], [0], [1], [0, 0, 1, 1], [], []>} : vector<2x32xf32>, vector<32x5xf32>, vector<2x5xf32> -> vector<2x5xf32>
    %c0_297 = arith.constant 0 : index
    %c0_298 = arith.constant 0 : index
    %499 = vector.load %arg17[%c0_297, %c0_298] : memref<1x5xf32, #tpu.memory_space<vmem>>, vector<1x5xf32>
    %500 = vector.broadcast %499 : vector<1x5xf32> to vector<2x5xf32>
    %501 = arith.addf %498, %500 : vector<2x5xf32>
    %c0_299 = arith.constant 0 : index
    %c0_300 = arith.constant 0 : index
    %502 = vector.load %arg18[%c0_299, %c0_300] : memref<2x5xf32, #tpu.memory_space<vmem>>, vector<2x5xf32>
    tpu.vector_store %arg18[%c0_299, %c0_300], %501 {strides = array<i32>} : memref<2x5xf32, #tpu.memory_space<vmem>>, vector<2x5xf32>,
    return
  }
}

</mosaic_0001>

<bundles_post_ra>
// kernel: ast_classifier_forward.1
= control target key start
LH: loop header
LB: loop body
LE: loop exit
PB: predicated region body
PF: predicated region fallthrough
CT: control target
= control target key end

     0   :  { %s9651_s0 = inlined_call_operand.vmem [shape: f32[16,64], index: 0, kind: input, shape index: {}]   ;;  %s9652_s1 = inlined_call_operand.vmem [shape: f32[64,32], index: 1, kind: input, shape index: {}]   ;;  %s9653_s2 = inlined_call_operand.vmem [shape: f32[16,32], index: 2, kind: input, shape index: {}]   ;;  %s9654_s3 = inlined_call_operand.vmem [shape: f32[8,32,8], index: 3, kind: input, shape index: {}]   ;;  %s9655_s4 = inlined_call_operand.vmem [shape: f32[8,1,8], index: 4, kind: input, shape index: {}]   ;;  %s9656_s5 = inlined_call_operand.vmem [shape: f32[8,32,8], index: 5, kind: input, shape index: {}]   ;;  %s9657_s6 = inlined_call_operand.vmem [shape: f32[8,1,8], index: 6, kind: input, shape index: {}]   ;;  %s9658_s7 = inlined_call_operand.vmem [shape: f32[8,32,8], index: 7, kind: input, shape index: {}]   ;;  %s9659_s8 = inlined_call_operand.vmem [shape: f32[8,1,8], index: 8, kind: input, shape index: {}]   ;;  %s9660_s9 = inlined_call_operand.vmem [shape: f32[2,32,32], index: 9, kind: input, shape index: {}]   ;;  %s9661_s10 = inlined_call_operand.vmem [shape: f32[2,1,32], index: 10, kind: input, shape index: {}]   ;;  %s9662_s11 = inlined_call_operand.vmem [shape: f32[2,32,128], index: 11, kind: input, shape index: {}]   ;;  %s9663_s12 = inlined_call_operand.vmem [shape: f32[2,1,128], index: 12, kind: input, shape index: {}]   ;;  %s9664_s13 = inlined_call_operand.vmem [shape: f32[2,128,32], index: 13, kind: input, shape index: {}]   ;;  %s9665_s14 = inlined_call_operand.vmem [shape: f32[2,1,32], index: 14, kind: input, shape index: {}]   ;;  %s9666_s15 = inlined_call_operand.vmem [shape: f32[2,16], index: 15, kind: input, shape index: {}]   ;;  %s9667_s16 = inlined_call_operand.vmem [shape: f32[32,5], index: 16, kind: input, shape index: {}]   ;;  %s9668_s17 = inlined_call_operand.vmem [shape: f32[1,5], index: 17, kind: input, shape index: {}]   ;;  %s9669_s18 = inlined_call_operand.hbm [shape: f32[2,5], index: 18, kind: output, shape index: {}]  }
   0x1   :  { %9673 = sst [smem:[#allocation5_spill]] %s9651_s0 }
   0x2   :  { %9674 = sst [smem:[#allocation6_spill]] %s9652_s1 }
   0x3   :  { %9675 = sst [smem:[#allocation7_spill]] %s9653_s2 }
   0x4   :  { %s9676_s29 = sld [smem:[#allocation6_spill]]  ;;  %vm72_vm0 = vcmask 523264   ;;  %s9677_s27 = sld [smem:[#allocation5_spill]] }
   0xa   :  { %v62_v0 = vld [vmem:[%s9676_s29] sm:$0xff]  ;;  %v63_v1 = vld [vmem:[%s9676_s29 + $0x8] sm:$0xff]  ;;  %v64_v2 = vld [vmem:[%s9676_s29 + $0x10] sm:$0xff] }
   0xb   :  { %v7998_v3 = vpack.c.bf16 %v63_v1, %v62_v0  ;;  %v65_v4 = vld [vmem:[%s9676_s29 + $0x18] sm:$0xff]  ;;  %v66_v6 = vld [vmem:[%s9676_s29 + $0x20] sm:$0xff]  ;;  %v67_v7 = vld [vmem:[%s9676_s29 + $0x28] sm:$0xff] }
   0xc   :  { %v8002_v5 = vpack.c.bf16 %v65_v4, %v64_v2  ;;  %v60_v8 = vld [vmem:[%s9677_s27] sm:$0xff] }
   0xd   :  { %7999 = vmatprep.subr.bf16.mxu0 %v7998_v3  ;;  %7381 = vmatprep.mubr.msk.f32.mxu0 %vm72_vm0, %v60_v8 }
   0xe   :  { %23 = vsyncpa [#allocation3], 0  ;;  %8001 = vmatpush3.bf16.msra.mxu0 %v7998_v3  ;;  %v8006_v9 = vpack.c.bf16 %v67_v7, %v66_v6  ;;  %v68_v10 = vld [vmem:[%s9676_s29 + $0x30] sm:$0xff]  ;;  %v69_v11 = vld [vmem:[%s9676_s29 + $0x38] sm:$0xff]  ;;  %s9678_s2 = sld [smem:[#allocation7_spill]]  ;;  %vm154_vm1 = vcmask 261120  }
   0xf   :  { %8003 = vmatprep.subr.bf16.mxu0 %v8002_v5  ;;  %v8010_v12 = vpack.c.bf16 %v69_v11, %v68_v10  ;;  %v61_v13 = vld [vmem:[%s9677_s27 + $0x8] sm:$0xff]  ;;  %v182_v32 = vld [vmem:[%s9654_s3] sm:$0xff]  ;;  %v184_v38 = vld [vmem:[%s9654_s3 + $0x10] sm:$0xff]  ;;  %vm8416_vm2 = vmmov 0   ;;  %vm1238_vm3 = vcmask 64512   ;;  %vm6602_vm4 = vcmask 130048  }
  0x10   :  { %v183_v33 = vld [vmem:[%s9654_s3 + $0x8] sm:$0xff]  ;;  %v274_v34 = vld [vmem:[%s9656_s5] sm:$0xff]  ;;  %v185_v39 = vld [vmem:[%s9654_s3 + $0x18] sm:$0xff]  ;;  %s8418_s21 = smov [#allocation2]   ;;  %vm6760_vm5 = vcmask 33792  }
  0x11   :  { %v8014_v35 = vpack.c.bf16 %v183_v33, %v182_v32  ;;  %v275_v36 = vld [vmem:[%s9656_s5 + $0x8] sm:$0xff]  ;;  %v276_v40 = vld [vmem:[%s9656_s5 + $0x10] sm:$0xff]  ;;  %v8018_v41 = vpack.c.bf16 %v185_v39, %v184_v38  ;;  %v277_v42 = vld [vmem:[%s9656_s5 + $0x18] sm:$0xff]  ;;  %s6768_s22 = sshll.u32 %s8418_s21, 4  ;;  %s6769_s22 = int_to_ptr.vmem [resolvable:$true] %s6768_s22 }
  0x12   :  { %8005 = vmatpush3.bf16.msra.mxu0 %v8002_v5  ;;  %v8022_v37 = vpack.c.bf16 %v275_v36, %v274_v34  ;;  %v8026_v43 = vpack.c.bf16 %v277_v42, %v276_v40  ;;  %v360_v44 = vld [vmem:[%s9658_s7] sm:$0xff]  ;;  %v361_v45 = vld [vmem:[%s9658_s7 + $0x8] sm:$0xff]  ;;  %v362_v58 = vld [vmem:[%s9658_s7 + $0x10] sm:$0xff]  ;;  %p8396_p1 = scmp.lt.s32.totalorder %s6769_s22, %s6769_s22 }
  0x13   :  { %8007 = vmatprep.subr.bf16.mxu0 %v8006_v9  ;;  %v6787_v46 = vld [vmem:[%s9654_s3 + $0x20] sm:$0xff]  ;;  %v8030_v47 = vpack.c.bf16 %v361_v45, %v360_v44  ;;  %v6788_v48 = vld [vmem:[%s9654_s3 + $0x28] sm:$0xff]  ;;  %v363_v59 = vld [vmem:[%s9658_s7 + $0x18] sm:$0xff] }
  0x14   :  { %v70_v14 = vld [vmem:[%s9678_s2] sm:$0xff]  ;;  %v71_v16 = vld [vmem:[%s9678_s2 + $0x8] sm:$0xff]  ;;  %8023 = vmatprep.subr.bf16.mxu1 %v8022_v37  ;;  %v8038_v49 = vpack.c.bf16 %v6788_v48, %v6787_v46  ;;  %v6789_v60 = vld [vmem:[%s9654_s3 + $0x30] sm:$0xff]  ;;  %v8034_v1 = vpack.c.bf16 %v363_v59, %v362_v58 }
  0x15   :  { %8025 = vmatpush3.bf16.msra.mxu1 %v8022_v37  ;;  %v6790_v61 = vld [vmem:[%s9654_s3 + $0x38] sm:$0xff]  ;;  %v6795_v0 = vld [vmem:[%s9656_s5 + $0x20] sm:$0xff]  ;;  %v6796_v3 = vld [vmem:[%s9656_s5 + $0x28] sm:$0xff] }
  0x16   :  { %8009 = vmatpush3.bf16.msra.mxu0 %v8006_v9  ;;  %8027 = vmatprep.subr.bf16.mxu1 %v8026_v43  ;;  %v8042_v2 = vpack.c.bf16 %v6790_v61, %v6789_v60  ;;  %v6803_v4 = vld [vmem:[%s9658_s7 + $0x20] sm:$0xff]  ;;  %v6804_v5 = vld [vmem:[%s9658_s7 + $0x28] sm:$0xff]  ;;  %v8046_v6 = vpack.c.bf16 %v6796_v3, %v6795_v0  ;;  %v6797_v8 = vld [vmem:[%s9656_s5 + $0x30] sm:$0xff] }
  0x17   :  { %8011 = vmatprep.subr.bf16.mxu0 %v8010_v12  ;;  %v8054_v7 = vpack.c.bf16 %v6804_v5, %v6803_v4  ;;  %v6798_v9 = vld [vmem:[%s9656_s5 + $0x38] sm:$0xff]  ;;  %v6805_v10 = vld [vmem:[%s9658_s7 + $0x30] sm:$0xff]  ;;  %v6843_v39 = vld [vmem:[%s9656_s5 + $0x60] sm:$0xff] }
  0x18   :  { %v6806_v11 = vld [vmem:[%s9658_s7 + $0x38] sm:$0xff]  ;;  %v6829_v34 = vld [vmem:[%s9658_s7 + $0x50] sm:$0xff]  ;;  %v6844_v40 = vld [vmem:[%s9656_s5 + $0x68] sm:$0xff] }
  0x19   :  { %8029 = vmatpush3.bf16.msra.mxu1 %v8026_v43  ;;  %v6837_v36 = vld [vmem:[%s9654_s3 + $0x70] sm:$0xff]  ;;  %v6838_v37 = vld [vmem:[%s9654_s3 + $0x78] sm:$0xff]  ;;  %v6851_v42 = vld [vmem:[%s9658_s7 + $0x60] sm:$0xff]  ;;  %v8094_v44 = vpack.c.bf16 %v6844_v40, %v6843_v39 }
  0x1a   :  { %8013 = vmatpush3.bf16.msra.mxu0 %v8010_v12  ;;  %8039 = vmatprep.subr.bf16.mxu1 %v8038_v49  ;;  %v8050_v12 = vpack.c.bf16 %v6798_v9, %v6797_v8  ;;  %v6852_v43 = vld [vmem:[%s9658_s7 + $0x68] sm:$0xff]  ;;  %v6845_v46 = vld [vmem:[%s9656_s5 + $0x70] sm:$0xff]  ;;  %v6778_v58 = vld [vmem:[%s9655_s4] ss:$0 sm:$0xff] }
  0x1b   :  { %8015 = vmatprep.subr.bf16.mxu0 %v8014_v35  ;;  %v8102_v45 = vpack.c.bf16 %v6852_v43, %v6851_v42  ;;  %v6853_v48 = vld [vmem:[%s9658_s7 + $0x70] sm:$0xff]  ;;  %v6784_v61 = vld [vmem:[%s9659_s8] ss:$0 sm:$0xff]  ;;  %v6800_v3 = vld [vmem:[%s9657_s6 + $0x1] ss:$0 sm:$0xff] }
  0x1c   :  { %v8790_v4 = vld [vmem:[%s9659_s8 + $0x1] ss:$0 sm:$0xff]  ;;  %v6840_v39 = vld [vmem:[%s9655_s4 + $0x3] ss:$0 sm:$0xff] }
  0x1d   :  { %7382 = vmatmul.mubr.msk.f32.vlgmr.msra.gmra.mrb[0].mxu0 %vm72_vm0, %v61_v13  ;;  %v8058_v13 = vpack.c.bf16 %v6806_v11, %v6805_v10  ;;  %v6792_v8 = vld [vmem:[%s9655_s4 + $0x1] ss:$0 sm:$0xff] }
  0x1e   :  { %8017 = vmatpush3.bf16.msra.mxu0 %v8014_v35  ;;  %v6830_v35 = vld [vmem:[%s9658_s7 + $0x58] sm:$0xff] }
  0x1f   :  { %8019 = vmatprep.subr.bf16.mxu0 %v8018_v41  ;;  %v8082_v38 = vpack.c.bf16 %v6830_v35, %v6829_v34  ;;  %v6848_v34 = vld [vmem:[%s9657_s6 + $0x3] ss:$0 sm:$0xff] }
  0x20   :  { %v8839_v35 = vld [vmem:[%s9659_s8 + $0x3] ss:$0 sm:$0xff] }
  0x22   :  { %8021 = vmatpush3.bf16.msra.mxu0 %v8018_v41  ;;  %v8090_v41 = vpack.c.bf16 %v6838_v37, %v6837_v36 }
  0x23   :  { %8031 = vmatprep.subr.bf16.mxu0 %v8030_v47 }
  0xf0   :  { %v7383_v15 = vpop.f32.mrb[0].mxu0 }
  0xf1   :  { %v145_v17 = vpop.f32.mrb[1].mxu0  ;;  %v8554_v19 = vadd.f32 %v7383_v15, %v71_v16  ;;  %v6812_v15 = vld [vmem:[%s9654_s3 + $0x48] sm:$0xff]  ;;  %v6819_v16 = vld [vmem:[%s9656_s5 + $0x40] sm:$0xff] }
  0xf2   :  { %v8552_v18 = vadd.f32 %v145_v17, %v70_v14  ;;  %v6811_v14 = vld [vmem:[%s9654_s3 + $0x40] sm:$0xff]  ;;  %v6820_v17 = vld [vmem:[%s9656_s5 + $0x48] sm:$0xff] }
  0xf3   :  { %v158_v21 = vsel %vm154_vm1, %v8554_v19, 0.0 }
  0xf4   :  { %v155_v20 = vsel %vm154_vm1, %v8552_v18, 0.0 }
  0xf5   :  { %156 = vadd.xlane.f32.xlu0 %v155_v20  ;;  %v8062_v20 = vpack.c.bf16 %v6812_v15, %v6811_v14  ;;  %v6824_v14 = vld [vmem:[%s9657_s6 + $0x2] ss:$0 sm:$0xff] }
  0xf9   :  { %159 = vadd.xlane.f32.xlu0 %v158_v21  ;;  %v8070_v21 = vpack.c.bf16 %v6820_v17, %v6819_v16 }
 0x182   :  { %v157_v22 = vpop.xlane.xlu0 %156 }
 0x183   :  { %v162_v23 = vmul.f32 0.03125, %v157_v22  ;;  %v6813_v22 = vld [vmem:[%s9654_s3 + $0x50] sm:$0xff] }
 0x185   :  { %v164_v24 = vsub.f32 %v8552_v18, %v162_v23  ;;  %v6814_v23 = vld [vmem:[%s9654_s3 + $0x58] sm:$0xff] }
 0x186   :  { %v160_v25 = vpop.xlane.xlu0 %159 }
 0x187   :  { %v163_v26 = vmul.f32 0.03125, %v160_v25  ;;  %v166_v27 = vmul.f32 %v164_v24, %v164_v24  ;;  %v6822_v25 = vld [vmem:[%s9656_s5 + $0x58] sm:$0xff] }
 0x189   :  { %v165_v28 = vsub.f32 %v8554_v19, %v163_v26  ;;  %v168_v29 = vsel %vm154_vm1, %v166_v27, 0.0  ;;  %v8066_v26 = vpack.c.bf16 %v6814_v23, %v6813_v22  ;;  %v6827_v27 = vld [vmem:[%s9658_s7 + $0x40] sm:$0xff] }
 0x18a   :  { %169 = vadd.xlane.f32.xlu1 %v168_v29  ;;  %v8816_v23 = vld [vmem:[%s9659_s8 + $0x2] ss:$0 sm:$0xff] }
 0x18b   :  { %v167_v30 = vmul.f32 %v165_v28, %v165_v28 }
 0x18d   :  { %v171_v31 = vsel %vm154_vm1, %v167_v30, 0.0  ;;  %v6835_v30 = vld [vmem:[%s9654_s3 + $0x60] sm:$0xff] }
 0x18e   :  { %172 = vadd.xlane.f32.xlu1 %v171_v31  ;;  %v6836_v31 = vld [vmem:[%s9654_s3 + $0x68] sm:$0xff] }
 0x18f   :  { %v8086_v33 = vpack.c.bf16 %v6836_v31, %v6835_v30 }
 0x217   :  { %v170_v50 = vpop.xlane.xlu1 %169 }
 0x218   :  { %v174_v51 = vmul.f32 0.03125, %v170_v50 }
 0x21a   :  { %v176_v52 = vadd.f32 1e-12, %v174_v51 }
 0x21b   :  { %v173_v53 = vpop.xlane.xlu1 %172 }
 0x21c   :  { %8299 = vrsqrt.f32 %v176_v52  ;;  %v175_v54 = vmul.f32 0.03125, %v173_v53  ;;  %v8415_v52 = vmov 0.0   ;;  %v6781_v53 = vld [vmem:[%s9657_s6] ss:$0 sm:$0xff] }
 0x21e   :  { %v177_v55 = vadd.f32 1e-12, %v175_v54 }
 0x220   :  { %8301 = vrsqrt.f32 %v177_v55 }
 0x226   :  { %v8300_v56 = vpop.eup %8299 }
 0x227   :  { %v8600_v57 = vmul.f32 %v8300_v56, %v164_v24  ;;  %v6821_v24 = vld [vmem:[%s9656_s5 + $0x50] sm:$0xff] }
 0x228   :  { %v8074_v29 = vpack.c.bf16 %v6822_v25, %v6821_v24 }
 0x229   :  { %7392 = vmatprep.mubr.msk.f32.mxu0 %vm154_vm1, %v8600_v57  ;;  %7403 = vmatprep.mubr.msk.f32.mxu1 %vm154_vm1, %v8600_v57 }
 0x22a   :  { %v8302_v62 = vpop.eup %8301 }
 0x22b   :  { %v8618_v63 = vmul.f32 %v8302_v62, %v165_v28  ;;  %v6828_v28 = vld [vmem:[%s9658_s7 + $0x48] sm:$0xff] }
 0x22c   :  { %v8078_v32 = vpack.c.bf16 %v6828_v28, %v6827_v27 }
 0x22d   :  { %7393 = vmatmul.mubr.msk.f32.vlgmr.msra.gmra.mrb[2].mxu0 %vm154_vm1, %v8618_v63  ;;  %7404 = vmatmul.mubr.msk.f32.vlgmr.msra.gmra.mrb[0].mxu1 %vm154_vm1, %v8618_v63 }
 0x22e   :  { %8033 = vmatpush3.bf16.msra.mxu0 %v8030_v47  ;;  %8041 = vmatpush3.bf16.msra.mxu1 %v8038_v49  ;;  %v6846_v47 = vld [vmem:[%s9656_s5 + $0x78] sm:$0xff] }
 0x22f   :  { %7414 = vmatprep.mubr.msk.f32.mxu0 %vm154_vm1, %v8600_v57  ;;  %7425 = vmatprep.mubr.msk.f32.mxu1 %vm154_vm1, %v8600_v57  ;;  %v6854_v49 = vld [vmem:[%s9658_s7 + $0x78] sm:$0xff]  ;;  %v8098_v50 = vpack.c.bf16 %v6846_v47, %v6845_v46 }
 0x230   :  { %8035 = vmatprep.subr.bf16.mxu0 %v8034_v1  ;;  %8043 = vmatprep.subr.bf16.mxu1 %v8042_v2  ;;  %v8106_v51 = vpack.c.bf16 %v6854_v49, %v6853_v48 }
 0x232   :  { %8037 = vmatpush3.bf16.msra.mxu0 %v8034_v1  ;;  %8045 = vmatpush3.bf16.msra.mxu1 %v8042_v2 }
 0x233   :  { %8047 = vmatprep.subr.bf16.mxu0 %v8046_v6  ;;  %8055 = vmatprep.subr.bf16.mxu1 %v8054_v7 }
 0x235   :  { %7415 = vmatmul.mubr.msk.f32.vlgmr.msra.gmra.mrb[4].mxu0 %vm154_vm1, %v8618_v63  ;;  %7426 = vmatmul.mubr.msk.f32.vlgmr.msra.gmra.mrb[2].mxu1 %vm154_vm1, %v8618_v63 }
 0x236   :  { %8049 = vmatpush3.bf16.msra.mxu0 %v8046_v6  ;;  %7436 = vmatprep.mubr.msk.f32.mxu0 %vm154_vm1, %v8600_v57 }
 0x237   :  { %8057 = vmatpush3.bf16.msra.mxu1 %v8054_v7  ;;  %7447 = vmatprep.mubr.msk.f32.mxu1 %vm154_vm1, %v8600_v57 }
 0x238   :  { %8051 = vmatprep.subr.bf16.mxu0 %v8050_v12  ;;  %8059 = vmatprep.subr.bf16.mxu1 %v8058_v13 }
 0x23a   :  { %8053 = vmatpush3.bf16.msra.mxu0 %v8050_v12 }
 0x23b   :  { %8061 = vmatpush3.bf16.msra.mxu1 %v8058_v13  ;;  %8063 = vmatprep.subr.bf16.mxu0 %v8062_v20 }
 0x23c   :  { %8071 = vmatprep.subr.bf16.mxu1 %v8070_v21 }
 0x23d   :  { %7437 = vmatmul.mubr.msk.f32.vlgmr.msra.gmra.mrb[6].mxu0 %vm154_vm1, %v8618_v63 }
 0x23e   :  { %7448 = vmatmul.mubr.msk.f32.vlgmr.msra.gmra.mrb[4].mxu1 %vm154_vm1, %v8618_v63  ;;  %8065 = vmatpush3.bf16.msra.mxu0 %v8062_v20  ;;  %v6816_v20 = vld [vmem:[%s9655_s4 + $0x2] ss:$0 sm:$0xff] }
 0x23f   :  { %7458 = vmatprep.mubr.msk.f32.mxu0 %vm154_vm1, %v8600_v57  ;;  %8073 = vmatpush3.bf16.msra.mxu1 %v8070_v21 }
 0x240   :  { %7469 = vmatprep.mubr.msk.f32.mxu1 %vm154_vm1, %v8600_v57  ;;  %8067 = vmatprep.subr.bf16.mxu0 %v8066_v26 }
 0x241   :  { %8075 = vmatprep.subr.bf16.mxu1 %v8074_v29 }
 0x242   :  { %8069 = vmatpush3.bf16.msra.mxu0 %v8066_v26 }
 0x243   :  { %8077 = vmatpush3.bf16.msra.mxu1 %v8074_v29  ;;  %8079 = vmatprep.subr.bf16.mxu0 %v8078_v32 }
 0x244   :  { %8087 = vmatprep.subr.bf16.mxu1 %v8086_v33 }
 0x245   :  { %7459 = vmatmul.mubr.msk.f32.vlgmr.msra.gmra.mrb[8].mxu0 %vm154_vm1, %v8618_v63 }
 0x246   :  { %7470 = vmatmul.mubr.msk.f32.vlgmr.msra.gmra.mrb[6].mxu1 %vm154_vm1, %v8618_v63  ;;  %8081 = vmatpush3.bf16.msra.mxu0 %v8078_v32 }
 0x247   :  { %7480 = vmatprep.mubr.msk.f32.mxu0 %vm154_vm1, %v8600_v57  ;;  %8089 = vmatpush3.bf16.msra.mxu1 %v8086_v33 }
 0x248   :  { %7491 = vmatprep.mubr.msk.f32.mxu1 %vm154_vm1, %v8600_v57  ;;  %8083 = vmatprep.subr.bf16.mxu0 %v8082_v38 }
 0x249   :  { %8091 = vmatprep.subr.bf16.mxu1 %v8090_v41 }
 0x24a   :  { %8085 = vmatpush3.bf16.msra.mxu0 %v8082_v38 }
 0x24b   :  { %8093 = vmatpush3.bf16.msra.mxu1 %v8090_v41  ;;  %8095 = vmatprep.subr.bf16.mxu0 %v8094_v44 }
 0x24c   :  { %8103 = vmatprep.subr.bf16.mxu1 %v8102_v45 }
 0x24d   :  { %7481 = vmatmul.mubr.msk.f32.vlgmr.msra.gmra.mrb[10].mxu0 %vm154_vm1, %v8618_v63 }
 0x24e   :  { %7492 = vmatmul.mubr.msk.f32.vlgmr.msra.gmra.mrb[8].mxu1 %vm154_vm1, %v8618_v63  ;;  %8097 = vmatpush3.bf16.msra.mxu0 %v8094_v44 }
 0x24f   :  { %7502 = vmatprep.mubr.msk.f32.mxu0 %vm154_vm1, %v8600_v57  ;;  %8105 = vmatpush3.bf16.msra.mxu1 %v8102_v45 }
 0x250   :  { %7513 = vmatprep.mubr.msk.f32.mxu1 %vm154_vm1, %v8600_v57  ;;  %8099 = vmatprep.subr.bf16.mxu0 %v8098_v50 }
 0x251   :  { %8107 = vmatprep.subr.bf16.mxu1 %v8106_v51 }
 0x252   :  { %8101 = vmatpush3.bf16.msra.mxu0 %v8098_v50 }
 0x253   :  { %8109 = vmatpush3.bf16.msra.mxu1 %v8106_v51  ;;  %7516 = vmatprep.subr.mxu0 %v8415_v52 }
 0x254   :  { %7521 = vmatprep.subr.mxu1 %v8415_v52 }
 0x255   :  { %7503 = vmatmul.mubr.msk.f32.vlgmr.msra.gmra.mrb[12].mxu0 %vm154_vm1, %v8618_v63 }
 0x256   :  { %7514 = vmatmul.mubr.msk.f32.vlgmr.msra.gmra.mrb[10].mxu1 %vm154_vm1, %v8618_v63  ;;  %7518 = vmatprep.mubr.msk.f32.mxu0 %vm8416_vm2, %v8415_v52 }
 0x257   :  { %7523 = vmatprep.mubr.msk.f32.mxu1 %vm8416_vm2, %v8415_v52 }
 0x300   :  { %v7394_v54 = vpop.f32.mrb[2].mxu0  ;;  %v7405_v55 = vpop.f32.mrb[0].mxu1 }
 0x301   :  { %v265_v56 = vpop.f32.mrb[3].mxu0  ;;  %v351_v57 = vpop.f32.mrb[1].mxu1  ;;  %v357_v24 = vadd.f32 %v7405_v55, %v6781_v53  ;;  %v271_v29 = vadd.f32 %v7394_v54, %v6778_v58 }
 0x302   :  { %v352_v59 = vadd.f32 %v6781_v53, %v351_v57  ;;  %v266_v60 = vadd.f32 %v6778_v58, %v265_v56 }
 0x304   :  { %7517 = vmatpush3.xpose.msk.msra.mxu0 %vm1238_vm3, %v352_v59 }
 0x305   :  { %7526 = vmatprep.subr.mxu0 %v8415_v52 }
 0x307   :  { %7519 = vmatmul.mubr.msk.f32.vlgmr.msra.gmra.mrb[14].mxu0 %vm1238_vm3, %v266_v60 }
 0x308   :  { %v7416_v62 = vpop.f32.mrb[4].mxu0  ;;  %v8778_v63 = vpop.f32.mrb[2].mxu1  ;;  %7528 = vmatprep.mubr.msk.f32.mxu0 %vm8416_vm2, %v8415_v52 }
 0x309   :  { %v8782_v0 = vadd.f32 %v7416_v62, %v6784_v61  ;;  %v437_v1 = vpop.f32.mrb[5].mxu0  ;;  %v525_v2 = vpop.f32.mrb[3].mxu1  ;;  %v531_v45 = vadd.f32 %v8778_v63, %v6792_v8 }
 0x30a   :  { %v526_v12 = vadd.f32 %v6792_v8, %v525_v2  ;;  %v438_v33 = vadd.f32 %v6784_v61, %v437_v1 }
 0x310   :  { %v7438_v5 = vpop.f32.mrb[6].mxu0 }
 0x311   :  { %v7449_v6 = vpop.f32.mrb[4].mxu1  ;;  %v613_v7 = vpop.f32.mrb[7].mxu0  ;;  %v619_v44 = vadd.f32 %v7438_v5, %v6800_v3 }
 0x312   :  { %v8796_v9 = vadd.f32 %v7449_v6, %v8790_v4  ;;  %v614_v10 = vadd.f32 %v6800_v3, %v613_v7  ;;  %v8798_v11 = vpop.f32.mrb[5].mxu1 }
 0x313   :  { %v702_v48 = vadd.f32 %v8790_v4, %v8798_v11 }
 0x314   :  { %7522 = vmatpush3.xpose.msk.msra.mxu1 %vm1238_vm3, %v614_v10 }
 0x315   :  { %7531 = vmatprep.subr.mxu1 %v8415_v52 }
 0x317   :  { %7524 = vmatmul.mubr.msk.f32.vlgmr.msra.gmra.mrb[12].mxu1 %vm1238_vm3, %v526_v12 }
 0x318   :  { %v7460_v13 = vpop.f32.mrb[8].mxu0  ;;  %7533 = vmatprep.mubr.msk.f32.mxu1 %vm8416_vm2, %v8415_v52 }
 0x319   :  { %v7471_v15 = vpop.f32.mrb[6].mxu1  ;;  %v789_v16 = vpop.f32.mrb[9].mxu0  ;;  %v795_v32 = vadd.f32 %v7460_v13, %v6816_v20 }
 0x31a   :  { %v877_v17 = vpop.f32.mrb[7].mxu1  ;;  %v790_v22 = vadd.f32 %v6816_v20, %v789_v16  ;;  %v883_v31 = vadd.f32 %v7471_v15, %v6824_v14 }
 0x31b   :  { %v878_v21 = vadd.f32 %v6824_v14, %v877_v17 }
 0x31d   :  { %7527 = vmatpush3.xpose.msk.msra.mxu0 %vm1238_vm3, %v878_v21 }
 0x31e   :  { %7536 = vmatprep.subr.mxu0 %v8415_v52 }
 0x320   :  { %7529 = vmatmul.mubr.msk.f32.vlgmr.msra.gmra.mrb[16].mxu0 %vm1238_vm3, %v790_v22  ;;  %v7482_v25 = vpop.f32.mrb[10].mxu0 }
 0x321   :  { %v8820_v26 = vadd.f32 %v7482_v25, %v8816_v23  ;;  %v7493_v27 = vpop.f32.mrb[8].mxu1  ;;  %7537 = vmatpush3.xpose.msk.msra.mxu0 %vm1238_vm3, %v357_v24  ;;  %v8823_v28 = vpop.f32.mrb[11].mxu0  ;;  %7538 = vmatprep.mubr.msk.f32.mxu0 %vm8416_vm2, %v8415_v52 }
 0x322   :  { %v1053_v30 = vpop.f32.mrb[9].mxu1  ;;  %7546 = vmatprep.subr.mxu0 %v8415_v52  ;;  %v1059_v47 = vadd.f32 %v7493_v27, %v6840_v39 }
 0x323   :  { %v1054_v43 = vadd.f32 %v6840_v39, %v1053_v30 }
 0x324   :  { %7539 = vmatmul.mubr.msk.f32.vlgmr.msra.gmra.mrb[18].mxu0 %vm1238_vm3, %v271_v29 }
 0x325   :  { %7547 = vmatpush3.xpose.msk.msra.mxu0 %vm1238_vm3, %v883_v31  ;;  %7548 = vmatprep.mubr.msk.f32.mxu0 %vm8416_vm2, %v8415_v52 }
 0x326   :  { %7556 = vmatprep.subr.mxu0 %v8415_v52 }
 0x328   :  { %7549 = vmatmul.mubr.msk.f32.vlgmr.msra.gmra.mrb[20].mxu0 %vm1238_vm3, %v795_v32  ;;  %v7504_v36 = vpop.f32.mrb[12].mxu0 }
 0x329   :  { %v7515_v37 = vpop.f32.mrb[10].mxu1  ;;  %7557 = vmatpush3.msra.mxu0 %v438_v33  ;;  %v1141_v38 = vpop.f32.mrb[13].mxu0  ;;  %7558 = vmatprep.mubr.msk.f32.mxu0 %vm8416_vm2, %v8415_v52  ;;  %v1147_v46 = vadd.f32 %v7504_v36, %v6848_v34 }
 0x32a   :  { %v8848_v40 = vadd.f32 %v7515_v37, %v8839_v35  ;;  %v1142_v41 = vadd.f32 %v6848_v34, %v1141_v38  ;;  %v8850_v42 = vpop.f32.mrb[11].mxu1  ;;  %7566 = vmatprep.subr.mxu0 %v8415_v52 }
 0x32c   :  { %7532 = vmatpush3.xpose.msk.msra.mxu1 %vm1238_vm3, %v1142_v41 }
 0x32d   :  { %7541 = vmatprep.subr.mxu1 %v8415_v52 }
 0x32f   :  { %7534 = vmatmul.mubr.msk.f32.vlgmr.msra.gmra.mrb[14].mxu1 %vm1238_vm3, %v1054_v43 }
 0x330   :  { %7542 = vmatpush3.xpose.msk.msra.mxu1 %vm1238_vm3, %v619_v44  ;;  %7543 = vmatprep.mubr.msk.f32.mxu1 %vm8416_vm2, %v8415_v52 }
 0x331   :  { %7551 = vmatprep.subr.mxu1 %v8415_v52 }
 0x333   :  { %7544 = vmatmul.mubr.msk.f32.vlgmr.msra.gmra.mrb[16].mxu1 %vm1238_vm3, %v531_v45  ;;  %v8903_v45 = vld [vmem:[%s9660_s9 + $0x8] sm:$0xff] }
 0x334   :  { %7552 = vmatpush3.xpose.msk.msra.mxu1 %vm1238_vm3, %v1147_v46  ;;  %7553 = vmatprep.mubr.msk.f32.mxu1 %vm8416_vm2, %v8415_v52  ;;  %v8910_v46 = vld [vmem:[%s9660_s9] sm:$0xff] }
 0x335   :  { %7561 = vmatprep.subr.mxu1 %v8415_v52 }
 0x337   :  { %7554 = vmatmul.mubr.msk.f32.vlgmr.msra.gmra.mrb[18].mxu1 %vm1238_vm3, %v1059_v47 }
 0x338   :  { %7562 = vmatpush3.msra.mxu1 %v702_v48  ;;  %7563 = vmatprep.mubr.msk.f32.mxu1 %vm8416_vm2, %v8415_v52 }
 0x339   :  { %7571 = vmatprep.subr.mxu1 %v8415_v52 }
 0x3da   :  { %v1311_v49 = vpop.f32.mrb[14].mxu0 }
 0x3db   :  { %v7520_v50 = vpop.f32.mrb[15].mxu0  ;;  %v1847_v55 = vsel %vm1238_vm3, %v1311_v49, -inf }
 0x3ea   :  { %v1387_v51 = vpop.f32.mrb[12].mxu1 }
 0x3eb   :  { %v7525_v53 = vpop.f32.mrb[13].mxu1  ;;  %v1850_v54 = vsel %vm1238_vm3, %v1387_v51, -inf }
 0x3ec   :  { %1851 = vmax.xlane.f32.xlu0 %v1850_v54 }
 0x3f0   :  { %1848 = vmax.xlane.f32.xlu0 %v1847_v55 }
 0x3f3   :  { %v1463_v56 = vpop.f32.mrb[16].mxu0 }
 0x3f4   :  { %v7530_v57 = vpop.f32.mrb[17].mxu0  ;;  %v1853_v15 = vsel %vm1238_vm3, %v1463_v56, -inf }
 0x3f7   :  { %v8874_v58 = vpop.f32.mrb[18].mxu0 }
 0x3f8   :  { %v7540_v59 = vpop.f32.mrb[19].mxu0  ;;  %v1859_v43 = vsel %vm1238_vm3, %v8874_v58, -inf }
 0x3fb   :  { %v8876_v60 = vpop.f32.mrb[20].mxu0 }
 0x3fc   :  { %v7550_v61 = vpop.f32.mrb[21].mxu0 }
 0x402   :  { %v1539_v62 = vpop.f32.mrb[14].mxu1 }
 0x403   :  { %v7535_v63 = vpop.f32.mrb[15].mxu1  ;;  %v1856_v1 = vsel %vm1238_vm3, %v1539_v62, -inf }
 0x404   :  { %1857 = vmax.xlane.f32.xlu0 %v1856_v1 }
 0x406   :  { %v1691_v2 = vpop.f32.mrb[16].mxu1 }
 0x407   :  { %v7545_v3 = vpop.f32.mrb[17].mxu1  ;;  %v1862_v41 = vsel %vm1238_vm3, %v1691_v2, -inf }
 0x40a   :  { %v8879_v4 = vpop.f32.mrb[18].mxu1 }
 0x40b   :  { %v7555_v5 = vpop.f32.mrb[19].mxu1  ;;  %v1868_v44 = vsel %vm1238_vm3, %v8879_v4, -inf }
 0x40c   :  { %v966_v5 = vadd.f32 %v8816_v23, %v8823_v28 }
 0x479   :  { %v1852_v6 = vpop.xlane.xlu0 %1851 }
 0x47a   :  { %v1872_v7 = vsub.f32 %v1387_v51, %v1852_v6 }
 0x47c   :  { %v1881_v8 = vmul.f32 1.442695, %v1872_v7 }
 0x47d   :  { %v1849_v10 = vpop.xlane.xlu0 %1848 }
 0x47e   :  { %8303 = vpow2.f32 %v1881_v8  ;;  %v1871_v11 = vsub.f32 %v1311_v49, %v1849_v10 }
 0x480   :  { %v1879_v12 = vmul.f32 1.442695, %v1871_v11  ;;  %v1230_v11 = vadd.f32 %v8839_v35, %v8850_v42  ;;  %v1937_v35 = vld [vmem:[%s9660_s9 + $0x10] sm:$0xff] }
 0x482   :  { %8305 = vpow2.f32 %v1879_v12 }
 0x488   :  { %v8304_v13 = vpop.eup %8303 }
 0x489   :  { %v1898_v14 = vsel %vm1238_vm3, %v8304_v13, 0.0 }
 0x48a   :  { %1899 = vadd.xlane.f32.xlu1 %v1898_v14 }
 0x48c   :  { %v8306_v16 = vpop.eup %8305 }
 0x48d   :  { %v1895_v20 = vsel %vm1238_vm3, %v8306_v16, 0.0 }
 0x48e   :  { %1854 = vmax.xlane.f32.xlu1 %v1853_v15 }
 0x491   :  { %v1858_v17 = vpop.xlane.xlu0 %1857 }
 0x492   :  { %v1874_v21 = vsub.f32 %v1539_v62, %v1858_v17  ;;  %1896 = vadd.xlane.f32.xlu1 %v1895_v20  ;;  %v1865_v62 = vsel %vm1238_vm3, %v8876_v60, -inf }
 0x494   :  { %v1885_v22 = vmul.f32 1.442695, %v1874_v21 }
 0x496   :  { %8307 = vpow2.f32 %v1885_v22 }
 0x4a0   :  { %v8884_v24 = vpop.eup %8307 }
 0x4a1   :  { %v1904_v25 = vsel %vm1238_vm3, %v8884_v24, 0.0 }
 0x4a2   :  { %1905 = vadd.xlane.f32.xlu1 %v1904_v25 }
 0x517   :  { %v1900_v27 = vpop.xlane.xlu1 %1899 }
 0x518   :  { %8309 = vrcp.f32 %v1900_v27 }
 0x51b   :  { %v1855_v29 = vpop.xlane.xlu1 %1854 }
 0x51c   :  { %v1873_v30 = vsub.f32 %v1463_v56, %v1855_v29 }
 0x51e   :  { %v1883_v31 = vmul.f32 1.442695, %v1873_v30 }
 0x51f   :  { %v1897_v32 = vpop.xlane.xlu1 %1896 }
 0x520   :  { %8311 = vpow2.f32 %v1883_v31 }
 0x521   :  { %8313 = vrcp.f32 %v1897_v32 }
 0x522   :  { %v8310_v33 = vpop.eup %8309 }
 0x523   :  { %v1922_v34 = vmul.f32 %v8310_v33, %v8304_v13 }
 0x525   :  { %7564 = vmatmul.mubr.msk.f32.vlgmr.msra.gmra.mrb[20].mxu1 %vm1238_vm3, %v1922_v34 }
 0x526   :  { %7573 = vmatprep.mubr.msk.f32.mxu1 %vm8416_vm2, %v8415_v52  ;;  %7572 = vmatpush3.msra.mxu1 %v8910_v46 }
 0x527   :  { %7581 = vmatprep.subr.mxu1 %v8415_v52 }
 0x52a   :  { %v8312_v36 = vpop.eup %8311 }
 0x52b   :  { %v8314_v37 = vpop.eup %8313  ;;  %v1901_v38 = vsel %vm1238_vm3, %v8312_v36, 0.0 }
 0x52c   :  { %v1920_v39 = vmul.f32 %v8314_v37, %v8306_v16  ;;  %1902 = vadd.xlane.f32.xlu0 %v1901_v38 }
 0x52e   :  { %7559 = vmatmul.mubr.msk.f32.vlgmr.msra.gmra.mrb[22].mxu0 %vm1238_vm3, %v1920_v39 }
 0x52f   :  { %7568 = vmatprep.mubr.msk.f32.mxu0 %vm8416_vm2, %v8415_v52  ;;  %7567 = vmatpush3.msra.mxu0 %v8903_v45  ;;  %v1906_v3 = vpop.xlane.xlu1 %1905 }
 0x530   :  { %1863 = vmax.xlane.f32.xlu0 %v1862_v41  ;;  %7576 = vmatprep.subr.mxu0 %v8415_v52 }
 0x534   :  { %1860 = vmax.xlane.f32.xlu0 %v1859_v43 }
 0x538   :  { %1869 = vmax.xlane.f32.xlu0 %v1868_v44 }
 0x5b9   :  { %v1903_v47 = vpop.xlane.xlu0 %1902 }
 0x5bd   :  { %v1864_v48 = vpop.xlane.xlu0 %1863 }
 0x5be   :  { %v1876_v49 = vsub.f32 %v1691_v2, %v1864_v48  ;;  %v6891_v48 = vld [vmem:[%s9661_s10] ss:$0 sm:$0xff] }
 0x5c0   :  { %v1889_v50 = vmul.f32 1.442695, %v1876_v49 }
 0x5c1   :  { %v1861_v51 = vpop.xlane.xlu0 %1860 }
 0x5c2   :  { %8315 = vpow2.f32 %v1889_v50  ;;  %v1875_v53 = vsub.f32 %v8874_v58, %v1861_v51 }
 0x5c4   :  { %v1887_v54 = vmul.f32 1.442695, %v1875_v53 }
 0x5c5   :  { %v1870_v55 = vpop.xlane.xlu0 %1869 }
 0x5c6   :  { %v1878_v56 = vsub.f32 %v8879_v4, %v1870_v55  ;;  %8317 = vpow2.f32 %v1887_v54 }
 0x5c8   :  { %v1893_v57 = vmul.f32 1.442695, %v1878_v56 }
 0x5ca   :  { %8319 = vpow2.f32 %v1893_v57 }
 0x5cb   :  { %8321 = vrcp.f32 %v1903_v47 }
 0x5cc   :  { %v8916_v59 = vpop.eup %8315  ;;  %8323 = vrcp.f32 %v1906_v3 }
 0x5cd   :  { %v1910_v61 = vsel %vm1238_vm3, %v8916_v59, 0.0 }
 0x5ce   :  { %1911 = vadd.xlane.f32.xlu1 %v1910_v61 }
 0x5d0   :  { %v8318_v63 = vpop.eup %8317 }
 0x5d1   :  { %v1907_v58 = vsel %vm1238_vm3, %v8318_v63, 0.0 }
 0x5d2   :  { %1866 = vmax.xlane.f32.xlu1 %v1865_v62 }
 0x5d4   :  { %v8923_v1 = vpop.eup %8319 }
 0x5d5   :  { %v1916_v2 = vsel %vm1238_vm3, %v8923_v1, 0.0  ;;  %v8322_v4 = vpop.eup %8321 }
 0x5d6   :  { %1908 = vadd.xlane.f32.xlu1 %v1907_v58  ;;  %v1924_v8 = vmul.f32 %v8322_v4, %v8312_v36  ;;  %v8324_v10 = vpop.eup %8323 }
 0x5d7   :  { %v1926_v23 = vmul.f32 %v8324_v10, %v8884_v24  ;;  %v8962_v24 = vld [vmem:[%s9660_s9 + $0x18] sm:$0xff] }
 0x5da   :  { %1917 = vadd.xlane.f32.xlu1 %v1916_v2 }
 0x5f8   :  { %v2081_v6 = vpop.f32.mrb[20].mxu1 }
 0x5f9   :  { %v7565_v7 = vpop.f32.mrb[21].mxu1  ;;  %7569 = vmatmul.mubr.msk.f32.vlgmr.msra.gmra.mrb[24].mxu0 %vm1238_vm3, %v2081_v6 }
 0x5fa   :  { %7577 = vmatpush3.msra.mxu0 %v966_v5  ;;  %7578 = vmatprep.mubr.msk.f32.mxu0 %vm8416_vm2, %v8415_v52 }
 0x5fb   :  { %7586 = vmatprep.subr.mxu0 %v8415_v52 }
 0x5fd   :  { %7579 = vmatmul.mubr.msk.f32.vlgmr.msra.gmra.mrb[26].mxu0 %vm1238_vm3, %v1924_v8 }
 0x5fe   :  { %7587 = vmatpush3.msra.mxu0 %v1230_v11  ;;  %7588 = vmatprep.mubr.msk.f32.mxu0 %vm8416_vm2, %v8415_v52 }
 0x5ff   :  { %7596 = vmatprep.subr.mxu0 %v8415_v52 }
 0x601   :  { %v2008_v28 = vpop.f32.mrb[22].mxu0  ;;  %7589 = vmatmul.mubr.msk.f32.vlgmr.msra.gmra.mrb[28].mxu0 %vm1238_vm3, %v1926_v23 }
 0x602   :  { %v7560_v12 = vpop.f32.mrb[23].mxu0  ;;  %7574 = vmatmul.mubr.msk.f32.vlgmr.msra.gmra.mrb[22].mxu1 %vm1238_vm3, %v2008_v28  ;;  %7597 = vmatpush3.msra.mxu0 %v8782_v0 }
 0x603   :  { %7598 = vmatprep.mubr.msk.f32.mxu0 %vm8416_vm2, %v8415_v52  ;;  %7583 = vmatprep.mubr.msk.f32.mxu1 %vm8416_vm2, %v8415_v52 }
 0x604   :  { %7606 = vmatprep.subr.mxu0 %v8415_v52  ;;  %7582 = vmatpush3.msra.mxu1 %v1937_v35 }
 0x605   :  { %7591 = vmatprep.subr.mxu1 %v8415_v52 }
 0x65b   :  { %v1912_v42 = vpop.xlane.xlu1 %1911 }
 0x65f   :  { %v1867_v13 = vpop.xlane.xlu1 %1866 }
 0x660   :  { %v1877_v14 = vsub.f32 %v8876_v60, %v1867_v13 }
 0x662   :  { %v1891_v0 = vmul.f32 1.442695, %v1877_v14 }
 0x663   :  { %v1909_v15 = vpop.xlane.xlu1 %1908 }
 0x664   :  { %8325 = vpow2.f32 %v1891_v0 }
 0x665   :  { %8327 = vrcp.f32 %v1909_v15 }
 0x666   :  { %8329 = vrcp.f32 %v1912_v42 }
 0x667   :  { %v1918_v39 = vpop.xlane.xlu1 %1917 }
 0x66e   :  { %v8326_v16 = vpop.eup %8325 }
 0x66f   :  { %v8328_v17 = vpop.eup %8327  ;;  %v1913_v20 = vsel %vm1238_vm3, %v8326_v16, 0.0 }
 0x670   :  { %v1928_v21 = vmul.f32 %v8328_v17, %v8318_v63  ;;  %1914 = vadd.xlane.f32.xlu0 %v1913_v20  ;;  %v8330_v29 = vpop.eup %8329 }
 0x671   :  { %v1930_v36 = vmul.f32 %v8330_v29, %v8916_v59 }
 0x672   :  { %7599 = vmatmul.mubr.msk.f32.vlgmr.msra.gmra.mrb[30].mxu0 %vm1238_vm3, %v1928_v21 }
 0x673   :  { %7607 = vmatpush3.msra.mxu0 %v8903_v45  ;;  %7608 = vmatprep.mubr.msk.f32.mxu0 %vm8416_vm2, %v8415_v52 }
 0x674   :  { %7616 = vmatprep.subr.mxu0 %v8415_v52 }
 0x6cc   :  { %v2154_v60 = vpop.f32.mrb[24].mxu0 }
 0x6cd   :  { %v7570_v22 = vpop.f32.mrb[25].mxu0 }
 0x6d0   :  { %v2300_v25 = vpop.f32.mrb[26].mxu0 }
 0x6d1   :  { %v7580_v27 = vpop.f32.mrb[27].mxu0  ;;  %7584 = vmatmul.mubr.msk.f32.vlgmr.msra.gmra.mrb[24].mxu1 %vm1238_vm3, %v2300_v25  ;;  %v3148_v25 = vld [vmem:[%s9662_s11] sm:$0xff] }
 0x6d2   :  { %7592 = vmatpush3.msra.mxu1 %v8962_v24  ;;  %7593 = vmatprep.mubr.msk.f32.mxu1 %vm8416_vm2, %v8415_v52  ;;  %v3150_v27 = vld [vmem:[%s9662_s11 + $0x10] sm:$0xff] }
 0x6d3   :  { %7601 = vmatprep.subr.mxu1 %v8415_v52 }
 0x6d4   :  { %v2447_v30 = vpop.f32.mrb[28].mxu0 }
 0x6d5   :  { %v2227_v31 = vpop.f32.mrb[22].mxu1  ;;  %v7590_v32 = vpop.f32.mrb[29].mxu0  ;;  %7594 = vmatmul.mubr.msk.f32.vlgmr.msra.gmra.mrb[26].mxu1 %vm1238_vm3, %v2447_v30  ;;  %v3151_v30 = vld [vmem:[%s9662_s11 + $0x18] sm:$0xff] }
 0x6d6   :  { %v2228_v33 = vadd.f32 %v2227_v31, %v2154_v60  ;;  %v7575_v34 = vpop.f32.mrb[23].mxu1  ;;  %7602 = vmatpush3.msra.mxu1 %v8796_v9  ;;  %7603 = vmatprep.mubr.msk.f32.mxu1 %vm8416_vm2, %v8415_v52  ;;  %v8114_v31 = vpack.c.bf16 %v3151_v30, %v3150_v27  ;;  %v3258_v32 = vld [vmem:[%s9664_s13] sm:$0xff] }
 0x6d7   :  { %7611 = vmatprep.subr.mxu1 %v8415_v52 }
 0x6d9   :  { %7604 = vmatmul.mubr.msk.f32.vlgmr.msra.gmra.mrb[28].mxu1 %vm1238_vm3, %v1930_v36 }
 0x6da   :  { %7612 = vmatpush3.msra.mxu1 %v8910_v46  ;;  %7613 = vmatprep.mubr.msk.f32.mxu1 %vm8416_vm2, %v8415_v52 }
 0x6db   :  { %7621 = vmatprep.subr.mxu1 %v8415_v52 }
 0x6fd   :  { %v1915_v9 = vpop.xlane.xlu0 %1914 }
 0x6fe   :  { %8331 = vrcp.f32 %v1915_v9 }
 0x6ff   :  { %8333 = vrcp.f32 %v1918_v39 }
 0x708   :  { %v8332_v50 = vpop.eup %8331 }
 0x709   :  { %v1932_v55 = vmul.f32 %v8332_v50, %v8326_v16  ;;  %v8334_v57 = vpop.eup %8333  ;;  %v3266_v50 = vld [vmem:[%s9664_s13 + $0x40] sm:$0xff] }
 0x745   :  { %v2594_v37 = vpop.f32.mrb[30].mxu0 }
 0x746   :  { %v7600_v38 = vpop.f32.mrb[31].mxu0  ;;  %7614 = vmatmul.mubr.msk.f32.vlgmr.msra.gmra.mrb[30].mxu1 %vm1238_vm3, %v2594_v37 }
 0x747   :  { %7622 = vmatpush3.msra.mxu1 %v1937_v35  ;;  %7623 = vmatprep.mubr.msk.f32.mxu1 %vm8416_vm2, %v8415_v52 }
 0x748   :  { %7631 = vmatprep.subr.mxu1 %v8415_v52 }
 0x7a4   :  { %v2373_v41 = vpop.f32.mrb[24].mxu1 }
 0x7a5   :  { %v2377_v43 = vadd.f32 %v2373_v41, %v2228_v33  ;;  %v7585_v44 = vpop.f32.mrb[25].mxu1  ;;  %v3259_v33 = vld [vmem:[%s9664_s13 + $0x8] sm:$0xff]  ;;  %v3260_v41 = vld [vmem:[%s9664_s13 + $0x10] sm:$0xff] }
 0x7a6   :  { %v8118_v34 = vpack.c.bf16 %v3259_v33, %v3258_v32 }
 0x7a8   :  { %v2520_v45 = vpop.f32.mrb[26].mxu1 }
 0x7a9   :  { %v2524_v46 = vadd.f32 %v2520_v45, %v2377_v43  ;;  %v7595_v47 = vpop.f32.mrb[27].mxu1  ;;  %v3261_v43 = vld [vmem:[%s9664_s13 + $0x18] sm:$0xff]  ;;  %v3262_v45 = vld [vmem:[%s9664_s13 + $0x20] sm:$0xff] }
 0x7aa   :  { %v8122_v44 = vpack.c.bf16 %v3261_v43, %v3260_v41  ;;  %v6896_v41 = vld [vmem:[%s9654_s3 + $0x80] sm:$0xff]  ;;  %v6897_v43 = vld [vmem:[%s9654_s3 + $0x88] sm:$0xff] }
 0x7ab   :  { %v3111_v49 = vadd.f32 %v2524_v46, %v8552_v18  ;;  %v1934_v18 = vmul.f32 %v8334_v57, %v8923_v1  ;;  %v3263_v46 = vld [vmem:[%s9664_s13 + $0x28] sm:$0xff]  ;;  %v3269_v57 = vld [vmem:[%s9664_s13 + $0x58] sm:$0xff] }
 0x7ac   :  { %v2667_v51 = vpop.f32.mrb[28].mxu1  ;;  %v8126_v47 = vpack.c.bf16 %v3263_v46, %v3262_v45  ;;  %v8150_v45 = vpack.c.bf16 %v6897_v43, %v6896_v41  ;;  %v6929_v46 = vld [vmem:[%s9656_s5 + $0xa8] sm:$0xff]  ;;  %v6938_v41 = vld [vmem:[%s9658_s7 + $0xb0] sm:$0xff]  ;;  %v6939_v43 = vld [vmem:[%s9658_s7 + $0xb8] sm:$0xff] }
 0x7ad   :  { %v8988_v53 = vadd.f32 %v6891_v48, %v3111_v49  ;;  %v7605_v54 = vpop.f32.mrb[29].mxu1  ;;  %7609 = vmatmul.mubr.msk.f32.vlgmr.msra.gmra.mrb[32].mxu0 %vm1238_vm3, %v2667_v51  ;;  %v3265_v49 = vld [vmem:[%s9664_s13 + $0x38] sm:$0xff] }
 0x7ae   :  { %7617 = vmatpush3.msra.mxu0 %v8820_v26  ;;  %7618 = vmatprep.mubr.msk.f32.mxu0 %vm8416_vm2, %v8415_v52  ;;  %v3267_v54 = vld [vmem:[%s9664_s13 + $0x48] sm:$0xff] }
 0x7af   :  { %v3122_v56 = vsel %vm154_vm1, %v8988_v53, 0.0  ;;  %7626 = vmatprep.subr.mxu0 %v8415_v52 }
 0x7b0   :  { %3123 = vadd.xlane.f32.xlu0 %v3122_v56  ;;  %v3268_v56 = vld [vmem:[%s9664_s13 + $0x50] sm:$0xff] }
 0x7b1   :  { %7619 = vmatmul.mubr.msk.f32.vlgmr.msra.gmra.mrb[34].mxu0 %vm1238_vm3, %v1932_v55  ;;  %v8134_v55 = vpack.c.bf16 %v3267_v54, %v3266_v50  ;;  %v6930_v50 = vld [vmem:[%s9656_s5 + $0xb0] sm:$0xff]  ;;  %v6931_v54 = vld [vmem:[%s9656_s5 + $0xb8] sm:$0xff] }
 0x7b2   :  { %7627 = vmatpush3.msra.mxu0 %v8848_v40  ;;  %7628 = vmatprep.mubr.msk.f32.mxu0 %vm8416_vm2, %v8415_v52 }
 0x7b5   :  { %7629 = vmatmul.mubr.msk.f32.vlgmr.msra.gmra.mrb[36].mxu0 %vm1238_vm3, %v1934_v18  ;;  %v8138_v18 = vpack.c.bf16 %v3269_v57, %v3268_v56  ;;  %v6904_v56 = vld [vmem:[%s9656_s5 + $0x80] sm:$0xff]  ;;  %v6905_v57 = vld [vmem:[%s9656_s5 + $0x88] sm:$0xff] }
 0x819   :  { %v2813_v26 = vpop.f32.mrb[30].mxu1 }
 0x81a   :  { %v7615_v59 = vpop.f32.mrb[31].mxu1 }
 0x81b   :  { %v3271_v59 = vld [vmem:[%s9664_s13 + $0x68] sm:$0xff] }
 0x83d   :  { %v3124_v61 = vpop.xlane.xlu0 %3123 }
 0x83e   :  { %v3128_v62 = vmul.f32 0.03125, %v3124_v61 }
 0x840   :  { %v3130_v63 = vsub.f32 %v8988_v53, %v3128_v62  ;;  %v3272_v62 = vld [vmem:[%s9664_s13 + $0x70] sm:$0xff] }
 0x842   :  { %v3132_v58 = vmul.f32 %v3130_v63, %v3130_v63 }
 0x844   :  { %v3134_v2 = vsel %vm154_vm1, %v3132_v58, 0.0 }
 0x845   :  { %3135 = vadd.xlane.f32.xlu0 %v3134_v2  ;;  %v6892_v2 = vld [vmem:[%s9663_s12] ss:$0 sm:$0xff] }
 0x880   :  { %v2740_v3 = vpop.f32.mrb[32].mxu0 }
 0x881   :  { %v2814_v4 = vadd.f32 %v2813_v26, %v2740_v3  ;;  %v7610_v40 = vpop.f32.mrb[33].mxu0  ;;  %v3270_v26 = vld [vmem:[%s9664_s13 + $0x60] sm:$0xff] }
 0x882   :  { %v8142_v61 = vpack.c.bf16 %v3271_v59, %v3270_v26  ;;  %v8158_v26 = vpack.c.bf16 %v6905_v57, %v6904_v56  ;;  %v6945_v59 = vld [vmem:[%s9654_s3 + $0xc8] sm:$0xff]  ;;  %v6970_v56 = vld [vmem:[%s9654_s3 + $0xf0] sm:$0xff]  ;;  %v6971_v57 = vld [vmem:[%s9654_s3 + $0xf8] sm:$0xff] }
 0x884   :  { %v2886_v5 = vpop.f32.mrb[34].mxu0 }
 0x885   :  { %v7620_v6 = vpop.f32.mrb[35].mxu0  ;;  %7624 = vmatmul.mubr.msk.f32.vlgmr.msra.gmra.mrb[32].mxu1 %vm1238_vm3, %v2886_v5 }
 0x886   :  { %7632 = vmatpush3.msra.mxu1 %v8962_v24  ;;  %7633 = vmatprep.mubr.msk.f32.mxu1 %vm8416_vm2, %v8415_v52 }
 0x887   :  { %8119 = vmatprep.subr.bf16.mxu1 %v8118_v34 }
 0x888   :  { %v3033_v1 = vpop.f32.mrb[36].mxu0 }
 0x889   :  { %v7630_v7 = vpop.f32.mrb[37].mxu0  ;;  %7634 = vmatmul.mubr.msk.f32.vlgmr.msra.gmra.mrb[34].mxu1 %vm1238_vm3, %v3033_v1 }
 0x88a   :  { %8121 = vmatpush3.bf16.msra.mxu1 %v8118_v34 }
 0x88b   :  { %8123 = vmatprep.subr.bf16.mxu1 %v8122_v44 }
 0x88e   :  { %8125 = vmatpush3.bf16.msra.mxu1 %v8122_v44  ;;  %v6928_v44 = vld [vmem:[%s9656_s5 + $0xa0] sm:$0xff] }
 0x88f   :  { %8127 = vmatprep.subr.bf16.mxu1 %v8126_v47 }
 0x892   :  { %8129 = vmatpush3.bf16.msra.mxu1 %v8126_v47  ;;  %v8182_v47 = vpack.c.bf16 %v6929_v46, %v6928_v44  ;;  %v8194_v44 = vpack.c.bf16 %v6939_v43, %v6938_v41  ;;  %v6953_v46 = vld [vmem:[%s9656_s5 + $0xc8] sm:$0xff]  ;;  %v6973_v43 = vld [vmem:[%s9655_s4 + $0x7] ss:$0 sm:$0xff] }
 0x8d2   :  { %v3136_v8 = vpop.xlane.xlu0 %3135 }
 0x8d3   :  { %v3140_v10 = vmul.f32 0.03125, %v3136_v8 }
 0x8d5   :  { %v3142_v11 = vadd.f32 1e-12, %v3140_v10 }
 0x8d7   :  { %8335 = vrsqrt.f32 %v3142_v11 }
 0x8e1   :  { %v8336_v23 = vpop.eup %8335 }
 0x8e2   :  { %v3146_v28 = vmul.f32 %v8336_v23, %v3130_v63  ;;  %v3273_v63 = vld [vmem:[%s9664_s13 + $0x78] sm:$0xff] }
 0x8e3   :  { %v8146_v58 = vpack.c.bf16 %v3273_v63, %v3272_v62 }
 0x8e4   :  { %7644 = vmatprep.mubr.msk.f32.mxu0 %vm154_vm1, %v3146_v28 }
 0x958   :  { %v2959_v12 = vpop.f32.mrb[32].mxu1 }
 0x959   :  { %v2963_v35 = vadd.f32 %v2959_v12, %v2814_v4  ;;  %v7625_v42 = vpop.f32.mrb[33].mxu1 }
 0x95c   :  { %v3106_v13 = vpop.f32.mrb[34].mxu1 }
 0x95d   :  { %v3110_v14 = vadd.f32 %v3106_v13, %v2963_v35  ;;  %v7635_v0 = vpop.f32.mrb[35].mxu1 }
 0x95f   :  { %v3112_v15 = vadd.f32 %v3110_v14, %v8554_v19  ;;  %v3149_v19 = vld [vmem:[%s9662_s11 + $0x8] sm:$0xff] }
 0x960   :  { %v8110_v29 = vpack.c.bf16 %v3149_v19, %v3148_v25 }
 0x961   :  { %v9012_v16 = vadd.f32 %v6891_v48, %v3112_v15  ;;  %v3264_v48 = vld [vmem:[%s9664_s13 + $0x30] sm:$0xff] }
 0x962   :  { %8111 = vmatprep.subr.bf16.mxu0 %v8110_v29  ;;  %v8130_v51 = vpack.c.bf16 %v3265_v49, %v3264_v48  ;;  %v6898_v48 = vld [vmem:[%s9654_s3 + $0x90] sm:$0xff]  ;;  %v6899_v49 = vld [vmem:[%s9654_s3 + $0x98] sm:$0xff] }
 0x963   :  { %v3125_v17 = vsel %vm154_vm1, %v9012_v16, 0.0  ;;  %8113 = vmatpush3.bf16.msra.mxu0 %v8110_v29 }
 0x964   :  { %3126 = vadd.xlane.f32.xlu1 %v3125_v17  ;;  %8115 = vmatprep.subr.bf16.mxu0 %v8114_v31 }
 0x965   :  { %8131 = vmatprep.subr.bf16.mxu1 %v8130_v51 }
 0x966   :  { %8133 = vmatpush3.bf16.msra.mxu1 %v8130_v51  ;;  %v8154_v51 = vpack.c.bf16 %v6899_v49, %v6898_v48  ;;  %v6954_v48 = vld [vmem:[%s9656_s5 + $0xd0] sm:$0xff]  ;;  %v6955_v49 = vld [vmem:[%s9656_s5 + $0xd8] sm:$0xff] }
 0x967   :  { %8117 = vmatpush3.bf16.msra.mxu0 %v8114_v31  ;;  %8135 = vmatprep.subr.bf16.mxu1 %v8134_v55 }
 0x968   :  { %8151 = vmatprep.subr.bf16.mxu0 %v8150_v45 }
 0x96a   :  { %8137 = vmatpush3.bf16.msra.mxu1 %v8134_v55  ;;  %v8186_v55 = vpack.c.bf16 %v6931_v54, %v6930_v50  ;;  %v8210_v50 = vpack.c.bf16 %v6955_v49, %v6954_v48  ;;  %v6969_v54 = vld [vmem:[%s9654_s3 + $0xe8] sm:$0xff] }
 0x96b   :  { %8139 = vmatprep.subr.bf16.mxu1 %v8138_v18 }
 0x96e   :  { %8141 = vmatpush3.bf16.msra.mxu1 %v8138_v18  ;;  %v6944_v18 = vld [vmem:[%s9654_s3 + $0xc0] sm:$0xff] }
 0x96f   :  { %8143 = vmatprep.subr.bf16.mxu1 %v8142_v61 }
 0x972   :  { %8145 = vmatpush3.bf16.msra.mxu1 %v8142_v61  ;;  %v8198_v61 = vpack.c.bf16 %v6945_v59, %v6944_v18  ;;  %v8226_v18 = vpack.c.bf16 %v6971_v57, %v6970_v56  ;;  %v6985_v59 = vld [vmem:[%s9658_s7 + $0xe8] sm:$0xff] }
 0x973   :  { %8147 = vmatprep.subr.bf16.mxu1 %v8146_v58 }
 0x976   :  { %8149 = vmatpush3.bf16.msra.mxu1 %v8146_v58 }
 0x977   :  { %8183 = vmatprep.subr.bf16.mxu1 %v8182_v47 }
 0x9f1   :  { %v3127_v20 = vpop.xlane.xlu1 %3126 }
 0x9f2   :  { %v3129_v21 = vmul.f32 0.03125, %v3127_v20 }
 0x9f4   :  { %v3131_v60 = vsub.f32 %v9012_v16, %v3129_v21 }
 0x9f6   :  { %v3133_v22 = vmul.f32 %v3131_v60, %v3131_v60 }
 0x9f8   :  { %v3137_v24 = vsel %vm154_vm1, %v3133_v22, 0.0  ;;  %v6895_v22 = vld [vmem:[%s9665_s14] ss:$0 sm:$0xff] }
 0x9f9   :  { %3138 = vadd.xlane.f32.xlu1 %v3137_v24 }
 0xa86   :  { %v3139_v36 = vpop.xlane.xlu1 %3138 }
 0xa87   :  { %v3141_v37 = vmul.f32 0.03125, %v3139_v36 }
 0xa89   :  { %v3143_v38 = vadd.f32 1e-12, %v3141_v37 }
 0xa8b   :  { %8337 = vrsqrt.f32 %v3143_v38 }
 0xa95   :  { %v8338_v9 = vpop.eup %8337 }
 0xa96   :  { %v3147_v39 = vmul.f32 %v8338_v9, %v3131_v60 }
 0xa98   :  { %7645 = vmatmul.mubr.msk.f32.vlgmr.msra.gmra.mrb[38].mxu0 %vm154_vm1, %v3147_v39 }
 0xa99   :  { %8153 = vmatpush3.bf16.msra.mxu0 %v8150_v45  ;;  %v6952_v45 = vld [vmem:[%s9656_s5 + $0xc0] sm:$0xff] }
 0xa9a   :  { %8155 = vmatprep.subr.bf16.mxu0 %v8154_v51 }
 0xa9d   :  { %8157 = vmatpush3.bf16.msra.mxu0 %v8154_v51  ;;  %v6968_v51 = vld [vmem:[%s9654_s3 + $0xe0] sm:$0xff] }
 0xa9e   :  { %8159 = vmatprep.subr.bf16.mxu0 %v8158_v26 }
 0xb6b   :  { %v7646_v3 = vpop.f32.mrb[38].mxu0 }
 0xb6c   :  { %v3237_v4 = vadd.f32 %v7646_v3, %v6892_v2  ;;  %v3231_v40 = vpop.f32.mrb[39].mxu0 }
 0xb6d   :  { %v3232_v5 = vadd.f32 %v6892_v2, %v3231_v40 }
 0xb6e   :  { %v3243_v6 = vmul.f32 0.044715, %v3237_v4  ;;  %v3241_v17 = vmul.f32 0.5, %v3237_v4 }
 0xb6f   :  { %v3242_v1 = vmul.f32 0.044715, %v3232_v5  ;;  %v3240_v0 = vmul.f32 0.5, %v3232_v5 }
 0xb70   :  { %v3245_v7 = vmul.f32 %v3243_v6, %v3237_v4 }
 0xb71   :  { %v3244_v8 = vmul.f32 %v3242_v1, %v3232_v5  ;;  %v6907_v1 = vld [vmem:[%s9656_s5 + $0x98] sm:$0xff] }
 0xb72   :  { %v3247_v10 = vmul.f32 %v3245_v7, %v3237_v4  ;;  %v6946_v7 = vld [vmem:[%s9654_s3 + $0xd0] sm:$0xff] }
 0xb73   :  { %v3246_v11 = vmul.f32 %v3244_v8, %v3232_v5  ;;  %v6947_v8 = vld [vmem:[%s9654_s3 + $0xd8] sm:$0xff] }
 0xb74   :  { %v3249_v23 = vadd.f32 %v3247_v10, %v3237_v4 }
 0xb75   :  { %v3248_v28 = vadd.f32 %v3246_v11, %v3232_v5  ;;  %v6906_v5 = vld [vmem:[%s9656_s5 + $0x90] sm:$0xff] }
 0xb76   :  { %v3251_v12 = vmul.f32 0.7978846, %v3249_v23  ;;  %v6912_v23 = vld [vmem:[%s9658_s7 + $0x80] sm:$0xff] }
 0xb77   :  { %v3250_v35 = vmul.f32 0.7978846, %v3248_v28  ;;  %v8162_v28 = vpack.c.bf16 %v6907_v1, %v6906_v5  ;;  %v6909_v5 = vld [vmem:[%s9657_s6 + $0x4] ss:$0 sm:$0xff] }
 0xb78   :  { %8339 = vtanh.f32 %v3251_v12  ;;  %v8202_v12 = vpack.c.bf16 %v6947_v8, %v6946_v7 }
 0xb79   :  { %8341 = vtanh.f32 %v3250_v35  ;;  %v6913_v35 = vld [vmem:[%s9658_s7 + $0x88] sm:$0xff] }
 0xb82   :  { %v8340_v42 = vpop.eup %8339 }
 0xb83   :  { %v8342_v13 = vpop.eup %8341  ;;  %v3255_v14 = vadd.f32 1.0, %v8340_v42  ;;  %v6960_v42 = vld [vmem:[%s9658_s7 + $0xc0] sm:$0xff] }
 0xb84   :  { %v3254_v15 = vadd.f32 1.0, %v8342_v13  ;;  %v6961_v13 = vld [vmem:[%s9658_s7 + $0xc8] sm:$0xff] }
 0xb85   :  { %v3257_v21 = vmul.f32 %v3255_v14, %v3241_v17  ;;  %v8166_v14 = vpack.c.bf16 %v6913_v35, %v6912_v23  ;;  %v6915_v17 = vld [vmem:[%s9658_s7 + $0x98] sm:$0xff]  ;;  %v6933_v23 = vld [vmem:[%s9657_s6 + $0x5] ss:$0 sm:$0xff]  ;;  %v6917_v35 = vld [vmem:[%s9659_s8 + $0x4] ss:$0 sm:$0xff] }
 0xb86   :  { %v3256_v20 = vmul.f32 %v3254_v15, %v3240_v0  ;;  %v8214_v0 = vpack.c.bf16 %v6961_v13, %v6960_v42  ;;  %v6914_v15 = vld [vmem:[%s9658_s7 + $0x90] sm:$0xff]  ;;  %v9319_v42 = vld [vmem:[%s9659_s8 + $0x6] ss:$0 sm:$0xff] }
 0xb88   :  { %7679 = vmatprep.mubr.f32.mxu1 %v3256_v20  ;;  %v6962_v20 = vld [vmem:[%s9658_s7 + $0xd0] sm:$0xff] }
 0xb89   :  { %7680 = vmatmul.mubr.f32.vlgmr.msra.gmra.mrb[36].mxu1 %v3257_v21  ;;  %v6963_v21 = vld [vmem:[%s9658_s7 + $0xd8] sm:$0xff] }
 0xb8a   :  { %8185 = vmatpush3.bf16.msra.mxu1 %v8182_v47  ;;  %v8206_v47 = vpack.c.bf16 %v6953_v46, %v6952_v45 }
 0xb8b   :  { %8187 = vmatprep.subr.bf16.mxu1 %v8186_v55 }
 0xb8e   :  { %8189 = vmatpush3.bf16.msra.mxu1 %v8186_v55  ;;  %v8222_v55 = vpack.c.bf16 %v6969_v54, %v6968_v51 }
 0xb8f   :  { %8199 = vmatprep.subr.bf16.mxu1 %v8198_v61 }
 0xc5c   :  { %v7681_v60 = vpop.f32.mrb[36].mxu1 }
 0xc5d   :  { %v3350_v24 = vadd.f32 %v7681_v60, %v9012_v16  ;;  %v3340_v25 = vpop.f32.mrb[37].mxu1  ;;  %v8170_v60 = vpack.c.bf16 %v6915_v17, %v6914_v15 }
 0xc5e   :  { %v3349_v19 = vadd.f32 %v3340_v25, %v8988_v53  ;;  %v6921_v25 = vld [vmem:[%s9654_s3 + $0xa8] sm:$0xff] }
 0xc5f   :  { %v9087_v27 = vadd.f32 %v6895_v22, %v3350_v24  ;;  %v6920_v24 = vld [vmem:[%s9654_s3 + $0xa0] sm:$0xff] }
 0xc60   :  { %v9089_v29 = vadd.f32 %v6895_v22, %v3349_v19  ;;  %v8218_v22 = vpack.c.bf16 %v6963_v21, %v6962_v20  ;;  %v6976_v19 = vld [vmem:[%s9656_s5 + $0xe0] sm:$0xff] }
 0xc61   :  { %v3363_v30 = vsel %vm154_vm1, %v9087_v27, 0.0  ;;  %v6925_v21 = vld [vmem:[%s9655_s4 + $0x5] ss:$0 sm:$0xff] }
 0xc62   :  { %3364 = vadd.xlane.f32.xlu1 %v3363_v30  ;;  %v3360_v31 = vsel %vm154_vm1, %v9089_v29, 0.0  ;;  %v6977_v30 = vld [vmem:[%s9656_s5 + $0xe8] sm:$0xff] }
 0xc63   :  { %3361 = vadd.xlane.f32.xlu0 %v3360_v31  ;;  %v8174_v31 = vpack.c.bf16 %v6921_v25, %v6920_v24 }
 0xcef   :  { %v3365_v32 = vpop.xlane.xlu1 %3364 }
 0xcf0   :  { %v3367_v33 = vmul.f32 0.03125, %v3365_v32  ;;  %v3362_v34 = vpop.xlane.xlu0 %3361  ;;  %v8230_v32 = vpack.c.bf16 %v6977_v30, %v6976_v19 }
 0xcf1   :  { %v3366_v36 = vmul.f32 0.03125, %v3362_v34  ;;  %v6923_v34 = vld [vmem:[%s9654_s3 + $0xb8] sm:$0xff] }
 0xcf2   :  { %v3369_v16 = vsub.f32 %v9087_v27, %v3367_v33  ;;  %v6922_v33 = vld [vmem:[%s9654_s3 + $0xb0] sm:$0xff] }
 0xcf3   :  { %v3368_v53 = vsub.f32 %v9089_v29, %v3366_v36  ;;  %v6978_v36 = vld [vmem:[%s9656_s5 + $0xf0] sm:$0xff] }
 0xcf4   :  { %v3371_v37 = vmul.f32 %v3369_v16, %v3369_v16 }
 0xcf5   :  { %v3370_v38 = vmul.f32 %v3368_v53, %v3368_v53 }
 0xcf6   :  { %v3375_v9 = vsel %vm154_vm1, %v3371_v37, 0.0  ;;  %v6936_v37 = vld [vmem:[%s9658_s7 + $0xa0] sm:$0xff] }
 0xcf7   :  { %3376 = vadd.xlane.f32.xlu1 %v3375_v9  ;;  %v3372_v39 = vsel %vm154_vm1, %v3370_v38, 0.0  ;;  %v6937_v38 = vld [vmem:[%s9658_s7 + $0xa8] sm:$0xff] }
 0xcf8   :  { %3373 = vadd.xlane.f32.xlu0 %v3372_v39  ;;  %v8190_v39 = vpack.c.bf16 %v6937_v38, %v6936_v37  ;;  %v6949_v38 = vld [vmem:[%s9655_s4 + $0x6] ss:$0 sm:$0xff] }
 0xd84   :  { %v3377_v62 = vpop.xlane.xlu1 %3376 }
 0xd85   :  { %v3379_v63 = vmul.f32 0.03125, %v3377_v62  ;;  %v3374_v58 = vpop.xlane.xlu0 %3373  ;;  %v6986_v62 = vld [vmem:[%s9658_s7 + $0xf0] sm:$0xff] }
 0xd86   :  { %v3378_v2 = vmul.f32 0.03125, %v3374_v58 }
 0xd87   :  { %v3381_v3 = vadd.f32 1e-12, %v3379_v63  ;;  %v6987_v63 = vld [vmem:[%s9658_s7 + $0xf8] sm:$0xff] }
 0xd88   :  { %v3380_v4 = vadd.f32 1e-12, %v3378_v2  ;;  %v8242_v58 = vpack.c.bf16 %v6987_v63, %v6986_v62 }
 0xd89   :  { %8343 = vrsqrt.f32 %v3381_v3 }
 0xd8a   :  { %8345 = vrsqrt.f32 %v3380_v4 }
 0xd93   :  { %v8344_v40 = vpop.eup %8343 }
 0xd94   :  { %v8346_v6 = vpop.eup %8345  ;;  %v9149_v11 = vmul.f32 %v8344_v40, %v3369_v16  ;;  %v6979_v16 = vld [vmem:[%s9656_s5 + $0xf8] sm:$0xff] }
 0xd95   :  { %v9147_v10 = vmul.f32 %v8346_v6, %v3368_v53  ;;  %v8178_v53 = vpack.c.bf16 %v6923_v34, %v6922_v33  ;;  %v8234_v9 = vpack.c.bf16 %v6979_v16, %v6978_v36  ;;  %v6957_v16 = vld [vmem:[%s9657_s6 + $0x6] ss:$0 sm:$0xff] }
 0xd97   :  { %7690 = vmatprep.mubr.msk.f32.mxu0 %vm154_vm1, %v9147_v10  ;;  %7734 = vmatprep.mubr.msk.f32.mxu1 %vm154_vm1, %v9147_v10 }
 0xd98   :  { %7691 = vmatmul.mubr.msk.f32.vlgmr.msra.gmra.mrb[40].mxu0 %vm154_vm1, %v9149_v11  ;;  %7735 = vmatmul.mubr.msk.f32.vlgmr.msra.gmra.mrb[38].mxu1 %vm154_vm1, %v9149_v11 }
 0xd99   :  { %8161 = vmatpush3.bf16.msra.mxu0 %v8158_v26  ;;  %8201 = vmatpush3.bf16.msra.mxu1 %v8198_v61  ;;  %v6984_v26 = vld [vmem:[%s9658_s7 + $0xe0] sm:$0xff] }
 0xd9a   :  { %7701 = vmatprep.mubr.msk.f32.mxu0 %vm154_vm1, %v9147_v10  ;;  %7756 = vmatprep.mubr.msk.f32.mxu1 %vm154_vm1, %v9147_v10  ;;  %v8238_v61 = vpack.c.bf16 %v6985_v59, %v6984_v26 }
 0xd9b   :  { %8163 = vmatprep.subr.bf16.mxu0 %v8162_v28  ;;  %8203 = vmatprep.subr.bf16.mxu1 %v8202_v12 }
 0xd9d   :  { %8165 = vmatpush3.bf16.msra.mxu0 %v8162_v28  ;;  %8205 = vmatpush3.bf16.msra.mxu1 %v8202_v12 }
 0xd9e   :  { %8167 = vmatprep.subr.bf16.mxu0 %v8166_v14  ;;  %8215 = vmatprep.subr.bf16.mxu1 %v8214_v0 }
 0xda0   :  { %7702 = vmatmul.mubr.msk.f32.vlgmr.msra.gmra.mrb[42].mxu0 %vm154_vm1, %v9149_v11  ;;  %7757 = vmatmul.mubr.msk.f32.vlgmr.msra.gmra.mrb[40].mxu1 %vm154_vm1, %v9149_v11 }
 0xda1   :  { %8169 = vmatpush3.bf16.msra.mxu0 %v8166_v14  ;;  %7712 = vmatprep.mubr.msk.f32.mxu0 %vm154_vm1, %v9147_v10 }
 0xda2   :  { %8217 = vmatpush3.bf16.msra.mxu1 %v8214_v0  ;;  %7778 = vmatprep.mubr.msk.f32.mxu1 %vm154_vm1, %v9147_v10 }
 0xda3   :  { %8171 = vmatprep.subr.bf16.mxu0 %v8170_v60  ;;  %8219 = vmatprep.subr.bf16.mxu1 %v8218_v22 }
 0xda5   :  { %8173 = vmatpush3.bf16.msra.mxu0 %v8170_v60 }
 0xda6   :  { %8221 = vmatpush3.bf16.msra.mxu1 %v8218_v22  ;;  %8175 = vmatprep.subr.bf16.mxu0 %v8174_v31  ;;  %v6981_v22 = vld [vmem:[%s9657_s6 + $0x7] ss:$0 sm:$0xff] }
 0xda7   :  { %8231 = vmatprep.subr.bf16.mxu1 %v8230_v32 }
 0xda8   :  { %7713 = vmatmul.mubr.msk.f32.vlgmr.msra.gmra.mrb[44].mxu0 %vm154_vm1, %v9149_v11 }
 0xda9   :  { %7779 = vmatmul.mubr.msk.f32.vlgmr.msra.gmra.mrb[42].mxu1 %vm154_vm1, %v9149_v11  ;;  %8177 = vmatpush3.bf16.msra.mxu0 %v8174_v31 }
 0xdaa   :  { %7723 = vmatprep.mubr.msk.f32.mxu0 %vm154_vm1, %v9147_v10  ;;  %8233 = vmatpush3.bf16.msra.mxu1 %v8230_v32  ;;  %v6941_v32 = vld [vmem:[%s9659_s8 + $0x5] ss:$0 sm:$0xff] }
 0xdab   :  { %7800 = vmatprep.mubr.msk.f32.mxu1 %vm154_vm1, %v9147_v10  ;;  %8179 = vmatprep.subr.bf16.mxu0 %v8178_v53 }
 0xdac   :  { %8235 = vmatprep.subr.bf16.mxu1 %v8234_v9 }
 0xdad   :  { %8181 = vmatpush3.bf16.msra.mxu0 %v8178_v53 }
 0xdae   :  { %8237 = vmatpush3.bf16.msra.mxu1 %v8234_v9  ;;  %8191 = vmatprep.subr.bf16.mxu0 %v8190_v39 }
 0xdaf   :  { %7814 = vmatprep.subr.mxu1 %v8415_v52 }
 0xdb0   :  { %7724 = vmatmul.mubr.msk.f32.vlgmr.msra.gmra.mrb[46].mxu0 %vm154_vm1, %v9149_v11 }
 0xdb1   :  { %7801 = vmatmul.mubr.msk.f32.vlgmr.msra.gmra.mrb[44].mxu1 %vm154_vm1, %v9149_v11  ;;  %8193 = vmatpush3.bf16.msra.mxu0 %v8190_v39 }
 0xdb2   :  { %7745 = vmatprep.mubr.msk.f32.mxu0 %vm154_vm1, %v9147_v10  ;;  %8195 = vmatprep.subr.bf16.mxu0 %v8194_v44 }
 0xdb3   :  { %7816 = vmatprep.mubr.msk.f32.mxu1 %vm8416_vm2, %v8415_v52 }
 0xdb5   :  { %8197 = vmatpush3.bf16.msra.mxu0 %v8194_v44 }
 0xdb6   :  { %8207 = vmatprep.subr.bf16.mxu0 %v8206_v47 }
 0xdb8   :  { %7746 = vmatmul.mubr.msk.f32.vlgmr.msra.gmra.mrb[48].mxu0 %vm154_vm1, %v9149_v11 }
 0xdb9   :  { %8209 = vmatpush3.bf16.msra.mxu0 %v8206_v47  ;;  %7767 = vmatprep.mubr.msk.f32.mxu0 %vm154_vm1, %v9147_v10 }
 0xdba   :  { %8211 = vmatprep.subr.bf16.mxu0 %v8210_v50 }
 0xdbd   :  { %8213 = vmatpush3.bf16.msra.mxu0 %v8210_v50 }
 0xdbe   :  { %8223 = vmatprep.subr.bf16.mxu0 %v8222_v55 }
 0xdc0   :  { %7768 = vmatmul.mubr.msk.f32.vlgmr.msra.gmra.mrb[50].mxu0 %vm154_vm1, %v9149_v11 }
 0xdc1   :  { %8225 = vmatpush3.bf16.msra.mxu0 %v8222_v55  ;;  %7789 = vmatprep.mubr.msk.f32.mxu0 %vm154_vm1, %v9147_v10  ;;  %v9376_v55 = vld [vmem:[%s9659_s8 + $0x7] ss:$0 sm:$0xff] }
 0xdc2   :  { %8227 = vmatprep.subr.bf16.mxu0 %v8226_v18 }
 0xdc5   :  { %8229 = vmatpush3.bf16.msra.mxu0 %v8226_v18 }
 0xdc6   :  { %8239 = vmatprep.subr.bf16.mxu0 %v8238_v61 }
 0xdc8   :  { %7790 = vmatmul.mubr.msk.f32.vlgmr.msra.gmra.mrb[52].mxu0 %vm154_vm1, %v9149_v11 }
 0xdc9   :  { %8241 = vmatpush3.bf16.msra.mxu0 %v8238_v61  ;;  %7811 = vmatprep.mubr.msk.f32.mxu0 %vm154_vm1, %v9147_v10  ;;  %v6901_v10 = vld [vmem:[%s9655_s4 + $0x4] ss:$0 sm:$0xff] }
 0xdca   :  { %8243 = vmatprep.subr.bf16.mxu0 %v8242_v58 }
 0xdcd   :  { %8245 = vmatpush3.bf16.msra.mxu0 %v8242_v58 }
 0xdce   :  { %7824 = vmatprep.subr.mxu0 %v8415_v52 }
 0xdd0   :  { %7812 = vmatmul.mubr.msk.f32.vlgmr.msra.gmra.mrb[54].mxu0 %vm154_vm1, %v9149_v11 }
 0xdd1   :  { %7826 = vmatprep.mubr.msk.f32.mxu0 %vm8416_vm2, %v8415_v52 }
 0xe6b   :  { %v7692_v2 = vpop.f32.mrb[40].mxu0  ;;  %v7736_v3 = vpop.f32.mrb[38].mxu1 }
 0xe6c   :  { %v3471_v4 = vpop.f32.mrb[41].mxu0  ;;  %v3823_v40 = vpop.f32.mrb[39].mxu1  ;;  %v3477_v45 = vadd.f32 %v7692_v2, %v6901_v10  ;;  %v3829_v49 = vadd.f32 %v7736_v3, %v6933_v23 }
 0xe6d   :  { %v3472_v28 = vadd.f32 %v6901_v10, %v3471_v4  ;;  %v3824_v12 = vadd.f32 %v6933_v23, %v3823_v40 }
 0xe73   :  { %v7703_v6 = vpop.f32.mrb[42].mxu0  ;;  %v7758_v1 = vpop.f32.mrb[40].mxu1 }
 0xe74   :  { %v3559_v7 = vpop.f32.mrb[43].mxu0  ;;  %v3999_v8 = vpop.f32.mrb[41].mxu1  ;;  %v3565_v41 = vadd.f32 %v7703_v6, %v6909_v5  ;;  %v4005_v50 = vadd.f32 %v7758_v1, %v6949_v38 }
 0xe75   :  { %v3560_v11 = vadd.f32 %v6909_v5, %v3559_v7  ;;  %v4000_v39 = vadd.f32 %v6949_v38, %v3999_v8 }
 0xe77   :  { %7815 = vmatpush3.xpose.msk.msra.mxu1 %vm1238_vm3, %v3560_v11 }
 0xe78   :  { %7819 = vmatprep.subr.mxu1 %v8415_v52 }
 0xe7a   :  { %7817 = vmatmul.mubr.msk.f32.vlgmr.msra.gmra.mrb[46].mxu1 %vm1238_vm3, %v3472_v28 }
 0xe7b   :  { %v7714_v13 = vpop.f32.mrb[44].mxu0  ;;  %7820 = vmatpush3.xpose.msk.msra.mxu1 %vm1238_vm3, %v3824_v12  ;;  %7821 = vmatprep.mubr.msk.f32.mxu1 %vm8416_vm2, %v8415_v52 }
 0xe7c   :  { %v9324_v14 = vadd.f32 %v7714_v13, %v6917_v35  ;;  %v7780_v0 = vpop.f32.mrb[42].mxu1  ;;  %v3647_v15 = vpop.f32.mrb[45].mxu0  ;;  %7829 = vmatprep.subr.mxu1 %v8415_v52 }
 0xe7d   :  { %v9328_v17 = vadd.f32 %v7780_v0, %v9319_v42  ;;  %v9330_v20 = vpop.f32.mrb[43].mxu1  ;;  %v3648_v51 = vadd.f32 %v6917_v35, %v3647_v15 }
 0xe83   :  { %v7725_v60 = vpop.f32.mrb[46].mxu0 }
 0xe84   :  { %v7802_v24 = vpop.f32.mrb[44].mxu1  ;;  %v3735_v25 = vpop.f32.mrb[47].mxu0  ;;  %v3741_v54 = vadd.f32 %v7725_v60, %v6925_v21 }
 0xe85   :  { %v3736_v19 = vadd.f32 %v6925_v21, %v3735_v25  ;;  %v4351_v30 = vpop.f32.mrb[45].mxu1  ;;  %v4357_v56 = vadd.f32 %v7802_v24, %v6981_v22 }
 0xe86   :  { %v4352_v31 = vadd.f32 %v6981_v22, %v4351_v30 }
 0xe87   :  { %7822 = vmatmul.mubr.msk.f32.vlgmr.msra.gmra.mrb[48].mxu1 %vm1238_vm3, %v3736_v19 }
 0xe88   :  { %7830 = vmatpush3.xpose.msk.msra.mxu1 %vm1238_vm3, %v4352_v31  ;;  %7831 = vmatprep.mubr.msk.f32.mxu1 %vm8416_vm2, %v8415_v52 }
 0xe89   :  { %7839 = vmatprep.subr.mxu1 %v8415_v52 }
 0xe8b   :  { %v7747_v33 = vpop.f32.mrb[48].mxu0 }
 0xe8c   :  { %v9346_v34 = vadd.f32 %v7747_v33, %v6941_v32  ;;  %v3911_v36 = vpop.f32.mrb[49].mxu0 }
 0xe8d   :  { %v3912_v61 = vadd.f32 %v6941_v32, %v3911_v36 }
 0xe93   :  { %v7769_v53 = vpop.f32.mrb[50].mxu0 }
 0xe94   :  { %v4087_v37 = vpop.f32.mrb[51].mxu0  ;;  %v4093_v47 = vadd.f32 %v7769_v53, %v6957_v16 }
 0xe95   :  { %v4088_v9 = vadd.f32 %v6957_v16, %v4087_v37 }
 0xe97   :  { %7825 = vmatpush3.xpose.msk.msra.mxu0 %vm1238_vm3, %v4088_v9 }
 0xe98   :  { %7834 = vmatprep.subr.mxu0 %v8415_v52 }
 0xe9a   :  { %7827 = vmatmul.mubr.msk.f32.vlgmr.msra.gmra.mrb[56].mxu0 %vm1238_vm3, %v4000_v39 }
 0xe9b   :  { %v7791_v44 = vpop.f32.mrb[52].mxu0  ;;  %7835 = vmatpush3.xpose.msk.msra.mxu0 %vm1238_vm3, %v3565_v41  ;;  %7836 = vmatprep.mubr.msk.f32.mxu0 %vm8416_vm2, %v8415_v52 }
 0xe9c   :  { %v4263_v46 = vpop.f32.mrb[53].mxu0  ;;  %7844 = vmatprep.subr.mxu0 %v8415_v52  ;;  %v4269_v59 = vadd.f32 %v7791_v44, %v6973_v43 }
 0xe9d   :  { %v4264_v48 = vadd.f32 %v6973_v43, %v4263_v46 }
 0xe9e   :  { %7837 = vmatmul.mubr.msk.f32.vlgmr.msra.gmra.mrb[58].mxu0 %vm1238_vm3, %v3477_v45 }
 0xe9f   :  { %7832 = vmatmul.mubr.msk.f32.vlgmr.msra.gmra.mrb[50].mxu1 %vm1238_vm3, %v4264_v48  ;;  %7845 = vmatpush3.xpose.msk.msra.mxu0 %vm1238_vm3, %v4093_v47 }
 0xea0   :  { %7840 = vmatpush3.xpose.msk.msra.mxu1 %vm1238_vm3, %v3829_v49  ;;  %7846 = vmatprep.mubr.msk.f32.mxu0 %vm8416_vm2, %v8415_v52 }
 0xea1   :  { %7841 = vmatprep.mubr.msk.f32.mxu1 %vm8416_vm2, %v8415_v52  ;;  %7849 = vmatprep.subr.mxu1 %v8415_v52 }
 0xea2   :  { %7847 = vmatmul.mubr.msk.f32.vlgmr.msra.gmra.mrb[60].mxu0 %vm1238_vm3, %v4005_v50  ;;  %7854 = vmatprep.subr.mxu0 %v8415_v52 }
 0xea3   :  { %v7813_v57 = vpop.f32.mrb[54].mxu0  ;;  %7842 = vmatmul.mubr.msk.f32.vlgmr.msra.gmra.mrb[52].mxu1 %vm1238_vm3, %v3741_v54  ;;  %7855 = vmatpush3.msra.mxu0 %v3648_v51 }
 0xea4   :  { %v9382_v18 = vadd.f32 %v7813_v57, %v9376_v55  ;;  %7850 = vmatpush3.xpose.msk.msra.mxu1 %vm1238_vm3, %v4357_v56  ;;  %v9385_v26 = vpop.f32.mrb[55].mxu0  ;;  %7851 = vmatprep.mubr.msk.f32.mxu1 %vm8416_vm2, %v8415_v52  ;;  %v9428_v56 = vld [vmem:[%s9660_s9 + $0x28] sm:$0xff]  ;;  %v9435_v57 = vld [vmem:[%s9660_s9 + $0x20] sm:$0xff] }
 0xea5   :  { %7859 = vmatprep.subr.mxu1 %v8415_v52  ;;  %7856 = vmatprep.mubr.msk.f32.mxu0 %vm8416_vm2, %v8415_v52 }
 0xea6   :  { %7864 = vmatprep.subr.mxu0 %v8415_v52 }
 0xea7   :  { %7852 = vmatmul.mubr.msk.f32.vlgmr.msra.gmra.mrb[54].mxu1 %vm1238_vm3, %v4269_v59 }
 0xea8   :  { %7860 = vmatpush3.msra.mxu1 %v3912_v61  ;;  %7861 = vmatprep.mubr.msk.f32.mxu1 %vm8416_vm2, %v8415_v52 }
 0xea9   :  { %7869 = vmatprep.subr.mxu1 %v8415_v52 }
 0xf4d   :  { %v4520_v62 = vpop.f32.mrb[46].mxu1 }
 0xf4e   :  { %v7818_v63 = vpop.f32.mrb[47].mxu1  ;;  %v5056_v4 = vsel %vm1238_vm3, %v4520_v62, -inf }
 0xf5a   :  { %v4596_v58 = vpop.f32.mrb[48].mxu1 }
 0xf5b   :  { %v7823_v2 = vpop.f32.mrb[49].mxu1  ;;  %v5059_v3 = vsel %vm1238_vm3, %v4596_v58, -inf }
 0xf5c   :  { %5060 = vmax.xlane.f32.xlu0 %v5059_v3 }
 0xf60   :  { %5057 = vmax.xlane.f32.xlu0 %v5056_v4 }
 0xf6d   :  { %v4672_v40 = vpop.f32.mrb[56].mxu0 }
 0xf6e   :  { %v7828_v5 = vpop.f32.mrb[57].mxu0  ;;  %v5062_v30 = vsel %vm1238_vm3, %v4672_v40, -inf }
 0xf71   :  { %v9399_v6 = vpop.f32.mrb[58].mxu0 }
 0xf72   :  { %v4748_v1 = vpop.f32.mrb[50].mxu1  ;;  %v7838_v7 = vpop.f32.mrb[59].mxu0  ;;  %v5068_v51 = vsel %vm1238_vm3, %v9399_v6, -inf }
 0xf73   :  { %v7833_v8 = vpop.f32.mrb[51].mxu1  ;;  %v5065_v10 = vsel %vm1238_vm3, %v4748_v1, -inf }
 0xf74   :  { %5066 = vmax.xlane.f32.xlu0 %v5065_v10 }
 0xf75   :  { %v9402_v11 = vpop.f32.mrb[60].mxu0 }
 0xf76   :  { %v4900_v23 = vpop.f32.mrb[52].mxu1  ;;  %v7848_v28 = vpop.f32.mrb[61].mxu0  ;;  %v5074_v8 = vsel %vm1238_vm3, %v9402_v11, -inf }
 0xf77   :  { %v7843_v12 = vpop.f32.mrb[53].mxu1  ;;  %v5071_v50 = vsel %vm1238_vm3, %v4900_v23, -inf }
 0xf7a   :  { %v9404_v35 = vpop.f32.mrb[54].mxu1 }
 0xf7b   :  { %v7853_v13 = vpop.f32.mrb[55].mxu1  ;;  %v5077_v54 = vsel %vm1238_vm3, %v9404_v35, -inf }
 0xf7c   :  { %v4176_v13 = vadd.f32 %v9319_v42, %v9330_v20 }
 0xfe9   :  { %v5061_v0 = vpop.xlane.xlu0 %5060 }
 0xfea   :  { %v5081_v15 = vsub.f32 %v4596_v58, %v5061_v0 }
 0xfec   :  { %v5090_v21 = vmul.f32 1.442695, %v5081_v15 }
 0xfed   :  { %v5058_v60 = vpop.xlane.xlu0 %5057 }
 0xfee   :  { %8347 = vpow2.f32 %v5090_v21  ;;  %v5080_v22 = vsub.f32 %v4520_v62, %v5058_v60 }
 0xff0   :  { %v5088_v24 = vmul.f32 1.442695, %v5080_v22  ;;  %v4440_v22 = vadd.f32 %v9376_v55, %v9385_v26  ;;  %v7010_v55 = vld [vmem:[%s9660_s9 + $0x30] sm:$0xff] }
 0xff2   :  { %8349 = vpow2.f32 %v5088_v24 }
 0xff8   :  { %v8348_v25 = vpop.eup %8347 }
 0xff9   :  { %v5107_v19 = vsel %vm1238_vm3, %v8348_v25, 0.0 }
 0xffa   :  { %5108 = vadd.xlane.f32.xlu1 %v5107_v19 }
 0xffc   :  { %v8350_v31 = vpop.eup %8349 }
 0xffd   :  { %v5104_v33 = vsel %vm1238_vm3, %v8350_v31, 0.0 }
 0xffe   :  { %5063 = vmax.xlane.f32.xlu1 %v5062_v30 }
0x1001   :  { %v5067_v32 = vpop.xlane.xlu0 %5066 }
0x1002   :  { %v5083_v36 = vsub.f32 %v4748_v1, %v5067_v32  ;;  %5105 = vadd.xlane.f32.xlu1 %v5104_v33 }
0x1004   :  { %v5094_v16 = vmul.f32 1.442695, %v5083_v36 }
0x1006   :  { %8351 = vpow2.f32 %v5094_v16 }
0x1010   :  { %v9409_v53 = vpop.eup %8351 }
0x1011   :  { %v5113_v37 = vsel %vm1238_vm3, %v9409_v53, 0.0 }
0x1012   :  { %5114 = vadd.xlane.f32.xlu1 %v5113_v37 }
0x1087   :  { %v5109_v38 = vpop.xlane.xlu1 %5108 }
0x1088   :  { %8353 = vrcp.f32 %v5109_v38 }
0x108b   :  { %v5064_v9 = vpop.xlane.xlu1 %5063 }
0x108c   :  { %v5082_v39 = vsub.f32 %v4672_v40, %v5064_v9 }
0x108e   :  { %v5092_v41 = vmul.f32 1.442695, %v5082_v39 }
0x108f   :  { %v5106_v43 = vpop.xlane.xlu1 %5105 }
0x1090   :  { %8355 = vpow2.f32 %v5092_v41 }
0x1091   :  { %8357 = vrcp.f32 %v5106_v43 }
0x1092   :  { %v8354_v44 = vpop.eup %8353 }
0x1093   :  { %v5131_v45 = vmul.f32 %v8354_v44, %v8348_v25 }
0x1095   :  { %7862 = vmatmul.mubr.msk.f32.vlgmr.msra.gmra.mrb[56].mxu1 %vm1238_vm3, %v5131_v45 }
0x1096   :  { %7871 = vmatprep.mubr.msk.f32.mxu1 %vm8416_vm2, %v8415_v52  ;;  %7870 = vmatpush3.msra.mxu1 %v9435_v57 }
0x1097   :  { %7879 = vmatprep.subr.mxu1 %v8415_v52 }
0x109a   :  { %v8356_v46 = vpop.eup %8355 }
0x109b   :  { %v8358_v47 = vpop.eup %8357  ;;  %v5110_v48 = vsel %vm1238_vm3, %v8356_v46, 0.0 }
0x109c   :  { %v5129_v49 = vmul.f32 %v8358_v47, %v8350_v31  ;;  %5111 = vadd.xlane.f32.xlu0 %v5110_v48 }
0x109e   :  { %7857 = vmatmul.mubr.msk.f32.vlgmr.msra.gmra.mrb[62].mxu0 %vm1238_vm3, %v5129_v49 }
0x109f   :  { %7866 = vmatprep.mubr.msk.f32.mxu0 %vm8416_vm2, %v8415_v52  ;;  %7865 = vmatpush3.msra.mxu0 %v9428_v56  ;;  %v5115_v12 = vpop.xlane.xlu1 %5114 }
0x10a0   :  { %5072 = vmax.xlane.f32.xlu0 %v5071_v50  ;;  %7874 = vmatprep.subr.mxu0 %v8415_v52 }
0x10a4   :  { %5069 = vmax.xlane.f32.xlu0 %v5068_v51 }
0x10a8   :  { %5078 = vmax.xlane.f32.xlu0 %v5077_v54 }
0x1129   :  { %v5112_v59 = vpop.xlane.xlu0 %5111 }
0x112d   :  { %v5073_v61 = vpop.xlane.xlu0 %5072 }
0x112e   :  { %v5085_v62 = vsub.f32 %v4900_v23, %v5073_v61  ;;  %v7029_v61 = vld [vmem:[%s9661_s10 + $0x1] ss:$0 sm:$0xff] }
0x1130   :  { %v5098_v63 = vmul.f32 1.442695, %v5085_v62 }
0x1131   :  { %v5070_v58 = vpop.xlane.xlu0 %5069 }
0x1132   :  { %8359 = vpow2.f32 %v5098_v63  ;;  %v5084_v2 = vsub.f32 %v9399_v6, %v5070_v58 }
0x1134   :  { %v5096_v3 = vmul.f32 1.442695, %v5084_v2 }
0x1135   :  { %v5079_v4 = vpop.xlane.xlu0 %5078 }
0x1136   :  { %v5087_v40 = vsub.f32 %v9404_v35, %v5079_v4  ;;  %8361 = vpow2.f32 %v5096_v3 }
0x1138   :  { %v5102_v5 = vmul.f32 1.442695, %v5087_v40 }
0x113a   :  { %8363 = vpow2.f32 %v5102_v5 }
0x113b   :  { %8365 = vrcp.f32 %v5112_v59 }
0x113c   :  { %v9441_v1 = vpop.eup %8359  ;;  %8367 = vrcp.f32 %v5115_v12 }
0x113d   :  { %v5119_v7 = vsel %vm1238_vm3, %v9441_v1, 0.0 }
0x113e   :  { %5120 = vadd.xlane.f32.xlu1 %v5119_v7 }
0x1140   :  { %v8362_v10 = vpop.eup %8361 }
0x1141   :  { %v5116_v6 = vsel %vm1238_vm3, %v8362_v10, 0.0 }
0x1142   :  { %5075 = vmax.xlane.f32.xlu1 %v5074_v8 }
0x1144   :  { %v9448_v23 = vpop.eup %8363 }
0x1145   :  { %v5125_v28 = vsel %vm1238_vm3, %v9448_v23, 0.0  ;;  %v8366_v35 = vpop.eup %8365 }
0x1146   :  { %5117 = vadd.xlane.f32.xlu1 %v5116_v6  ;;  %v5133_v21 = vmul.f32 %v8366_v35, %v8356_v46  ;;  %v8368_v60 = vpop.eup %8367 }
0x1147   :  { %v5135_v42 = vmul.f32 %v8368_v60, %v9409_v53  ;;  %v9487_v53 = vld [vmem:[%s9660_s9 + $0x38] sm:$0xff] }
0x114a   :  { %5126 = vadd.xlane.f32.xlu1 %v5125_v28 }
0x1168   :  { %v5291_v0 = vpop.f32.mrb[56].mxu1 }
0x1169   :  { %v7863_v15 = vpop.f32.mrb[57].mxu1  ;;  %7867 = vmatmul.mubr.msk.f32.vlgmr.msra.gmra.mrb[64].mxu0 %vm1238_vm3, %v5291_v0 }
0x116a   :  { %7875 = vmatpush3.msra.mxu0 %v4176_v13  ;;  %7876 = vmatprep.mubr.msk.f32.mxu0 %vm8416_vm2, %v8415_v52 }
0x116b   :  { %7884 = vmatprep.subr.mxu0 %v8415_v52 }
0x116d   :  { %7877 = vmatmul.mubr.msk.f32.vlgmr.msra.gmra.mrb[66].mxu0 %vm1238_vm3, %v5133_v21 }
0x116e   :  { %7885 = vmatpush3.msra.mxu0 %v4440_v22  ;;  %7886 = vmatprep.mubr.msk.f32.mxu0 %vm8416_vm2, %v8415_v52 }
0x116f   :  { %7894 = vmatprep.subr.mxu0 %v8415_v52 }
0x1171   :  { %v5218_v20 = vpop.f32.mrb[62].mxu0  ;;  %7887 = vmatmul.mubr.msk.f32.vlgmr.msra.gmra.mrb[68].mxu0 %vm1238_vm3, %v5135_v42 }
0x1172   :  { %v7858_v24 = vpop.f32.mrb[63].mxu0  ;;  %7872 = vmatmul.mubr.msk.f32.vlgmr.msra.gmra.mrb[58].mxu1 %vm1238_vm3, %v5218_v20  ;;  %7895 = vmatpush3.msra.mxu0 %v9324_v14 }
0x1173   :  { %7896 = vmatprep.mubr.msk.f32.mxu0 %vm8416_vm2, %v8415_v52  ;;  %7881 = vmatprep.mubr.msk.f32.mxu1 %vm8416_vm2, %v8415_v52 }
0x1174   :  { %7904 = vmatprep.subr.mxu0 %v8415_v52  ;;  %7880 = vmatpush3.msra.mxu1 %v7010_v55 }
0x1175   :  { %7889 = vmatprep.subr.mxu1 %v8415_v52 }
0x11cb   :  { %v5121_v26 = vpop.xlane.xlu1 %5120 }
0x11cf   :  { %v5076_v25 = vpop.xlane.xlu1 %5075 }
0x11d0   :  { %v5086_v19 = vsub.f32 %v9402_v11, %v5076_v25 }
0x11d2   :  { %v5100_v14 = vmul.f32 1.442695, %v5086_v19 }
0x11d3   :  { %v5118_v30 = vpop.xlane.xlu1 %5117 }
0x11d4   :  { %8369 = vpow2.f32 %v5100_v14 }
0x11d5   :  { %8371 = vrcp.f32 %v5118_v30 }
0x11d6   :  { %8373 = vrcp.f32 %v5121_v26 }
0x11d7   :  { %v5127_v49 = vpop.xlane.xlu1 %5126 }
0x11de   :  { %v8370_v31 = vpop.eup %8369 }
0x11df   :  { %v8372_v32 = vpop.eup %8371  ;;  %v5122_v33 = vsel %vm1238_vm3, %v8370_v31, 0.0 }
0x11e0   :  { %v5137_v36 = vmul.f32 %v8372_v32, %v8362_v10  ;;  %5123 = vadd.xlane.f32.xlu0 %v5122_v33  ;;  %v8374_v9 = vpop.eup %8373 }
0x11e1   :  { %v5139_v46 = vmul.f32 %v8374_v9, %v9441_v1 }
0x11e2   :  { %7897 = vmatmul.mubr.msk.f32.vlgmr.msra.gmra.mrb[70].mxu0 %vm1238_vm3, %v5137_v36 }
0x11e3   :  { %7905 = vmatpush3.msra.mxu0 %v9428_v56  ;;  %7906 = vmatprep.mubr.msk.f32.mxu0 %vm8416_vm2, %v8415_v52 }
0x11e4   :  { %7914 = vmatprep.subr.mxu0 %v8415_v52 }
0x123c   :  { %v5364_v11 = vpop.f32.mrb[64].mxu0 }
0x123d   :  { %v7868_v16 = vpop.f32.mrb[65].mxu0 }
0x1240   :  { %v5510_v37 = vpop.f32.mrb[66].mxu0 }
0x1241   :  { %v7878_v38 = vpop.f32.mrb[67].mxu0  ;;  %7882 = vmatmul.mubr.msk.f32.vlgmr.msra.gmra.mrb[60].mxu1 %vm1238_vm3, %v5510_v37  ;;  %v7030_v37 = vld [vmem:[%s9662_s11 + $0x20] sm:$0xff] }
0x1242   :  { %7890 = vmatpush3.msra.mxu1 %v9487_v53  ;;  %7891 = vmatprep.mubr.msk.f32.mxu1 %vm8416_vm2, %v8415_v52  ;;  %v7032_v38 = vld [vmem:[%s9662_s11 + $0x30] sm:$0xff] }
0x1243   :  { %7899 = vmatprep.subr.mxu1 %v8415_v52 }
0x1244   :  { %v5657_v39 = vpop.f32.mrb[68].mxu0 }
0x1245   :  { %v5437_v41 = vpop.f32.mrb[58].mxu1  ;;  %v7888_v43 = vpop.f32.mrb[69].mxu0  ;;  %7892 = vmatmul.mubr.msk.f32.vlgmr.msra.gmra.mrb[62].mxu1 %vm1238_vm3, %v5657_v39  ;;  %v7033_v39 = vld [vmem:[%s9662_s11 + $0x38] sm:$0xff] }
0x1246   :  { %v5438_v44 = vadd.f32 %v5437_v41, %v5364_v11  ;;  %v7873_v45 = vpop.f32.mrb[59].mxu1  ;;  %7900 = vmatpush3.msra.mxu1 %v9346_v34  ;;  %7901 = vmatprep.mubr.msk.f32.mxu1 %vm8416_vm2, %v8415_v52  ;;  %v8250_v41 = vpack.c.bf16 %v7033_v39, %v7032_v38  ;;  %v7038_v43 = vld [vmem:[%s9664_s13 + $0x80] sm:$0xff] }
0x1247   :  { %7909 = vmatprep.subr.mxu1 %v8415_v52 }
0x1249   :  { %7902 = vmatmul.mubr.msk.f32.vlgmr.msra.gmra.mrb[64].mxu1 %vm1238_vm3, %v5139_v46 }
0x124a   :  { %7910 = vmatpush3.msra.mxu1 %v9435_v57  ;;  %7911 = vmatprep.mubr.msk.f32.mxu1 %vm8416_vm2, %v8415_v52 }
0x124b   :  { %7919 = vmatprep.subr.mxu1 %v8415_v52 }
0x126d   :  { %v5124_v34 = vpop.xlane.xlu0 %5123 }
0x126e   :  { %8375 = vrcp.f32 %v5124_v34 }
0x126f   :  { %8377 = vrcp.f32 %v5127_v49 }
0x1278   :  { %v8376_v63 = vpop.eup %8375 }
0x1279   :  { %v5141_v4 = vmul.f32 %v8376_v63, %v8370_v31  ;;  %v8378_v5 = vpop.eup %8377  ;;  %v7046_v63 = vld [vmem:[%s9664_s13 + $0xc0] sm:$0xff] }
0x12b5   :  { %v5804_v47 = vpop.f32.mrb[70].mxu0 }
0x12b6   :  { %v7898_v48 = vpop.f32.mrb[71].mxu0  ;;  %7912 = vmatmul.mubr.msk.f32.vlgmr.msra.gmra.mrb[66].mxu1 %vm1238_vm3, %v5804_v47 }
0x12b7   :  { %7920 = vmatpush3.msra.mxu1 %v7010_v55  ;;  %7921 = vmatprep.mubr.msk.f32.mxu1 %vm8416_vm2, %v8415_v52 }
0x12b8   :  { %7929 = vmatprep.subr.mxu1 %v8415_v52 }
0x1314   :  { %v5583_v50 = vpop.f32.mrb[60].mxu1 }
0x1315   :  { %v5587_v51 = vadd.f32 %v5583_v50, %v5438_v44  ;;  %v7883_v54 = vpop.f32.mrb[61].mxu1  ;;  %v7039_v44 = vld [vmem:[%s9664_s13 + $0x88] sm:$0xff]  ;;  %v7040_v50 = vld [vmem:[%s9664_s13 + $0x90] sm:$0xff] }
0x1316   :  { %v8254_v45 = vpack.c.bf16 %v7039_v44, %v7038_v43 }
0x1318   :  { %v5730_v56 = vpop.f32.mrb[62].mxu1 }
0x1319   :  { %v5734_v57 = vadd.f32 %v5730_v56, %v5587_v51  ;;  %v7893_v59 = vpop.f32.mrb[63].mxu1  ;;  %v7041_v51 = vld [vmem:[%s9664_s13 + $0x98] sm:$0xff]  ;;  %v7042_v56 = vld [vmem:[%s9664_s13 + $0xa0] sm:$0xff] }
0x131a   :  { %v8258_v54 = vpack.c.bf16 %v7041_v51, %v7040_v50  ;;  %v8417_v50 = vmov 0.0|0.0  }
0x131b   :  { %v6321_v62 = vadd.f32 %v5734_v57, %v9089_v29  ;;  %v5143_v29 = vmul.f32 %v8378_v5, %v9448_v23  ;;  %v7043_v57 = vld [vmem:[%s9664_s13 + $0xa8] sm:$0xff]  ;;  %v7049_v5 = vld [vmem:[%s9664_s13 + $0xd8] sm:$0xff] }
0x131c   :  { %v5877_v58 = vpop.f32.mrb[64].mxu1  ;;  %v8262_v59 = vpack.c.bf16 %v7043_v57, %v7042_v56 }
0x131d   :  { %v9513_v2 = vadd.f32 %v7029_v61, %v6321_v62  ;;  %v7903_v3 = vpop.f32.mrb[65].mxu1  ;;  %7907 = vmatmul.mubr.msk.f32.vlgmr.msra.gmra.mrb[72].mxu0 %vm1238_vm3, %v5877_v58  ;;  %v7045_v62 = vld [vmem:[%s9664_s13 + $0xb8] sm:$0xff] }
0x131e   :  { %7915 = vmatpush3.msra.mxu0 %v9328_v17  ;;  %7916 = vmatprep.mubr.msk.f32.mxu0 %vm8416_vm2, %v8415_v52  ;;  %v7047_v3 = vld [vmem:[%s9664_s13 + $0xc8] sm:$0xff] }
0x131f   :  { %v6333_v40 = vsel %vm154_vm1, %v9513_v2, 0.0  ;;  %7924 = vmatprep.subr.mxu0 %v8415_v52 }
0x1320   :  { %6334 = vadd.xlane.f32.xlu0 %v6333_v40  ;;  %v7048_v40 = vld [vmem:[%s9664_s13 + $0xd0] sm:$0xff] }
0x1321   :  { %7917 = vmatmul.mubr.msk.f32.vlgmr.msra.gmra.mrb[74].mxu0 %vm1238_vm3, %v5141_v4  ;;  %v8270_v4 = vpack.c.bf16 %v7047_v3, %v7046_v63 }
0x1322   :  { %7925 = vmatpush3.msra.mxu0 %v9382_v18  ;;  %7926 = vmatprep.mubr.msk.f32.mxu0 %vm8416_vm2, %v8415_v52 }
0x1325   :  { %7927 = vmatmul.mubr.msk.f32.vlgmr.msra.gmra.mrb[76].mxu0 %vm1238_vm3, %v5143_v29  ;;  %v8274_v29 = vpack.c.bf16 %v7049_v5, %v7048_v40  ;;  %v6677_v40 = vld [vmem:[%s9667_s16 + $0x8] sm:$0xff] }
0x1389   :  { %v6023_v17 = vpop.f32.mrb[66].mxu1 }
0x138a   :  { %v7913_v1 = vpop.f32.mrb[67].mxu1 }
0x138b   :  { %v7051_v1 = vld [vmem:[%s9664_s13 + $0xe8] sm:$0xff] }
0x13ad   :  { %v6335_v7 = vpop.xlane.xlu0 %6334 }
0x13ae   :  { %v6339_v8 = vmul.f32 0.03125, %v6335_v7 }
0x13b0   :  { %v6341_v10 = vsub.f32 %v9513_v2, %v6339_v8  ;;  %v7052_v8 = vld [vmem:[%s9664_s13 + $0xf0] sm:$0xff] }
0x13b2   :  { %v6343_v6 = vmul.f32 %v6341_v10, %v6341_v10 }
0x13b4   :  { %v6345_v28 = vsel %vm154_vm1, %v6343_v6, 0.0 }
0x13b5   :  { %6346 = vadd.xlane.f32.xlu0 %v6345_v28  ;;  %v7035_v28 = vld [vmem:[%s9663_s12 + $0x1] ss:$0 sm:$0xff] }
0x13f0   :  { %v5950_v12 = vpop.f32.mrb[72].mxu0 }
0x13f1   :  { %v6024_v35 = vadd.f32 %v6023_v17, %v5950_v12  ;;  %v7908_v18 = vpop.f32.mrb[73].mxu0  ;;  %v7050_v17 = vld [vmem:[%s9664_s13 + $0xe0] sm:$0xff] }
0x13f2   :  { %v8278_v7 = vpack.c.bf16 %v7051_v1, %v7050_v17  ;;  %v6678_v1 = vld [vmem:[%s9667_s16 + $0x10] sm:$0xff] }
0x13f4   :  { %v6096_v13 = vpop.f32.mrb[74].mxu0 }
0x13f5   :  { %v7918_v0 = vpop.f32.mrb[75].mxu0  ;;  %7922 = vmatmul.mubr.msk.f32.vlgmr.msra.gmra.mrb[68].mxu1 %vm1238_vm3, %v6096_v13 }
0x13f6   :  { %7930 = vmatpush3.msra.mxu1 %v9487_v53  ;;  %7931 = vmatprep.mubr.msk.f32.mxu1 %vm8416_vm2, %v8415_v52 }
0x13f7   :  { %8255 = vmatprep.subr.bf16.mxu1 %v8254_v45 }
0x13f8   :  { %v6243_v23 = vpop.f32.mrb[76].mxu0 }
0x13f9   :  { %v7928_v15 = vpop.f32.mrb[77].mxu0  ;;  %7932 = vmatmul.mubr.msk.f32.vlgmr.msra.gmra.mrb[70].mxu1 %vm1238_vm3, %v6243_v23 }
0x13fa   :  { %8257 = vmatpush3.bf16.msra.mxu1 %v8254_v45 }
0x13fb   :  { %8259 = vmatprep.subr.bf16.mxu1 %v8258_v54 }
0x13fe   :  { %8261 = vmatpush3.bf16.msra.mxu1 %v8258_v54 }
0x13ff   :  { %8263 = vmatprep.subr.bf16.mxu1 %v8262_v59 }
0x1402   :  { %8265 = vmatpush3.bf16.msra.mxu1 %v8262_v59 }
0x1442   :  { %v6347_v21 = vpop.xlane.xlu0 %6346 }
0x1443   :  { %v6351_v60 = vmul.f32 0.03125, %v6347_v21 }
0x1445   :  { %v6353_v22 = vadd.f32 1e-12, %v6351_v60 }
0x1447   :  { %8379 = vrsqrt.f32 %v6353_v22 }
0x1451   :  { %v8380_v42 = vpop.eup %8379 }
0x1452   :  { %v6357_v20 = vmul.f32 %v8380_v42, %v6341_v10  ;;  %v7053_v10 = vld [vmem:[%s9664_s13 + $0xf8] sm:$0xff] }
0x1453   :  { %v8282_v6 = vpack.c.bf16 %v7053_v10, %v7052_v8 }
0x1454   :  { %7942 = vmatprep.mubr.msk.f32.mxu0 %vm154_vm1, %v6357_v20 }
0x14c8   :  { %v6169_v24 = vpop.f32.mrb[68].mxu1 }
0x14c9   :  { %v6173_v55 = vadd.f32 %v6169_v24, %v6024_v35  ;;  %v7923_v26 = vpop.f32.mrb[69].mxu1 }
0x14cc   :  { %v6316_v25 = vpop.f32.mrb[70].mxu1 }
0x14cd   :  { %v6320_v19 = vadd.f32 %v6316_v25, %v6173_v55  ;;  %v7933_v14 = vpop.f32.mrb[71].mxu1 }
0x14cf   :  { %v6322_v30 = vadd.f32 %v6320_v19, %v9087_v27  ;;  %v7031_v27 = vld [vmem:[%s9662_s11 + $0x28] sm:$0xff] }
0x14d0   :  { %v8246_v9 = vpack.c.bf16 %v7031_v27, %v7030_v37 }
0x14d1   :  { %v9537_v31 = vadd.f32 %v7029_v61, %v6322_v30  ;;  %v7044_v61 = vld [vmem:[%s9664_s13 + $0xb0] sm:$0xff] }
0x14d2   :  { %8247 = vmatprep.subr.bf16.mxu0 %v8246_v9  ;;  %v8266_v58 = vpack.c.bf16 %v7045_v62, %v7044_v61 }
0x14d3   :  { %v6336_v32 = vsel %vm154_vm1, %v9537_v31, 0.0  ;;  %8249 = vmatpush3.bf16.msra.mxu0 %v8246_v9 }
0x14d4   :  { %6337 = vadd.xlane.f32.xlu1 %v6336_v32  ;;  %8251 = vmatprep.subr.bf16.mxu0 %v8250_v41 }
0x14d5   :  { %8267 = vmatprep.subr.bf16.mxu1 %v8266_v58 }
0x14d6   :  { %8269 = vmatpush3.bf16.msra.mxu1 %v8266_v58 }
0x14d7   :  { %8253 = vmatpush3.bf16.msra.mxu0 %v8250_v41  ;;  %8271 = vmatprep.subr.bf16.mxu1 %v8270_v4 }
0x14d8   :  { %8286 = vmatprep.subr.bf16.mxu0 %v8417_v50 }
0x14da   :  { %8273 = vmatpush3.bf16.msra.mxu1 %v8270_v4  ;;  %v6676_v4 = vld [vmem:[%s9667_s16] sm:$0xff] }
0x14db   :  { %8275 = vmatprep.subr.bf16.mxu1 %v8274_v29  ;;  %v8290_v17 = vpack.c.bf16 %v6677_v40, %v6676_v4 }
0x14de   :  { %8277 = vmatpush3.bf16.msra.mxu1 %v8274_v29  ;;  %v6601_v29 = vld [vmem:[%s9666_s15] sm:$0x3] }
0x14df   :  { %8279 = vmatprep.subr.bf16.mxu1 %v8278_v7 }
0x14e2   :  { %8281 = vmatpush3.bf16.msra.mxu1 %v8278_v7  ;;  %v6679_v7 = vld [vmem:[%s9667_s16 + $0x18] sm:$0xff]  ;;  %s8391_s16 = scalar_lea.vmem %s6769_s22, 32 }
0x14e3   :  { %8283 = vmatprep.subr.bf16.mxu1 %v8282_v6  ;;  %v8293_v8 = vpack.c.bf16 %v6679_v7, %v6678_v1  ;;  %p8392_p0 = scmp.ne.s32.totalorder %s6769_s22, %s8391_s16  ;;  %p8397_p2 = scmp.lt.s32.totalorder %s8391_s16, %s8391_s16 }
0x14e5   :  { %p8398_p3 = por %p8397_p2, %p8396_p1 }
0x14e6   :  { %8285 = vmatpush3.bf16.msra.mxu1 %v8282_v6 }
0x14e7   :  { %p8399_p4 = pnand %p8398_p3, %p8392_p0 }
0x1561   :  { %v6338_v33 = vpop.xlane.xlu1 %6337 }
0x1562   :  { %v6340_v36 = vmul.f32 0.03125, %v6338_v33 }
0x1564   :  { %v6342_v11 = vsub.f32 %v9537_v31, %v6340_v36 }
0x1566   :  { %v6344_v16 = vmul.f32 %v6342_v11, %v6342_v11 }
0x1568   :  { %v6348_v53 = vsel %vm154_vm1, %v6344_v16, 0.0  ;;  %v7055_v16 = vld [vmem:[%s9665_s14 + $0x1] ss:$0 sm:$0xff] }
0x1569   :  { %6349 = vadd.xlane.f32.xlu1 %v6348_v53 }
0x15f6   :  { %v6350_v46 = vpop.xlane.xlu1 %6349 }
0x15f7   :  { %v6352_v47 = vmul.f32 0.03125, %v6350_v46 }
0x15f9   :  { %v6354_v48 = vadd.f32 1e-12, %v6352_v47 }
0x15fb   :  { %8381 = vrsqrt.f32 %v6354_v48 }
0x1605   :  { %v8382_v34 = vpop.eup %8381 }
0x1606   :  { %v6358_v49 = vmul.f32 %v8382_v34, %v6342_v11 }
0x1608   :  { %7943 = vmatmul.mubr.msk.f32.vlgmr.msra.gmra.mrb[78].mxu0 %vm154_vm1, %v6358_v49 }
0x1609   :  { %7984 = vmatprep.mubr.msk.f32.mxu0 %vm8416_vm2, %v8415_v52 }
0x16db   :  { %v7944_v12 = vpop.f32.mrb[78].mxu0 }
0x16dc   :  { %v6450_v35 = vadd.f32 %v7944_v12, %v7035_v28  ;;  %v6444_v18 = vpop.f32.mrb[79].mxu0 }
0x16dd   :  { %v6445_v13 = vadd.f32 %v7035_v28, %v6444_v18  ;;  %v7057_v28 = vld [vmem:[%s9668_s17] ss:$0 sm:$0xff] }
0x16de   :  { %v6456_v0 = vmul.f32 0.044715, %v6450_v35  ;;  %v6454_v32 = vmul.f32 0.5, %v6450_v35 }
0x16df   :  { %v6455_v23 = vmul.f32 0.044715, %v6445_v13  ;;  %v6453_v14 = vmul.f32 0.5, %v6445_v13 }
0x16e0   :  { %v6458_v15 = vmul.f32 %v6456_v0, %v6450_v35 }
0x16e1   :  { %v6457_v21 = vmul.f32 %v6455_v23, %v6445_v13 }
0x16e2   :  { %v6460_v60 = vmul.f32 %v6458_v15, %v6450_v35 }
0x16e3   :  { %v6459_v22 = vmul.f32 %v6457_v21, %v6445_v13 }
0x16e4   :  { %v6462_v42 = vadd.f32 %v6460_v60, %v6450_v35 }
0x16e5   :  { %v6461_v20 = vadd.f32 %v6459_v22, %v6445_v13 }
0x16e6   :  { %v6464_v24 = vmul.f32 0.7978846, %v6462_v42 }
0x16e7   :  { %v6463_v55 = vmul.f32 0.7978846, %v6461_v20 }
0x16e8   :  { %8383 = vtanh.f32 %v6464_v24 }
0x16e9   :  { %8385 = vtanh.f32 %v6463_v55 }
0x16f2   :  { %v8384_v26 = vpop.eup %8383 }
0x16f3   :  { %v8386_v25 = vpop.eup %8385  ;;  %v6468_v19 = vadd.f32 1.0, %v8384_v26 }
0x16f4   :  { %v6467_v30 = vadd.f32 1.0, %v8386_v25 }
0x16f5   :  { %v6470_v36 = vmul.f32 %v6468_v19, %v6454_v32 }
0x16f6   :  { %v6469_v33 = vmul.f32 %v6467_v30, %v6453_v14 }
0x16f8   :  { %7977 = vmatprep.mubr.f32.mxu1 %v6469_v33 }
0x16f9   :  { %7978 = vmatmul.mubr.f32.vlgmr.msra.gmra.mrb[72].mxu1 %v6470_v36 }
0x17cc   :  { %v7979_v11 = vpop.f32.mrb[72].mxu1 }
0x17cd   :  { %v6564_v53 = vadd.f32 %v7979_v11, %v9537_v31  ;;  %v6554_v37 = vpop.f32.mrb[73].mxu1 }
0x17ce   :  { %v6563_v27 = vadd.f32 %v6554_v37, %v9513_v2 }
0x17cf   :  { %v6574_v38 = vadd.f32 %v7055_v16, %v6564_v53 }
0x17d0   :  { %v6573_v9 = vadd.f32 %v7055_v16, %v6563_v27 }
0x17d1   :  { %v6578_v39 = vsel %vm154_vm1, %v6574_v38, 0.0 }
0x17d2   :  { %6579 = vadd.xlane.f32.xlu1 %v6578_v39  ;;  %v6575_v41 = vsel %vm154_vm1, %v6573_v9, 0.0 }
0x17d3   :  { %6576 = vadd.xlane.f32.xlu0 %v6575_v41 }
0x185f   :  { %v6580_v43 = vpop.xlane.xlu1 %6579 }
0x1860   :  { %v6582_v44 = vmul.f32 0.03125, %v6580_v43  ;;  %v6577_v45 = vpop.xlane.xlu0 %6576 }
0x1861   :  { %v6581_v46 = vmul.f32 0.03125, %v6577_v45 }
0x1862   :  { %v6584_v47 = vsub.f32 %v6574_v38, %v6582_v44 }
0x1863   :  { %v6583_v48 = vsub.f32 %v6573_v9, %v6581_v46 }
0x1864   :  { %v6586_v34 = vmul.f32 %v6584_v47, %v6584_v47 }
0x1865   :  { %v6585_v49 = vmul.f32 %v6583_v48, %v6583_v48 }
0x1866   :  { %v6590_v31 = vsel %vm154_vm1, %v6586_v34, 0.0 }
0x1867   :  { %6591 = vadd.xlane.f32.xlu1 %v6590_v31  ;;  %v6587_v2 = vsel %vm154_vm1, %v6585_v49, 0.0 }
0x1868   :  { %6588 = vadd.xlane.f32.xlu0 %v6587_v2 }
0x18f4   :  { %v6592_v51 = vpop.xlane.xlu1 %6591 }
0x18f5   :  { %v6594_v54 = vmul.f32 0.03125, %v6592_v51  ;;  %v6589_v56 = vpop.xlane.xlu0 %6588 }
0x18f6   :  { %v6593_v57 = vmul.f32 0.03125, %v6589_v56 }
0x18f7   :  { %v6596_v59 = vadd.f32 1e-12, %v6594_v54 }
0x18f8   :  { %v6595_v61 = vadd.f32 1e-12, %v6593_v57 }
0x18f9   :  { %8387 = vrsqrt.f32 %v6596_v59 }
0x18fa   :  { %8389 = vrsqrt.f32 %v6595_v61 }
0x1903   :  { %v8388_v62 = vpop.eup %8387 }
0x1904   :  { %v8390_v63 = vpop.eup %8389  ;;  %v6600_v58 = vmul.f32 %v8388_v62, %v6584_v47 }
0x1905   :  { %v6599_v3 = vmul.f32 %v8390_v63, %v6583_v48 }
0x1907   :  { %v8287_v5 = vpack.c.bf16 %v6600_v58, %v6599_v3 }
0x1909   :  { %8288 = vmatpush3.bf16.msra.mxu0 %v8287_v5 }
0x190a   :  { %8289 = vmatprep.subr.bf16.mxu0 %v8417_v50 }
0x190c   :  { %7985 = vmatmul.mubr.msk.f32.vlgmr.msra.gmra.mrb[80].mxu0 %vm6602_vm4, %v6601_v29 }
0x190d   :  { %8291 = vmatpush3.bf16.msra.mxu0 %v8290_v17  ;;  %7995 = vmatprep.mubr.msk.f32.mxu0 %vm8416_vm2, %v8415_v52 }
0x190e   :  { %8292 = vmatprep.subr.bf16.mxu0 %v8417_v50 }
0x1911   :  { %8294 = vmatpush3.bf16.msra.mxu0 %v8293_v8 }
0x19df   :  { %v6672_v10 = vpop.f32.mrb[80].mxu0 }
0x19e0   :  { %v7986_v6 = vpop.f32.mrb[81].mxu0  ;;  %7996 = vmatmul.mubr.msk.f32.vlgmr.msra.gmra.mrb[82].mxu0 %vm154_vm1, %v6672_v10 }
0x1ab3   :  { %v6756_v12 = vpop.f32.mrb[82].mxu0 }
0x1ab4   :  { %v6757_v35 = vadd.f32 %v7057_v28, %v6756_v12  ;;  %v7997_v18 = vpop.f32.mrb[83].mxu0 }
0x1ab6   :  { %6761 = vst.msk [vmem:[#allocation2] sm:$0x3] %vm6760_vm5, %v6757_v35 }
0x1ab7   :  { %8402 = shalt.err (!%p8399_p4)
}
0x1ab8   :  { %s8403_s23 = scalar_lea.hbm %s9669_s18, 32 }
0x1ab9   :  { %p8404_p5 = scmp.ne.s32.totalorder %s9669_s18, %s8403_s23  ;;  %p8407_p6 = scmp.lt.u32.totalorder %s8403_s23, %s9669_s18 }
0x1abb   :  { %p8409_p7 = pnand %p8407_p6, %p8404_p5 }
0x1abd   :  { %8412 = shalt.err (!%p8409_p7)
}
0x1abe   :  { %6771 = dma.vmem_to_hbm [thread:$0]  %s6769_s22, 32, %s9669_s18, [#allocation3]  }
0x1abf   :  { %8413 = dma.done.wait [#allocation3], 32  }
0x1ac0   :  { %8414 = vsyncadd [#allocation3], 4294967264 }
0x1ac1   :  { %6775 = vsyncpa [#allocation3], 1 }

</bundles_post_ra>
